<compile_context>
chip_gen: v7x
topology: tpu7x:2x2x1
jax: 0.10.0
libtpu: 0.0.40
codegen_flags: <defaults>
</compile_context>

<pallas_src>
import functools

import jax
import jax.numpy as jnp
from jax.experimental import pallas as pl
from jax.experimental.pallas import tpu as pltpu

IGNORE_INDEX = -100
PAD_TOKEN_ID = 0
RMS_EPS = 1e-6
NEG_INF = -1e30        # f32-safe large negative; mask arithmetic stays in f32
VMEM_LIMIT = 48 * 1024 * 1024   # explicit scoped-VMEM budget (fits v7x 64MiB)


def _cp(*sem):
    return pltpu.CompilerParams(dimension_semantics=sem,
                                vmem_limit_bytes=VMEM_LIMIT)


def _snap(tile, dim):
    """Snap tile to dim for small toy dims; assert no silent tail truncation."""
    t = min(tile, dim)
    assert dim % t == 0, f"dim {dim} not divisible by tile {t}"
    return t


# ------------------- kernel 1: fused RMSNorm + matmul (QKV) -----------------

def _norm_matmul_kernel(x_ref, g_ref, w_ref, o_ref, xn_sc):
    # RMSNorm computed once per row tile (j == 0), reused for every col tile.
    @pl.when(pl.program_id(1) == 0)
    def _():
        x = x_ref[...].astype(jnp.float32)
        ms = jnp.mean(x * x, axis=-1, keepdims=True)
        xn_sc[...] = (x * jax.lax.rsqrt(ms + RMS_EPS)
                      * g_ref[...]).astype(jnp.bfloat16)

    o_ref[...] = jnp.dot(xn_sc[...], w_ref[...],
                         preferred_element_type=jnp.float32).astype(o_ref.dtype)


def norm_matmul(x, gamma, w, *, tm=256, tn=256, out_dtype=jnp.bfloat16):
    M, D = x.shape
    _, N = w.shape
    tm, tn = _snap(tm, M), _snap(tn, N)
    ce = pl.CostEstimate(flops=2 * M * D * N, transcendentals=0,
                         bytes_accessed=2 * (M * D + D * N + M * N))
    return pl.pallas_call(
        _norm_matmul_kernel,
        out_shape=jax.ShapeDtypeStruct((M, N), out_dtype),
        grid=(M // tm, N // tn),
        in_specs=[pl.BlockSpec((tm, D), lambda i, j: (i, 0)),
                  pl.BlockSpec((1, D), lambda i, j: (0, 0)),
                  pl.BlockSpec((D, tn), lambda i, j: (0, j))],
        out_specs=pl.BlockSpec((tm, tn), lambda i, j: (i, j)),
        scratch_shapes=[pltpu.VMEM((tm, D), jnp.bfloat16)],
        compiler_params=_cp("parallel", "arbitrary"),
        cost_estimate=ce,
    )(x, gamma.reshape(1, D), w)


# --------------- kernel 2: tiled matmul + fused residual add ----------------

def _matmul_residual_kernel(x_ref, w_ref, r_ref, o_ref, acc_ref):
    k = pl.program_id(2)

    @pl.when(k == 0)
    def _():
        acc_ref[...] = jnp.zeros_like(acc_ref)

    acc_ref[...] += jnp.dot(x_ref[...], w_ref[...],
                            preferred_element_type=jnp.float32)

    @pl.when(k == pl.num_programs(2) - 1)
    def _():
        o_ref[...] = (acc_ref[...]
                      + r_ref[...].astype(jnp.float32)).astype(o_ref.dtype)


def matmul_residual(x, w, res, *, tm=256, tn=256, tk=512):
    M, K = x.shape
    _, N = w.shape
    tm, tn, tk = _snap(tm, M), _snap(tn, N), _snap(tk, K)
    ce = pl.CostEstimate(flops=2 * M * K * N, transcendentals=0,
                         bytes_accessed=2 * (M * K + K * N + 2 * M * N))
    return pl.pallas_call(
        _matmul_residual_kernel,
        out_shape=jax.ShapeDtypeStruct((M, N), jnp.bfloat16),
        grid=(M // tm, N // tn, K // tk),
        in_specs=[pl.BlockSpec((tm, tk), lambda i, j, k: (i, k)),
                  pl.BlockSpec((tk, tn), lambda i, j, k: (k, j)),
                  pl.BlockSpec((tm, tn), lambda i, j, k: (i, j))],
        out_specs=pl.BlockSpec((tm, tn), lambda i, j, k: (i, j)),
        scratch_shapes=[pltpu.VMEM((tm, tn), jnp.float32)],
        compiler_params=_cp("parallel", "parallel", "arbitrary"),
        cost_estimate=ce,
    )(x, w, res)


# ----------------- kernel 3: flash attention (online softmax) ---------------

def _flash_attn_kernel(q_ref, k_ref, v_ref, mask_ref, o_ref,
                       q_sc, m_sc, l_sc, acc_sc, *, head_dim, tq, tkv):
    qi = pl.program_id(2)
    ki = pl.program_id(3)

    @pl.when(ki == 0)
    def _():
        scale = 1.0 / (head_dim ** 0.5)
        q_sc[...] = (q_ref[...].astype(jnp.float32) * scale).astype(jnp.bfloat16)
        m_sc[...] = jnp.full_like(m_sc, NEG_INF)
        l_sc[...] = jnp.zeros_like(l_sc)
        acc_sc[...] = jnp.zeros_like(acc_sc)

    # Skip kv tiles entirely above the causal diagonal (ki == 0 never skips,
    # so the scratch is always initialized before the finalize step).
    @pl.when(ki * tkv <= qi * tq + tq - 1)
    def _():
        s = jax.lax.dot_general(q_sc[...], k_ref[...],
                                (((1,), (1,)), ((), ())),
                                preferred_element_type=jnp.float32)  # [tq,tkv]
        # causal + key-padding mask from program ids (no [S,S] bias in HBM)
        q_pos = qi * tq + jax.lax.broadcasted_iota(jnp.int32, (tq, tkv), 0)
        k_pos = ki * tkv + jax.lax.broadcasted_iota(jnp.int32, (tq, tkv), 1)
        visible = (k_pos <= q_pos) & (mask_ref[...] > 0.5)
        s = jnp.where(visible, s, NEG_INF)

        m_new = jnp.maximum(m_sc[...], jnp.max(s, axis=-1, keepdims=True))
        alpha = jnp.exp(m_sc[...] - m_new)
        p = jnp.exp(s - m_new)
        l_sc[...] = alpha * l_sc[...] + jnp.sum(p, axis=-1, keepdims=True)
        acc_sc[...] = alpha * acc_sc[...] + jnp.dot(
            p.astype(v_ref.dtype), v_ref[...],
            preferred_element_type=jnp.float32)
        m_sc[...] = m_new

    @pl.when(ki == pl.num_programs(3) - 1)
    def _():
        # NOTE: fully-padded (left-pad) query rows end up as a uniform average
        # over keys; those rows are masked out as keys everywhere and carry
        # IGNORE labels, so the loss is unaffected.
        o_ref[...] = (acc_sc[...]
                      * pl.reciprocal(l_sc[...], approx=True)).astype(o_ref.dtype)


def flash_attention(qkv, mask3, *, num_heads, tq=512, tkv=512):
    """qkv: [B, S, 3*D] fused projection; returns [B, S, D] (D = H*Dh)."""
    B, S, threeD = qkv.shape
    D = threeD // 3
    head_dim = D // num_heads
    tq, tkv = _snap(tq, S), _snap(tkv, S)
    kernel = functools.partial(_flash_attn_kernel, head_dim=head_dim,
                               tq=tq, tkv=tkv)
    H = num_heads
    return pl.pallas_call(
        kernel,
        out_shape=jax.ShapeDtypeStruct((B, S, D), jnp.bfloat16),
        grid=(B, H, S // tq, S // tkv),
        in_specs=[
            # q/k/v tiles come straight out of the fused qkv tensor via
            # column-block indices: q head h -> h, k -> H+h, v -> 2H+h.
            pl.BlockSpec((None, tq, head_dim), lambda b, h, qi, ki: (b, qi, h)),
            pl.BlockSpec((None, tkv, head_dim),
                         lambda b, h, qi, ki: (b, ki, H + h)),
            pl.BlockSpec((None, tkv, head_dim),
                         lambda b, h, qi, ki: (b, ki, 2 * H + h)),
            pl.BlockSpec((None, 1, tkv), lambda b, h, qi, ki: (b, 0, ki)),
        ],
        out_specs=pl.BlockSpec((None, tq, head_dim),
                               lambda b, h, qi, ki: (b, qi, h)),
        scratch_shapes=[pltpu.VMEM((tq, head_dim), jnp.bfloat16),   # scaled q
                        pltpu.VMEM((tq, 1), jnp.float32),           # m
                        pltpu.VMEM((tq, 1), jnp.float32),           # l
                        pltpu.VMEM((tq, head_dim), jnp.float32)],   # acc
        compiler_params=_cp("parallel", "parallel", "parallel", "arbitrary"),
    )(qkv, qkv, qkv, mask3)


# -------- kernel 4: RMSNorm + SwiGLU + down-proj + residual (fused MLP) -----

def _mlp_kernel(x_ref, g_ref, wg_ref, wu_ref, wd_ref, o_ref, xn_sc, acc_ref):
    f = pl.program_id(1)

    @pl.when(f == 0)
    def _():
        x = x_ref[...].astype(jnp.float32)
        ms = jnp.mean(x * x, axis=-1, keepdims=True)
        xn_sc[...] = (x * jax.lax.rsqrt(ms + RMS_EPS)
                      * g_ref[...]).astype(jnp.bfloat16)
        acc_ref[...] = jnp.zeros_like(acc_ref)

    xn = xn_sc[...]
    g = jnp.dot(xn, wg_ref[...], preferred_element_type=jnp.float32)
    u = jnp.dot(xn, wu_ref[...], preferred_element_type=jnp.float32)
    act = (g * jax.nn.sigmoid(g) * u).astype(jnp.bfloat16)   # SiLU(gate) * up
    acc_ref[...] += jnp.dot(act, wd_ref[...],
                            preferred_element_type=jnp.float32)

    @pl.when(f == pl.num_programs(1) - 1)
    def _():
        o_ref[...] = (acc_ref[...]
                      + x_ref[...].astype(jnp.float32)).astype(o_ref.dtype)


def mlp_block(x, gamma, wg, wu, wd, *, tm=256, tf=512):
    M, D = x.shape
    _, F = wg.shape
    tm, tf = _snap(tm, M), _snap(tf, F)
    ce = pl.CostEstimate(flops=6 * M * D * F, transcendentals=M * F,
                         bytes_accessed=2 * (2 * M * D + 3 * D * F))
    return pl.pallas_call(
        _mlp_kernel,
        out_shape=jax.ShapeDtypeStruct((M, D), jnp.bfloat16),
        grid=(M // tm, F // tf),
        in_specs=[pl.BlockSpec((tm, D), lambda i, f: (i, 0)),
                  pl.BlockSpec((1, D), lambda i, f: (0, 0)),
                  pl.BlockSpec((D, tf), lambda i, f: (0, f)),
                  pl.BlockSpec((D, tf), lambda i, f: (0, f)),
                  pl.BlockSpec((tf, D), lambda i, f: (f, 0))],
        out_specs=pl.BlockSpec((tm, D), lambda i, f: (i, 0)),
        scratch_shapes=[pltpu.VMEM((tm, D), jnp.bfloat16),
                        pltpu.VMEM((tm, D), jnp.float32)],
        compiler_params=_cp("parallel", "arbitrary"),
        cost_estimate=ce,
    )(x, gamma.reshape(1, D), wg, wu, wd)


# ----- kernel 5: final RMSNorm + LM head + cross-entropy (vocab-streamed) ---

def _lmhead_ce_kernel(h_ref, g_ref, w_ref, lab_ref, loss_ref, cnt_ref,
                      xn_sc, m_sc, l_sc, t_sc, *, tv):
    j = pl.program_id(1)

    @pl.when(j == 0)
    def _():
        x = h_ref[...].astype(jnp.float32)
        ms = jnp.mean(x * x, axis=-1, keepdims=True)
        xn_sc[...] = (x * jax.lax.rsqrt(ms + RMS_EPS)
                      * g_ref[...]).astype(jnp.bfloat16)
        m_sc[...] = jnp.full_like(m_sc, NEG_INF)
        l_sc[...] = jnp.zeros_like(l_sc)
        t_sc[...] = jnp.zeros_like(t_sc)

    logits = jnp.dot(xn_sc[...], w_ref[...],
                     preferred_element_type=jnp.float32)        # [tm, tv]
    labels = lab_ref[...]                                       # [tm, 1] int32
    col = j * tv + jax.lax.broadcasted_iota(jnp.int32, logits.shape, 1)
    t_sc[...] += jnp.sum(jnp.where(col == labels, logits, 0.0),
                         axis=-1, keepdims=True)
    m_new = jnp.maximum(m_sc[...], jnp.max(logits, axis=-1, keepdims=True))
    l_sc[...] = (jnp.exp(m_sc[...] - m_new) * l_sc[...]
                 + jnp.sum(jnp.exp(logits - m_new), axis=-1, keepdims=True))
    m_sc[...] = m_new

    @pl.when(j == pl.num_programs(1) - 1)
    def _():
        valid = (labels != IGNORE_INDEX).astype(jnp.float32)
        loss_ref[...] = (jnp.log(l_sc[...]) + m_sc[...] - t_sc[...]) * valid
        cnt_ref[...] = valid


def lmhead_cross_entropy(h, gamma, w_lm, labels, *, tm=256, tv=512):
    M, D = h.shape
    _, V = w_lm.shape
    tm, tv = _snap(tm, M), _snap(tv, V)
    kernel = functools.partial(_lmhead_ce_kernel, tv=tv)
    ce = pl.CostEstimate(flops=2 * M * D * V, transcendentals=M * V,
                         bytes_accessed=2 * (M * D + D * V) + 8 * M)
    return pl.pallas_call(
        kernel,
        out_shape=(jax.ShapeDtypeStruct((M, 1), jnp.float32),
                   jax.ShapeDtypeStruct((M, 1), jnp.float32)),
        grid=(M // tm, V // tv),
        in_specs=[pl.BlockSpec((tm, D), lambda i, j: (i, 0)),
                  pl.BlockSpec((1, D), lambda i, j: (0, 0)),
                  pl.BlockSpec((D, tv), lambda i, j: (0, j)),
                  pl.BlockSpec((tm, 1), lambda i, j: (i, 0))],
        out_specs=(pl.BlockSpec((tm, 1), lambda i, j: (i, 0)),
                   pl.BlockSpec((tm, 1), lambda i, j: (i, 0))),
        scratch_shapes=[pltpu.VMEM((tm, D), jnp.bfloat16),
                        pltpu.VMEM((tm, 1), jnp.float32),
                        pltpu.VMEM((tm, 1), jnp.float32),
                        pltpu.VMEM((tm, 1), jnp.float32)],
        compiler_params=_cp("parallel", "arbitrary"),
        cost_estimate=ce,
    )(h, gamma.reshape(1, D), w_lm, labels)


# --------------------------- model / forward pass ---------------------------

def init_params(key, V, D, F, L):
    def rnd(k, shape):
        return 0.02 * jax.random.normal(k, shape, dtype=jnp.float32)

    ks = jax.random.split(key, 1 + L)
    emb = rnd(ks[0], (V, D))
    layers = []
    for l in range(L):
        lk = jax.random.split(ks[1 + l], 7)
        wqkv = jnp.concatenate([rnd(lk[0], (D, D)), rnd(lk[1], (D, D)),
                                rnd(lk[2], (D, D))], axis=1)
        layers.append(dict(
            attn_norm=jnp.ones((D,), jnp.float32),
            wqkv=wqkv.astype(jnp.bfloat16),
            wo=rnd(lk[3], (D, D)).astype(jnp.bfloat16),
            mlp_norm=jnp.ones((D,), jnp.float32),
            wg=rnd(lk[4], (D, F)).astype(jnp.bfloat16),
            wu=rnd(lk[5], (D, F)).astype(jnp.bfloat16),
            wd=rnd(lk[6], (F, D)).astype(jnp.bfloat16),
        ))
    return dict(emb=emb, layers=layers,
                final_norm=jnp.ones((D,), jnp.float32),
                lm_head=emb.T.astype(jnp.bfloat16))   # tied embeddings


def baseline_llm_loss(params, inputs_embeds, attention_mask, label_ids,
                      num_heads):
    B, S, D = inputs_embeds.shape
    M = B * S
    # residual stream kept in bf16 between kernels (f32 accumulation inside)
    h = inputs_embeds.astype(jnp.bfloat16).reshape(M, D)
    mask3 = attention_mask.reshape(B, 1, S).astype(jnp.float32)

    for layer in params['layers']:
        qkv = norm_matmul(h, layer['attn_norm'], layer['wqkv'])  # [M,3D] bf16
        attn = flash_attention(qkv.reshape(B, S, 3 * D), mask3,
                               num_heads=num_heads)              # [B,S,D] bf16
        h = matmul_residual(attn.reshape(M, D), layer['wo'], h)  # o-proj + res
        h = mlp_block(h, layer['mlp_norm'],
                      layer['wg'], layer['wu'], layer['wd'])     # MLP + res

    # HF causal-LM loss: position s predicts token s+1, ignore -100, mean.
    shift_labels = jnp.concatenate(
        [label_ids[:, 1:], jnp.full((B, 1), IGNORE_INDEX, jnp.int32)], axis=1)
    shift_labels = shift_labels.reshape(M, 1).astype(jnp.int32)

    row_loss, row_cnt = lmhead_cross_entropy(
        h, params['final_norm'], params['lm_head'], shift_labels)
    return jnp.sum(row_loss) / jnp.maximum(jnp.sum(row_cnt), 1.0)


# --------------------------------- driver -----------------------------------

if __name__ == "__main__":
    # 128-aligned model dims: D, H*Dh, F, V multiples of 128; Dh = 128.
    V, D, H, F, L = 512, 256, 2, 512, 2
    max_new_tokens = 4
    batch_size = 2

    key = jax.random.PRNGKey(0)
    pkey, dkey = jax.random.split(key)
    params = init_params(pkey, V, D, F, L)

    # Synthetic "tokenizer" output (fixed special-token ids, random body ids).
    bos_ids = [1, 2]          # stands in for BOS chat template
    eos_user_ids = [3, 4]     # stands in for EOS_USER
    eos_ids = [5]             # stands in for EOS
    prompt_lens = [8, 5]
    label_lens = [3, 6]       # second one exercises max_new_tokens truncation
    tks = jax.random.split(dkey, 2 * batch_size)
    prompts = [[int(t) for t in jax.random.randint(tks[i], (prompt_lens[i],), 6, V)]
               for i in range(batch_size)]
    labels_tok = [[int(t) for t in jax.random.randint(tks[batch_size + i],
                                                      (label_lens[i],), 6, V)]
                  for i in range(batch_size)]

    # Replicate BaselineLLM.forward batch assembly (token-id space; embedding
    # bos/pad ids is equivalent to concatenating bos_embeds / pad_embeds).
    batch_ids, batch_attn, batch_labels = [], [], []
    for i in range(batch_size):
        label_input_ids = labels_tok[i][:max_new_tokens] + eos_ids
        input_ids = bos_ids + prompts[i] + eos_user_ids + label_input_ids
        attn = [1] * len(input_ids)
        lab = [IGNORE_INDEX] * (len(input_ids) - len(label_input_ids)) \
              + label_input_ids
        batch_ids.append(input_ids)
        batch_attn.append(attn)
        batch_labels.append(lab)
    max_length = max(len(x) for x in batch_ids)
    for i in range(batch_size):
        pad = max_length - len(batch_ids[i])
        batch_ids[i] = [PAD_TOKEN_ID] * pad + batch_ids[i]        # left pad
        batch_attn[i] = [0] * pad + batch_attn[i]
        batch_labels[i] = [IGNORE_INDEX] * pad + batch_labels[i]

    input_ids = jnp.array(batch_ids, dtype=jnp.int32)             # [B, S]
    attention_mask = jnp.array(batch_attn, dtype=jnp.float32)     # [B, S]
    label_ids = jnp.array(batch_labels, dtype=jnp.int32)          # [B, S]

    inputs_embeds = jnp.take(params['emb'], input_ids, axis=0)    # [B, S, D]

    loss_fn = jax.jit(functools.partial(baseline_llm_loss, num_heads=H))
    loss = loss_fn(params, inputs_embeds, attention_mask, label_ids)
    loss = jax.block_until_ready(loss)
    assert bool(jnp.isfinite(loss)), "loss is not finite"
    print("KERNEL_OK")
</pallas_src>

<mosaic_0001>
module attributes {stable_mosaic.version = 11 : i64} {
  func.func @_matmul_residual_kernel(%arg0: i32, %arg1: i32, %arg2: i32, %arg3: memref<32x256xbf16, #tpu.memory_space<vmem>>, %arg4: memref<256x256xbf16, #tpu.memory_space<vmem>>, %arg5: memref<32x256xbf16, #tpu.memory_space<vmem>>, %arg6: memref<32x256xbf16, #tpu.memory_space<vmem>>, %arg7: memref<32x256xf32, #tpu.memory_space<vmem>>) attributes {dimension_semantics = [#tpu.dimension_semantics<parallel>, #tpu.dimension_semantics<parallel>, #tpu.dimension_semantics<arbitrary>], iteration_bounds = array<i64: 1, 1, 1>, scalar_prefetch = 0 : i64, scratch_operands = 1 : i64, tpu.core_type = #tpu.core_type<tc>, window_params = [{transform_indices = @transform_0, window_bounds = array<i64: 32, 256>}, {transform_indices = @transform_1, window_bounds = array<i64: 256, 256>}, {transform_indices = @transform_2, window_bounds = array<i64: 32, 256>}, {transform_indices = @transform_3, window_bounds = array<i64: 32, 256>}]} {
    %c0_i32 = arith.constant 0 : i32
    %0 = arith.cmpi eq, %arg2, %c0_i32 : i32
    %1 = arith.extui %0 : i1 to i32
    %c0_i32_0 = arith.constant 0 : i32
    %2 = arith.cmpi ne, %1, %c0_i32_0 : i32
    scf.if %2 {
      %cst_10 = arith.constant 0.000000e+00 : f32
      %12 = vector.broadcast %cst_10 : f32 to vector<32x256xf32>
      %c0_11 = arith.constant 0 : index
      %c0_12 = arith.constant 0 : index
      %13 = vector.load %arg7[%c0_11, %c0_12] : memref<32x256xf32, #tpu.memory_space<vmem>>, vector<32x256xf32>
      tpu.vector_store %arg7[%c0_11, %c0_12], %12 {strides = array<i32>} : memref<32x256xf32, #tpu.memory_space<vmem>>, vector<32x256xf32>,
    } else {
    }
    %c0 = arith.constant 0 : index
    %c0_1 = arith.constant 0 : index
    %3 = vector.load %arg7[%c0, %c0_1] : memref<32x256xf32, #tpu.memory_space<vmem>>, vector<32x256xf32>
    %c0_2 = arith.constant 0 : index
    %c0_3 = arith.constant 0 : index
    %4 = vector.load %arg3[%c0_2, %c0_3] : memref<32x256xbf16, #tpu.memory_space<vmem>>, vector<32x256xbf16>
    %c0_4 = arith.constant 0 : index
    %c0_5 = arith.constant 0 : index
    %5 = vector.load %arg4[%c0_4, %c0_5] : memref<256x256xbf16, #tpu.memory_space<vmem>>, vector<256x256xbf16>
    %cst = arith.constant dense<0.000000e+00> : vector<32x256xf32>
    %6 = tpu.matmul %4, %5, %cst {dimension_numbers = #tpu.dot_dimension_numbers<[1], [0], [0], [1], [0, 0, 1, 1], [], []>} : vector<32x256xbf16>, vector<256x256xbf16>, vector<32x256xf32> -> vector<32x256xf32>
    %7 = arith.addf %3, %6 : vector<32x256xf32>
    %c0_6 = arith.constant 0 : index
    %c0_7 = arith.constant 0 : index
    %8 = vector.load %arg7[%c0_6, %c0_7] : memref<32x256xf32, #tpu.memory_space<vmem>>, vector<32x256xf32>
    tpu.vector_store %arg7[%c0_6, %c0_7], %7 {strides = array<i32>} : memref<32x256xf32, #tpu.memory_space<vmem>>, vector<32x256xf32>,
    %c0_i32_8 = arith.constant 0 : i32
    %9 = arith.cmpi eq, %arg2, %c0_i32_8 : i32
    %10 = arith.extui %9 : i1 to i32
    %c0_i32_9 = arith.constant 0 : i32
    %11 = arith.cmpi ne, %10, %c0_i32_9 : i32
    scf.if %11 {
      %c0_10 = arith.constant 0 : index
      %c0_11 = arith.constant 0 : index
      %12 = vector.load %arg7[%c0_10, %c0_11] : memref<32x256xf32, #tpu.memory_space<vmem>>, vector<32x256xf32>
      %c0_12 = arith.constant 0 : index
      %c0_13 = arith.constant 0 : index
      %13 = vector.load %arg5[%c0_12, %c0_13] : memref<32x256xbf16, #tpu.memory_space<vmem>>, vector<32x256xbf16>
      %14 = arith.extf %13 : vector<32x256xbf16> to vector<32x256xf32>
      %15 = arith.addf %12, %14 : vector<32x256xf32>
      %16 = arith.truncf %15 : vector<32x256xf32> to vector<32x256xbf16>
      %c0_14 = arith.constant 0 : index
      %c0_15 = arith.constant 0 : index
      %17 = vector.load %arg6[%c0_14, %c0_15] : memref<32x256xbf16, #tpu.memory_space<vmem>>, vector<32x256xbf16>
      tpu.vector_store %arg6[%c0_14, %c0_15], %16 {strides = array<i32>} : memref<32x256xbf16, #tpu.memory_space<vmem>>, vector<32x256xbf16>,
    } else {
    }
    return
  }
  func.func @transform_0(%arg0: i32, %arg1: i32, %arg2: i32) -> (i32, i32) {
    %c0_i32 = arith.constant 0 : i32
    return %arg0, %arg2 : i32, i32
  }
  func.func @transform_1(%arg0: i32, %arg1: i32, %arg2: i32) -> (i32, i32) {
    %c0_i32 = arith.constant 0 : i32
    return %arg2, %arg1 : i32, i32
  }
  func.func @transform_2(%arg0: i32, %arg1: i32, %arg2: i32) -> (i32, i32) {
    %c0_i32 = arith.constant 0 : i32
    return %arg0, %arg1 : i32, i32
  }
  func.func @transform_3(%arg0: i32, %arg1: i32, %arg2: i32) -> (i32, i32) {
    %c0_i32 = arith.constant 0 : i32
    return %arg0, %arg1 : i32, i32
  }
}

module attributes {stable_mosaic.version = 11 : i64} {
  func.func @_norm_matmul_kernel(%arg0: i32, %arg1: i32, %arg2: memref<32x256xbf16, #tpu.memory_space<vmem>>, %arg3: memref<1x256xf32, #tpu.memory_space<vmem>>, %arg4: memref<256x256xbf16, #tpu.memory_space<vmem>>, %arg5: memref<32x256xbf16, #tpu.memory_space<vmem>>, %arg6: memref<32x256xbf16, #tpu.memory_space<vmem>>) attributes {dimension_semantics = [#tpu.dimension_semantics<parallel>, #tpu.dimension_semantics<arbitrary>], iteration_bounds = array<i64: 1, 3>, scalar_prefetch = 0 : i64, scratch_operands = 1 : i64, tpu.core_type = #tpu.core_type<tc>, window_params = [{transform_indices = @transform_0, window_bounds = array<i64: 32, 256>}, {pipeline_mode = #tpu.pipeline_mode<synchronous>, transform_indices = @transform_1, window_bounds = array<i64: 1, 256>}, {transform_indices = @transform_2, window_bounds = array<i64: 256, 256>}, {transform_indices = @transform_3, window_bounds = array<i64: 32, 256>}]} {
    %c0_i32 = arith.constant 0 : i32
    %0 = arith.cmpi eq, %arg1, %c0_i32 : i32
    %1 = arith.extui %0 : i1 to i32
    %c0_i32_0 = arith.constant 0 : i32
    %2 = arith.cmpi ne, %1, %c0_i32_0 : i32
    scf.if %2 {
      %c0_6 = arith.constant 0 : index
      %c0_7 = arith.constant 0 : index
      %8 = vector.load %arg2[%c0_6, %c0_7] : memref<32x256xbf16, #tpu.memory_space<vmem>>, vector<32x256xbf16>
      %9 = arith.extf %8 : vector<32x256xbf16> to vector<32x256xf32>
      %10 = arith.mulf %9, %9 : vector<32x256xf32>
      %cst_8 = arith.constant dense<0.000000e+00> : vector<32xf32>
      %11 = vector.multi_reduction <add>, %10, %cst_8 [1] : vector<32x256xf32> to vector<32xf32>
      %12 = vector.shape_cast %11 : vector<32xf32> to vector<32x1xf32>
      %cst_9 = arith.constant 2.560000e+02 : f32
      %13 = vector.broadcast %cst_9 : f32 to vector<32x1xf32>
      %14 = arith.divf %12, %13 : vector<32x1xf32>
      %cst_10 = arith.constant 9.99999997E-7 : f32
      %15 = vector.broadcast %cst_10 : f32 to vector<32x1xf32>
      %16 = arith.addf %14, %15 : vector<32x1xf32>
      %17 = math.rsqrt %16 : vector<32x1xf32>
      %18 = vector.broadcast %17 : vector<32x1xf32> to vector<32x256xf32>
      %19 = arith.mulf %9, %18 : vector<32x256xf32>
      %c0_11 = arith.constant 0 : index
      %c0_12 = arith.constant 0 : index
      %20 = vector.load %arg3[%c0_11, %c0_12] : memref<1x256xf32, #tpu.memory_space<vmem>>, vector<1x256xf32>
      %21 = vector.broadcast %20 : vector<1x256xf32> to vector<32x256xf32>
      %22 = arith.mulf %19, %21 : vector<32x256xf32>
      %23 = arith.truncf %22 : vector<32x256xf32> to vector<32x256xbf16>
      %c0_13 = arith.constant 0 : index
      %c0_14 = arith.constant 0 : index
      %24 = vector.load %arg6[%c0_13, %c0_14] : memref<32x256xbf16, #tpu.memory_space<vmem>>, vector<32x256xbf16>
      tpu.vector_store %arg6[%c0_13, %c0_14], %23 {strides = array<i32>} : memref<32x256xbf16, #tpu.memory_space<vmem>>, vector<32x256xbf16>,
    } else {
    }
    %c0 = arith.constant 0 : index
    %c0_1 = arith.constant 0 : index
    %3 = vector.load %arg6[%c0, %c0_1] : memref<32x256xbf16, #tpu.memory_space<vmem>>, vector<32x256xbf16>
    %c0_2 = arith.constant 0 : index
    %c0_3 = arith.constant 0 : index
    %4 = vector.load %arg4[%c0_2, %c0_3] : memref<256x256xbf16, #tpu.memory_space<vmem>>, vector<256x256xbf16>
    %cst = arith.constant dense<0.000000e+00> : vector<32x256xf32>
    %5 = tpu.matmul %3, %4, %cst {dimension_numbers = #tpu.dot_dimension_numbers<[1], [0], [0], [1], [0, 0, 1, 1], [], []>} : vector<32x256xbf16>, vector<256x256xbf16>, vector<32x256xf32> -> vector<32x256xf32>
    %6 = arith.truncf %5 : vector<32x256xf32> to vector<32x256xbf16>
    %c0_4 = arith.constant 0 : index
    %c0_5 = arith.constant 0 : index
    %7 = vector.load %arg5[%c0_4, %c0_5] : memref<32x256xbf16, #tpu.memory_space<vmem>>, vector<32x256xbf16>
    tpu.vector_store %arg5[%c0_4, %c0_5], %6 {strides = array<i32>} : memref<32x256xbf16, #tpu.memory_space<vmem>>, vector<32x256xbf16>,
    return
  }
  func.func @transform_0(%arg0: i32, %arg1: i32) -> (i32, i32) {
    %c0_i32 = arith.constant 0 : i32
    %c0_i32_0 = arith.constant 0 : i32
    return %arg0, %c0_i32 : i32, i32
  }
  func.func @transform_1(%arg0: i32, %arg1: i32) -> (i32, i32) {
    %c0_i32 = arith.constant 0 : i32
    %c0_i32_0 = arith.constant 0 : i32
    %c0_i32_1 = arith.constant 0 : i32
    return %c0_i32, %c0_i32_0 : i32, i32
  }
  func.func @transform_2(%arg0: i32, %arg1: i32) -> (i32, i32) {
    %c0_i32 = arith.constant 0 : i32
    %c0_i32_0 = arith.constant 0 : i32
    return %c0_i32, %arg1 : i32, i32
  }
  func.func @transform_3(%arg0: i32, %arg1: i32) -> (i32, i32) {
    %c0_i32 = arith.constant 0 : i32
    return %arg0, %arg1 : i32, i32
  }
}

module attributes {stable_mosaic.version = 11 : i64} {
  func.func @_flash_attn_kernel(%arg0: i32, %arg1: i32, %arg2: i32, %arg3: i32, %arg4: memref<1x16x128xbf16, #tpu.memory_space<vmem>>, %arg5: memref<1x16x128xbf16, #tpu.memory_space<vmem>>, %arg6: memref<1x16x128xbf16, #tpu.memory_space<vmem>>, %arg7: memref<1x1x16xf32, #tpu.memory_space<vmem>>, %arg8: memref<1x16x128xbf16, #tpu.memory_space<vmem>>, %arg9: memref<16x128xbf16, #tpu.memory_space<vmem>>, %arg10: memref<16x1xf32, #tpu.memory_space<vmem>>, %arg11: memref<16x1xf32, #tpu.memory_space<vmem>>, %arg12: memref<16x128xf32, #tpu.memory_space<vmem>>) attributes {dimension_semantics = [#tpu.dimension_semantics<parallel>, #tpu.dimension_semantics<parallel>, #tpu.dimension_semantics<parallel>, #tpu.dimension_semantics<arbitrary>], iteration_bounds = array<i64: 2, 2, 1, 1>, scalar_prefetch = 0 : i64, scratch_operands = 4 : i64, tpu.core_type = #tpu.core_type<tc>, window_params = [{transform_indices = @transform_0, window_bounds = array<i64: 1, 16, 128>}, {transform_indices = @transform_1, window_bounds = array<i64: 1, 16, 128>}, {transform_indices = @transform_2, window_bounds = array<i64: 1, 16, 128>}, {transform_indices = @transform_3, window_bounds = array<i64: 1, 1, 16>}, {transform_indices = @transform_4, window_bounds = array<i64: 1, 16, 128>}]} {
    %c0_i32 = arith.constant 0 : i32
    %0 = arith.cmpi eq, %arg3, %c0_i32 : i32
    %1 = arith.extui %0 : i1 to i32
    %c0_i32_0 = arith.constant 0 : i32
    %2 = arith.cmpi ne, %1, %c0_i32_0 : i32
    scf.if %2 {
      %c0 = arith.constant 0 : index
      %c0_6 = arith.constant 0 : index
      %c0_7 = arith.constant 0 : index
      %13 = vector.load %arg4[%c0, %c0_6, %c0_7] : memref<1x16x128xbf16, #tpu.memory_space<vmem>>, vector<1x16x128xbf16>
      %14 = vector.shape_cast %13 : vector<1x16x128xbf16> to vector<16x128xbf16>
      %15 = arith.extf %14 : vector<16x128xbf16> to vector<16x128xf32>
      %cst = arith.constant 0.0883883461 : f32
      %16 = vector.broadcast %cst : f32 to vector<16x128xf32>
      %17 = arith.mulf %15, %16 : vector<16x128xf32>
      %18 = arith.truncf %17 : vector<16x128xf32> to vector<16x128xbf16>
      %c0_8 = arith.constant 0 : index
      %c0_9 = arith.constant 0 : index
      %19 = vector.load %arg9[%c0_8, %c0_9] : memref<16x128xbf16, #tpu.memory_space<vmem>>, vector<16x128xbf16>
      tpu.vector_store %arg9[%c0_8, %c0_9], %18 {strides = array<i32>} : memref<16x128xbf16, #tpu.memory_space<vmem>>, vector<16x128xbf16>,
      %cst_10 = arith.constant -1.000000e+30 : f32
      %20 = vector.broadcast %cst_10 : f32 to vector<16x1xf32>
      %c0_11 = arith.constant 0 : index
      %c0_12 = arith.constant 0 : index
      %21 = vector.load %arg10[%c0_11, %c0_12] : memref<16x1xf32, #tpu.memory_space<vmem>>, vector<16x1xf32>
      tpu.vector_store %arg10[%c0_11, %c0_12], %20 {strides = array<i32>} : memref<16x1xf32, #tpu.memory_space<vmem>>, vector<16x1xf32>,
      %cst_13 = arith.constant 0.000000e+00 : f32
      %22 = vector.broadcast %cst_13 : f32 to vector<16x1xf32>
      %c0_14 = arith.constant 0 : index
      %c0_15 = arith.constant 0 : index
      %23 = vector.load %arg11[%c0_14, %c0_15] : memref<16x1xf32, #tpu.memory_space<vmem>>, vector<16x1xf32>
      tpu.vector_store %arg11[%c0_14, %c0_15], %22 {strides = array<i32>} : memref<16x1xf32, #tpu.memory_space<vmem>>, vector<16x1xf32>,
      %cst_16 = arith.constant 0.000000e+00 : f32
      %24 = vector.broadcast %cst_16 : f32 to vector<16x128xf32>
      %c0_17 = arith.constant 0 : index
      %c0_18 = arith.constant 0 : index
      %25 = vector.load %arg12[%c0_17, %c0_18] : memref<16x128xf32, #tpu.memory_space<vmem>>, vector<16x128xf32>
      tpu.vector_store %arg12[%c0_17, %c0_18], %24 {strides = array<i32>} : memref<16x128xf32, #tpu.memory_space<vmem>>, vector<16x128xf32>,
    } else {
    }
    %c16_i32 = arith.constant 16 : i32
    %3 = arith.muli %arg3, %c16_i32 : i32
    %c16_i32_1 = arith.constant 16 : i32
    %4 = arith.muli %arg2, %c16_i32_1 : i32
    %c16_i32_2 = arith.constant 16 : i32
    %5 = arith.addi %4, %c16_i32_2 : i32
    %c1_i32 = arith.constant 1 : i32
    %6 = arith.subi %5, %c1_i32 : i32
    %7 = arith.cmpi sle, %3, %6 : i32
    %8 = arith.extui %7 : i1 to i32
    %c0_i32_3 = arith.constant 0 : i32
    %9 = arith.cmpi ne, %8, %c0_i32_3 : i32
    scf.if %9 {
      %c0 = arith.constant 0 : index
      %c0_6 = arith.constant 0 : index
      %13 = vector.load %arg9[%c0, %c0_6] : memref<16x128xbf16, #tpu.memory_space<vmem>>, vector<16x128xbf16>
      %c0_7 = arith.constant 0 : index
      %c0_8 = arith.constant 0 : index
      %c0_9 = arith.constant 0 : index
      %14 = vector.load %arg5[%c0_7, %c0_8, %c0_9] : memref<1x16x128xbf16, #tpu.memory_space<vmem>>, vector<1x16x128xbf16>
      %15 = vector.shape_cast %14 : vector<1x16x128xbf16> to vector<16x128xbf16>
      %cst = arith.constant dense<0.000000e+00> : vector<16x16xf32>
      %16 = tpu.matmul %13, %15, %cst {dimension_numbers = #tpu.dot_dimension_numbers<[1], [1], [0], [0], [0, 0, 1, 0], [], []>} : vector<16x128xbf16>, vector<16x128xbf16>, vector<16x16xf32> -> vector<16x16xf32>
      %c16_i32_10 = arith.constant 16 : i32
      %17 = arith.muli %arg2, %c16_i32_10 : i32
      %18 = tpu.iota {dimensions = array<i32: 0>} : vector<16x16xi32>
      %19 = vector.broadcast %17 : i32 to vector<16x16xi32>
      %20 = arith.addi %19, %18 : vector<16x16xi32>
      %c16_i32_11 = arith.constant 16 : i32
      %21 = arith.muli %arg3, %c16_i32_11 : i32
      %22 = tpu.iota {dimensions = array<i32: 1>} : vector<16x16xi32>
      %23 = vector.broadcast %21 : i32 to vector<16x16xi32>
      %24 = arith.addi %23, %22 : vector<16x16xi32>
      %25 = arith.cmpi sle, %24, %20 : vector<16x16xi32>
      %c0_12 = arith.constant 0 : index
      %c0_13 = arith.constant 0 : index
      %c0_14 = arith.constant 0 : index
      %26 = vector.load %arg7[%c0_12, %c0_13, %c0_14] : memref<1x1x16xf32, #tpu.memory_space<vmem>>, vector<1x1x16xf32>
      %27 = vector.shape_cast %26 : vector<1x1x16xf32> to vector<1x16xf32>
      %cst_15 = arith.constant 5.000000e-01 : f32
      %28 = vector.broadcast %cst_15 : f32 to vector<1x16xf32>
      %29 = arith.cmpf ogt, %27, %28 : vector<1x16xf32>
      %30 = vector.broadcast %29 : vector<1x16xi1> to vector<16x16xi1>
      %31 = arith.andi %25, %30 : vector<16x16xi1>
      %cst_16 = arith.constant -1.000000e+30 : f32
      %32 = vector.broadcast %cst_16 : f32 to vector<16x16xf32>
      %33 = arith.select %31, %16, %32 : vector<16x16xi1>, vector<16x16xf32>
      %c0_17 = arith.constant 0 : index
      %c0_18 = arith.constant 0 : index
      %34 = vector.load %arg10[%c0_17, %c0_18] : memref<16x1xf32, #tpu.memory_space<vmem>>, vector<16x1xf32>
      %cst_19 = arith.constant dense<0xFF800000> : vector<16xf32>
      %35 = vector.multi_reduction <maximumf>, %33, %cst_19 [1] : vector<16x16xf32> to vector<16xf32>
      %36 = vector.shape_cast %35 : vector<16xf32> to vector<16x1xf32>
      %37 = arith.maximumf %34, %36 : vector<16x1xf32>
      %c0_20 = arith.constant 0 : index
      %c0_21 = arith.constant 0 : index
      %38 = vector.load %arg10[%c0_20, %c0_21] : memref<16x1xf32, #tpu.memory_space<vmem>>, vector<16x1xf32>
      %39 = arith.subf %38, %37 : vector<16x1xf32>
      %40 = math.exp %39 : vector<16x1xf32>
      %41 = vector.broadcast %37 : vector<16x1xf32> to vector<16x16xf32>
      %42 = arith.subf %33, %41 : vector<16x16xf32>
      %43 = math.exp %42 : vector<16x16xf32>
      %c0_22 = arith.constant 0 : index
      %c0_23 = arith.constant 0 : index
      %44 = vector.load %arg11[%c0_22, %c0_23] : memref<16x1xf32, #tpu.memory_space<vmem>>, vector<16x1xf32>
      %45 = arith.mulf %40, %44 : vector<16x1xf32>
      %cst_24 = arith.constant dense<0.000000e+00> : vector<16xf32>
      %46 = vector.multi_reduction <add>, %43, %cst_24 [1] : vector<16x16xf32> to vector<16xf32>
      %47 = vector.shape_cast %46 : vector<16xf32> to vector<16x1xf32>
      %48 = arith.addf %45, %47 : vector<16x1xf32>
      %c0_25 = arith.constant 0 : index
      %c0_26 = arith.constant 0 : index
      %49 = vector.load %arg11[%c0_25, %c0_26] : memref<16x1xf32, #tpu.memory_space<vmem>>, vector<16x1xf32>
      tpu.vector_store %arg11[%c0_25, %c0_26], %48 {strides = array<i32>} : memref<16x1xf32, #tpu.memory_space<vmem>>, vector<16x1xf32>,
      %c0_27 = arith.constant 0 : index
      %c0_28 = arith.constant 0 : index
      %50 = vector.load %arg12[%c0_27, %c0_28] : memref<16x128xf32, #tpu.memory_space<vmem>>, vector<16x128xf32>
      %51 = vector.broadcast %40 : vector<16x1xf32> to vector<16x128xf32>
      %52 = arith.mulf %51, %50 : vector<16x128xf32>
      %53 = arith.truncf %43 : vector<16x16xf32> to vector<16x16xbf16>
      %c0_29 = arith.constant 0 : index
      %c0_30 = arith.constant 0 : index
      %c0_31 = arith.constant 0 : index
      %54 = vector.load %arg6[%c0_29, %c0_30, %c0_31] : memref<1x16x128xbf16, #tpu.memory_space<vmem>>, vector<1x16x128xbf16>
      %55 = vector.shape_cast %54 : vector<1x16x128xbf16> to vector<16x128xbf16>
      %cst_32 = arith.constant dense<0.000000e+00> : vector<16x128xf32>
      %56 = tpu.matmul %53, %55, %cst_32 {dimension_numbers = #tpu.dot_dimension_numbers<[1], [0], [0], [1], [0, 0, 1, 1], [], []>} : vector<16x16xbf16>, vector<16x128xbf16>, vector<16x128xf32> -> vector<16x128xf32>
      %57 = arith.addf %52, %56 : vector<16x128xf32>
      %c0_33 = arith.constant 0 : index
      %c0_34 = arith.constant 0 : index
      %58 = vector.load %arg12[%c0_33, %c0_34] : memref<16x128xf32, #tpu.memory_space<vmem>>, vector<16x128xf32>
      tpu.vector_store %arg12[%c0_33, %c0_34], %57 {strides = array<i32>} : memref<16x128xf32, #tpu.memory_space<vmem>>, vector<16x128xf32>,
      %c0_35 = arith.constant 0 : index
      %c0_36 = arith.constant 0 : index
      %59 = vector.load %arg10[%c0_35, %c0_36] : memref<16x1xf32, #tpu.memory_space<vmem>>, vector<16x1xf32>
      tpu.vector_store %arg10[%c0_35, %c0_36], %37 {strides = array<i32>} : memref<16x1xf32, #tpu.memory_space<vmem>>, vector<16x1xf32>,
    } else {
    }
    %c0_i32_4 = arith.constant 0 : i32
    %10 = arith.cmpi eq, %arg3, %c0_i32_4 : i32
    %11 = arith.extui %10 : i1 to i32
    %c0_i32_5 = arith.constant 0 : i32
    %12 = arith.cmpi ne, %11, %c0_i32_5 : i32
    scf.if %12 {
      %c0 = arith.constant 0 : index
      %c0_6 = arith.constant 0 : index
      %13 = vector.load %arg12[%c0, %c0_6] : memref<16x128xf32, #tpu.memory_space<vmem>>, vector<16x128xf32>
      %c0_7 = arith.constant 0 : index
      %c0_8 = arith.constant 0 : index
      %14 = vector.load %arg11[%c0_7, %c0_8] : memref<16x1xf32, #tpu.memory_space<vmem>>, vector<16x1xf32>
      %15 = tpu.reciprocal %14 {approx = true} : vector<16x1xf32> -> vector<16x1xf32>
      %16 = vector.broadcast %15 : vector<16x1xf32> to vector<16x128xf32>
      %17 = arith.mulf %13, %16 : vector<16x128xf32>
      %18 = arith.truncf %17 : vector<16x128xf32> to vector<16x128xbf16>
      %c0_9 = arith.constant 0 : index
      %c0_10 = arith.constant 0 : index
      %c0_11 = arith.constant 0 : index
      %19 = vector.load %arg8[%c0_9, %c0_10, %c0_11] : memref<1x16x128xbf16, #tpu.memory_space<vmem>>, vector<1x16x128xbf16>
      %20 = vector.shape_cast %19 : vector<1x16x128xbf16> to vector<16x128xbf16>
      %21 = vector.shape_cast %18 : vector<16x128xbf16> to vector<1x16x128xbf16>
      tpu.vector_store %arg8[%c0_9, %c0_10, %c0_11], %21 {strides = array<i32>} : memref<1x16x128xbf16, #tpu.memory_space<vmem>>, vector<1x16x128xbf16>,
    } else {
    }
    return
  }
  func.func @transform_0(%arg0: i32, %arg1: i32, %arg2: i32, %arg3: i32) -> (i32, i32, i32) {
    %c0_i32 = arith.constant 0 : i32
    return %arg0, %arg2, %arg1 : i32, i32, i32
  }
  func.func @transform_1(%arg0: i32, %arg1: i32, %arg2: i32, %arg3: i32) -> (i32, i32, i32) {
    %c2_i32 = arith.constant 2 : i32
    %0 = arith.addi %c2_i32, %arg1 : i32
    %c0_i32 = arith.constant 0 : i32
    return %arg0, %arg3, %0 : i32, i32, i32
  }
  func.func @transform_2(%arg0: i32, %arg1: i32, %arg2: i32, %arg3: i32) -> (i32, i32, i32) {
    %c4_i32 = arith.constant 4 : i32
    %0 = arith.addi %c4_i32, %arg1 : i32
    %c0_i32 = arith.constant 0 : i32
    return %arg0, %arg3, %0 : i32, i32, i32
  }
  func.func @transform_3(%arg0: i32, %arg1: i32, %arg2: i32, %arg3: i32) -> (i32, i32, i32) {
    %c0_i32 = arith.constant 0 : i32
    %c0_i32_0 = arith.constant 0 : i32
    return %arg0, %c0_i32, %arg3 : i32, i32, i32
  }
  func.func @transform_4(%arg0: i32, %arg1: i32, %arg2: i32, %arg3: i32) -> (i32, i32, i32) {
    %c0_i32 = arith.constant 0 : i32
    return %arg0, %arg2, %arg1 : i32, i32, i32
  }
}

module attributes {stable_mosaic.version = 11 : i64} {
  func.func @_mlp_kernel(%arg0: i32, %arg1: i32, %arg2: memref<32x256xbf16, #tpu.memory_space<vmem>>, %arg3: memref<1x256xf32, #tpu.memory_space<vmem>>, %arg4: memref<256x512xbf16, #tpu.memory_space<vmem>>, %arg5: memref<256x512xbf16, #tpu.memory_space<vmem>>, %arg6: memref<512x256xbf16, #tpu.memory_space<vmem>>, %arg7: memref<32x256xbf16, #tpu.memory_space<vmem>>, %arg8: memref<32x256xbf16, #tpu.memory_space<vmem>>, %arg9: memref<32x256xf32, #tpu.memory_space<vmem>>) attributes {dimension_semantics = [#tpu.dimension_semantics<parallel>, #tpu.dimension_semantics<arbitrary>], iteration_bounds = array<i64: 1, 1>, scalar_prefetch = 0 : i64, scratch_operands = 2 : i64, tpu.core_type = #tpu.core_type<tc>, window_params = [{transform_indices = @transform_0, window_bounds = array<i64: 32, 256>}, {pipeline_mode = #tpu.pipeline_mode<synchronous>, transform_indices = @transform_1, window_bounds = array<i64: 1, 256>}, {transform_indices = @transform_2, window_bounds = array<i64: 256, 512>}, {transform_indices = @transform_3, window_bounds = array<i64: 256, 512>}, {transform_indices = @transform_4, window_bounds = array<i64: 512, 256>}, {transform_indices = @transform_5, window_bounds = array<i64: 32, 256>}]} {
    %c0_i32 = arith.constant 0 : i32
    %0 = arith.cmpi eq, %arg1, %c0_i32 : i32
    %1 = arith.extui %0 : i1 to i32
    %c0_i32_0 = arith.constant 0 : i32
    %2 = arith.cmpi ne, %1, %c0_i32_0 : i32
    scf.if %2 {
      %c0_17 = arith.constant 0 : index
      %c0_18 = arith.constant 0 : index
      %24 = vector.load %arg2[%c0_17, %c0_18] : memref<32x256xbf16, #tpu.memory_space<vmem>>, vector<32x256xbf16>
      %25 = arith.extf %24 : vector<32x256xbf16> to vector<32x256xf32>
      %26 = arith.mulf %25, %25 : vector<32x256xf32>
      %cst_19 = arith.constant dense<0.000000e+00> : vector<32xf32>
      %27 = vector.multi_reduction <add>, %26, %cst_19 [1] : vector<32x256xf32> to vector<32xf32>
      %28 = vector.shape_cast %27 : vector<32xf32> to vector<32x1xf32>
      %cst_20 = arith.constant 2.560000e+02 : f32
      %29 = vector.broadcast %cst_20 : f32 to vector<32x1xf32>
      %30 = arith.divf %28, %29 : vector<32x1xf32>
      %cst_21 = arith.constant 9.99999997E-7 : f32
      %31 = vector.broadcast %cst_21 : f32 to vector<32x1xf32>
      %32 = arith.addf %30, %31 : vector<32x1xf32>
      %33 = math.rsqrt %32 : vector<32x1xf32>
      %34 = vector.broadcast %33 : vector<32x1xf32> to vector<32x256xf32>
      %35 = arith.mulf %25, %34 : vector<32x256xf32>
      %c0_22 = arith.constant 0 : index
      %c0_23 = arith.constant 0 : index
      %36 = vector.load %arg3[%c0_22, %c0_23] : memref<1x256xf32, #tpu.memory_space<vmem>>, vector<1x256xf32>
      %37 = vector.broadcast %36 : vector<1x256xf32> to vector<32x256xf32>
      %38 = arith.mulf %35, %37 : vector<32x256xf32>
      %39 = arith.truncf %38 : vector<32x256xf32> to vector<32x256xbf16>
      %c0_24 = arith.constant 0 : index
      %c0_25 = arith.constant 0 : index
      %40 = vector.load %arg8[%c0_24, %c0_25] : memref<32x256xbf16, #tpu.memory_space<vmem>>, vector<32x256xbf16>
      tpu.vector_store %arg8[%c0_24, %c0_25], %39 {strides = array<i32>} : memref<32x256xbf16, #tpu.memory_space<vmem>>, vector<32x256xbf16>,
      %cst_26 = arith.constant 0.000000e+00 : f32
      %41 = vector.broadcast %cst_26 : f32 to vector<32x256xf32>
      %c0_27 = arith.constant 0 : index
      %c0_28 = arith.constant 0 : index
      %42 = vector.load %arg9[%c0_27, %c0_28] : memref<32x256xf32, #tpu.memory_space<vmem>>, vector<32x256xf32>
      tpu.vector_store %arg9[%c0_27, %c0_28], %41 {strides = array<i32>} : memref<32x256xf32, #tpu.memory_space<vmem>>, vector<32x256xf32>,
    } else {
    }
    %c0 = arith.constant 0 : index
    %c0_1 = arith.constant 0 : index
    %3 = vector.load %arg8[%c0, %c0_1] : memref<32x256xbf16, #tpu.memory_space<vmem>>, vector<32x256xbf16>
    %c0_2 = arith.constant 0 : index
    %c0_3 = arith.constant 0 : index
    %4 = vector.load %arg4[%c0_2, %c0_3] : memref<256x512xbf16, #tpu.memory_space<vmem>>, vector<256x512xbf16>
    %cst = arith.constant dense<0.000000e+00> : vector<32x512xf32>
    %5 = tpu.matmul %3, %4, %cst {dimension_numbers = #tpu.dot_dimension_numbers<[1], [0], [0], [1], [0, 0, 1, 1], [], []>} : vector<32x256xbf16>, vector<256x512xbf16>, vector<32x512xf32> -> vector<32x512xf32>
    %c0_4 = arith.constant 0 : index
    %c0_5 = arith.constant 0 : index
    %6 = vector.load %arg5[%c0_4, %c0_5] : memref<256x512xbf16, #tpu.memory_space<vmem>>, vector<256x512xbf16>
    %cst_6 = arith.constant dense<0.000000e+00> : vector<32x512xf32>
    %7 = tpu.matmul %3, %6, %cst_6 {dimension_numbers = #tpu.dot_dimension_numbers<[1], [0], [0], [1], [0, 0, 1, 1], [], []>} : vector<32x256xbf16>, vector<256x512xbf16>, vector<32x512xf32> -> vector<32x512xf32>
    %8 = arith.negf %5 : vector<32x512xf32>
    %9 = math.exp %8 : vector<32x512xf32>
    %cst_7 = arith.constant 1.000000e+00 : f32
    %10 = vector.broadcast %cst_7 : f32 to vector<32x512xf32>
    %11 = arith.addf %10, %9 : vector<32x512xf32>
    %12 = arith.divf %10, %11 : vector<32x512xf32>
    %13 = arith.mulf %5, %12 : vector<32x512xf32>
    %14 = arith.mulf %13, %7 : vector<32x512xf32>
    %15 = arith.truncf %14 : vector<32x512xf32> to vector<32x512xbf16>
    %c0_8 = arith.constant 0 : index
    %c0_9 = arith.constant 0 : index
    %16 = vector.load %arg9[%c0_8, %c0_9] : memref<32x256xf32, #tpu.memory_space<vmem>>, vector<32x256xf32>
    %c0_10 = arith.constant 0 : index
    %c0_11 = arith.constant 0 : index
    %17 = vector.load %arg6[%c0_10, %c0_11] : memref<512x256xbf16, #tpu.memory_space<vmem>>, vector<512x256xbf16>
    %cst_12 = arith.constant dense<0.000000e+00> : vector<32x256xf32>
    %18 = tpu.matmul %15, %17, %cst_12 {dimension_numbers = #tpu.dot_dimension_numbers<[1], [0], [0], [1], [0, 0, 1, 1], [], []>} : vector<32x512xbf16>, vector<512x256xbf16>, vector<32x256xf32> -> vector<32x256xf32>
    %19 = arith.addf %16, %18 : vector<32x256xf32>
    %c0_13 = arith.constant 0 : index
    %c0_14 = arith.constant 0 : index
    %20 = vector.load %arg9[%c0_13, %c0_14] : memref<32x256xf32, #tpu.memory_space<vmem>>, vector<32x256xf32>
    tpu.vector_store %arg9[%c0_13, %c0_14], %19 {strides = array<i32>} : memref<32x256xf32, #tpu.memory_space<vmem>>, vector<32x256xf32>,
    %c0_i32_15 = arith.constant 0 : i32
    %21 = arith.cmpi eq, %arg1, %c0_i32_15 : i32
    %22 = arith.extui %21 : i1 to i32
    %c0_i32_16 = arith.constant 0 : i32
    %23 = arith.cmpi ne, %22, %c0_i32_16 : i32
    scf.if %23 {
      %c0_17 = arith.constant 0 : index
      %c0_18 = arith.constant 0 : index
      %24 = vector.load %arg9[%c0_17, %c0_18] : memref<32x256xf32, #tpu.memory_space<vmem>>, vector<32x256xf32>
      %c0_19 = arith.constant 0 : index
      %c0_20 = arith.constant 0 : index
      %25 = vector.load %arg2[%c0_19, %c0_20] : memref<32x256xbf16, #tpu.memory_space<vmem>>, vector<32x256xbf16>
      %26 = arith.extf %25 : vector<32x256xbf16> to vector<32x256xf32>
      %27 = arith.addf %24, %26 : vector<32x256xf32>
      %28 = arith.truncf %27 : vector<32x256xf32> to vector<32x256xbf16>
      %c0_21 = arith.constant 0 : index
      %c0_22 = arith.constant 0 : index
      %29 = vector.load %arg7[%c0_21, %c0_22] : memref<32x256xbf16, #tpu.memory_space<vmem>>, vector<32x256xbf16>
      tpu.vector_store %arg7[%c0_21, %c0_22], %28 {strides = array<i32>} : memref<32x256xbf16, #tpu.memory_space<vmem>>, vector<32x256xbf16>,
    } else {
    }
    return
  }
  func.func @transform_0(%arg0: i32, %arg1: i32) -> (i32, i32) {
    %c0_i32 = arith.constant 0 : i32
    %c0_i32_0 = arith.constant 0 : i32
    return %arg0, %c0_i32 : i32, i32
  }
  func.func @transform_1(%arg0: i32, %arg1: i32) -> (i32, i32) {
    %c0_i32 = arith.constant 0 : i32
    %c0_i32_0 = arith.constant 0 : i32
    %c0_i32_1 = arith.constant 0 : i32
    return %c0_i32, %c0_i32_0 : i32, i32
  }
  func.func @transform_2(%arg0: i32, %arg1: i32) -> (i32, i32) {
    %c0_i32 = arith.constant 0 : i32
    %c0_i32_0 = arith.constant 0 : i32
    return %c0_i32, %arg1 : i32, i32
  }
  func.func @transform_3(%arg0: i32, %arg1: i32) -> (i32, i32) {
    %c0_i32 = arith.constant 0 : i32
    %c0_i32_0 = arith.constant 0 : i32
    return %c0_i32, %arg1 : i32, i32
  }
  func.func @transform_4(%arg0: i32, %arg1: i32) -> (i32, i32) {
    %c0_i32 = arith.constant 0 : i32
    %c0_i32_0 = arith.constant 0 : i32
    return %arg1, %c0_i32 : i32, i32
  }
  func.func @transform_5(%arg0: i32, %arg1: i32) -> (i32, i32) {
    %c0_i32 = arith.constant 0 : i32
    %c0_i32_0 = arith.constant 0 : i32
    return %arg0, %c0_i32 : i32, i32
  }
}

module attributes {stable_mosaic.version = 11 : i64} {
  func.func @_norm_matmul_kernel(%arg0: i32, %arg1: i32, %arg2: memref<32x256xbf16, #tpu.memory_space<vmem>>, %arg3: memref<1x256xf32, #tpu.memory_space<vmem>>, %arg4: memref<256x256xbf16, #tpu.memory_space<vmem>>, %arg5: memref<32x256xbf16, #tpu.memory_space<vmem>>, %arg6: memref<32x256xbf16, #tpu.memory_space<vmem>>) attributes {dimension_semantics = [#tpu.dimension_semantics<parallel>, #tpu.dimension_semantics<arbitrary>], iteration_bounds = array<i64: 1, 3>, scalar_prefetch = 0 : i64, scratch_operands = 1 : i64, tpu.core_type = #tpu.core_type<tc>, window_params = [{transform_indices = @transform_0, window_bounds = array<i64: 32, 256>}, {pipeline_mode = #tpu.pipeline_mode<synchronous>, transform_indices = @transform_1, window_bounds = array<i64: 1, 256>}, {transform_indices = @transform_2, window_bounds = array<i64: 256, 256>}, {transform_indices = @transform_3, window_bounds = array<i64: 32, 256>}]} {
    %c0_i32 = arith.constant 0 : i32
    %0 = arith.cmpi eq, %arg1, %c0_i32 : i32
    %1 = arith.extui %0 : i1 to i32
    %c0_i32_0 = arith.constant 0 : i32
    %2 = arith.cmpi ne, %1, %c0_i32_0 : i32
    scf.if %2 {
      %c0_6 = arith.constant 0 : index
      %c0_7 = arith.constant 0 : index
      %8 = vector.load %arg2[%c0_6, %c0_7] : memref<32x256xbf16, #tpu.memory_space<vmem>>, vector<32x256xbf16>
      %9 = arith.extf %8 : vector<32x256xbf16> to vector<32x256xf32>
      %10 = arith.mulf %9, %9 : vector<32x256xf32>
      %cst_8 = arith.constant dense<0.000000e+00> : vector<32xf32>
      %11 = vector.multi_reduction <add>, %10, %cst_8 [1] : vector<32x256xf32> to vector<32xf32>
      %12 = vector.shape_cast %11 : vector<32xf32> to vector<32x1xf32>
      %cst_9 = arith.constant 2.560000e+02 : f32
      %13 = vector.broadcast %cst_9 : f32 to vector<32x1xf32>
      %14 = arith.divf %12, %13 : vector<32x1xf32>
      %cst_10 = arith.constant 9.99999997E-7 : f32
      %15 = vector.broadcast %cst_10 : f32 to vector<32x1xf32>
      %16 = arith.addf %14, %15 : vector<32x1xf32>
      %17 = math.rsqrt %16 : vector<32x1xf32>
      %18 = vector.broadcast %17 : vector<32x1xf32> to vector<32x256xf32>
      %19 = arith.mulf %9, %18 : vector<32x256xf32>
      %c0_11 = arith.constant 0 : index
      %c0_12 = arith.constant 0 : index
      %20 = vector.load %arg3[%c0_11, %c0_12] : memref<1x256xf32, #tpu.memory_space<vmem>>, vector<1x256xf32>
      %21 = vector.broadcast %20 : vector<1x256xf32> to vector<32x256xf32>
      %22 = arith.mulf %19, %21 : vector<32x256xf32>
      %23 = arith.truncf %22 : vector<32x256xf32> to vector<32x256xbf16>
      %c0_13 = arith.constant 0 : index
      %c0_14 = arith.constant 0 : index
      %24 = vector.load %arg6[%c0_13, %c0_14] : memref<32x256xbf16, #tpu.memory_space<vmem>>, vector<32x256xbf16>
      tpu.vector_store %arg6[%c0_13, %c0_14], %23 {strides = array<i32>} : memref<32x256xbf16, #tpu.memory_space<vmem>>, vector<32x256xbf16>,
    } else {
    }
    %c0 = arith.constant 0 : index
    %c0_1 = arith.constant 0 : index
    %3 = vector.load %arg6[%c0, %c0_1] : memref<32x256xbf16, #tpu.memory_space<vmem>>, vector<32x256xbf16>
    %c0_2 = arith.constant 0 : index
    %c0_3 = arith.constant 0 : index
    %4 = vector.load %arg4[%c0_2, %c0_3] : memref<256x256xbf16, #tpu.memory_space<vmem>>, vector<256x256xbf16>
    %cst = arith.constant dense<0.000000e+00> : vector<32x256xf32>
    %5 = tpu.matmul %3, %4, %cst {dimension_numbers = #tpu.dot_dimension_numbers<[1], [0], [0], [1], [0, 0, 1, 1], [], []>} : vector<32x256xbf16>, vector<256x256xbf16>, vector<32x256xf32> -> vector<32x256xf32>
    %6 = arith.truncf %5 : vector<32x256xf32> to vector<32x256xbf16>
    %c0_4 = arith.constant 0 : index
    %c0_5 = arith.constant 0 : index
    %7 = vector.load %arg5[%c0_4, %c0_5] : memref<32x256xbf16, #tpu.memory_space<vmem>>, vector<32x256xbf16>
    tpu.vector_store %arg5[%c0_4, %c0_5], %6 {strides = array<i32>} : memref<32x256xbf16, #tpu.memory_space<vmem>>, vector<32x256xbf16>,
    return
  }
  func.func @transform_0(%arg0: i32, %arg1: i32) -> (i32, i32) {
    %c0_i32 = arith.constant 0 : i32
    %c0_i32_0 = arith.constant 0 : i32
    return %arg0, %c0_i32 : i32, i32
  }
  func.func @transform_1(%arg0: i32, %arg1: i32) -> (i32, i32) {
    %c0_i32 = arith.constant 0 : i32
    %c0_i32_0 = arith.constant 0 : i32
    %c0_i32_1 = arith.constant 0 : i32
    return %c0_i32, %c0_i32_0 : i32, i32
  }
  func.func @transform_2(%arg0: i32, %arg1: i32) -> (i32, i32) {
    %c0_i32 = arith.constant 0 : i32
    %c0_i32_0 = arith.constant 0 : i32
    return %c0_i32, %arg1 : i32, i32
  }
  func.func @transform_3(%arg0: i32, %arg1: i32) -> (i32, i32) {
    %c0_i32 = arith.constant 0 : i32
    return %arg0, %arg1 : i32, i32
  }
}

module attributes {stable_mosaic.version = 11 : i64} {
  func.func @_matmul_residual_kernel(%arg0: i32, %arg1: i32, %arg2: i32, %arg3: memref<32x256xbf16, #tpu.memory_space<vmem>>, %arg4: memref<256x256xbf16, #tpu.memory_space<vmem>>, %arg5: memref<32x256xbf16, #tpu.memory_space<vmem>>, %arg6: memref<32x256xbf16, #tpu.memory_space<vmem>>, %arg7: memref<32x256xf32, #tpu.memory_space<vmem>>) attributes {dimension_semantics = [#tpu.dimension_semantics<parallel>, #tpu.dimension_semantics<parallel>, #tpu.dimension_semantics<arbitrary>], iteration_bounds = array<i64: 1, 1, 1>, scalar_prefetch = 0 : i64, scratch_operands = 1 : i64, tpu.core_type = #tpu.core_type<tc>, window_params = [{transform_indices = @transform_0, window_bounds = array<i64: 32, 256>}, {transform_indices = @transform_1, window_bounds = array<i64: 256, 256>}, {transform_indices = @transform_2, window_bounds = array<i64: 32, 256>}, {transform_indices = @transform_3, window_bounds = array<i64: 32, 256>}]} {
    %c0_i32 = arith.constant 0 : i32
    %0 = arith.cmpi eq, %arg2, %c0_i32 : i32
    %1 = arith.extui %0 : i1 to i32
    %c0_i32_0 = arith.constant 0 : i32
    %2 = arith.cmpi ne, %1, %c0_i32_0 : i32
    scf.if %2 {
      %cst_10 = arith.constant 0.000000e+00 : f32
      %12 = vector.broadcast %cst_10 : f32 to vector<32x256xf32>
      %c0_11 = arith.constant 0 : index
      %c0_12 = arith.constant 0 : index
      %13 = vector.load %arg7[%c0_11, %c0_12] : memref<32x256xf32, #tpu.memory_space<vmem>>, vector<32x256xf32>
      tpu.vector_store %arg7[%c0_11, %c0_12], %12 {strides = array<i32>} : memref<32x256xf32, #tpu.memory_space<vmem>>, vector<32x256xf32>,
    } else {
    }
    %c0 = arith.constant 0 : index
    %c0_1 = arith.constant 0 : index
    %3 = vector.load %arg7[%c0, %c0_1] : memref<32x256xf32, #tpu.memory_space<vmem>>, vector<32x256xf32>
    %c0_2 = arith.constant 0 : index
    %c0_3 = arith.constant 0 : index
    %4 = vector.load %arg3[%c0_2, %c0_3] : memref<32x256xbf16, #tpu.memory_space<vmem>>, vector<32x256xbf16>
    %c0_4 = arith.constant 0 : index
    %c0_5 = arith.constant 0 : index
    %5 = vector.load %arg4[%c0_4, %c0_5] : memref<256x256xbf16, #tpu.memory_space<vmem>>, vector<256x256xbf16>
    %cst = arith.constant dense<0.000000e+00> : vector<32x256xf32>
    %6 = tpu.matmul %4, %5, %cst {dimension_numbers = #tpu.dot_dimension_numbers<[1], [0], [0], [1], [0, 0, 1, 1], [], []>} : vector<32x256xbf16>, vector<256x256xbf16>, vector<32x256xf32> -> vector<32x256xf32>
    %7 = arith.addf %3, %6 : vector<32x256xf32>
    %c0_6 = arith.constant 0 : index
    %c0_7 = arith.constant 0 : index
    %8 = vector.load %arg7[%c0_6, %c0_7] : memref<32x256xf32, #tpu.memory_space<vmem>>, vector<32x256xf32>
    tpu.vector_store %arg7[%c0_6, %c0_7], %7 {strides = array<i32>} : memref<32x256xf32, #tpu.memory_space<vmem>>, vector<32x256xf32>,
    %c0_i32_8 = arith.constant 0 : i32
    %9 = arith.cmpi eq, %arg2, %c0_i32_8 : i32
    %10 = arith.extui %9 : i1 to i32
    %c0_i32_9 = arith.constant 0 : i32
    %11 = arith.cmpi ne, %10, %c0_i32_9 : i32
    scf.if %11 {
      %c0_10 = arith.constant 0 : index
      %c0_11 = arith.constant 0 : index
      %12 = vector.load %arg7[%c0_10, %c0_11] : memref<32x256xf32, #tpu.memory_space<vmem>>, vector<32x256xf32>
      %c0_12 = arith.constant 0 : index
      %c0_13 = arith.constant 0 : index
      %13 = vector.load %arg5[%c0_12, %c0_13] : memref<32x256xbf16, #tpu.memory_space<vmem>>, vector<32x256xbf16>
      %14 = arith.extf %13 : vector<32x256xbf16> to vector<32x256xf32>
      %15 = arith.addf %12, %14 : vector<32x256xf32>
      %16 = arith.truncf %15 : vector<32x256xf32> to vector<32x256xbf16>
      %c0_14 = arith.constant 0 : index
      %c0_15 = arith.constant 0 : index
      %17 = vector.load %arg6[%c0_14, %c0_15] : memref<32x256xbf16, #tpu.memory_space<vmem>>, vector<32x256xbf16>
      tpu.vector_store %arg6[%c0_14, %c0_15], %16 {strides = array<i32>} : memref<32x256xbf16, #tpu.memory_space<vmem>>, vector<32x256xbf16>,
    } else {
    }
    return
  }
  func.func @transform_0(%arg0: i32, %arg1: i32, %arg2: i32) -> (i32, i32) {
    %c0_i32 = arith.constant 0 : i32
    return %arg0, %arg2 : i32, i32
  }
  func.func @transform_1(%arg0: i32, %arg1: i32, %arg2: i32) -> (i32, i32) {
    %c0_i32 = arith.constant 0 : i32
    return %arg2, %arg1 : i32, i32
  }
  func.func @transform_2(%arg0: i32, %arg1: i32, %arg2: i32) -> (i32, i32) {
    %c0_i32 = arith.constant 0 : i32
    return %arg0, %arg1 : i32, i32
  }
  func.func @transform_3(%arg0: i32, %arg1: i32, %arg2: i32) -> (i32, i32) {
    %c0_i32 = arith.constant 0 : i32
    return %arg0, %arg1 : i32, i32
  }
}

module attributes {stable_mosaic.version = 11 : i64} {
  func.func @_lmhead_ce_kernel(%arg0: i32, %arg1: i32, %arg2: memref<32x256xbf16, #tpu.memory_space<vmem>>, %arg3: memref<1x256xf32, #tpu.memory_space<vmem>>, %arg4: memref<256x512xbf16, #tpu.memory_space<vmem>>, %arg5: memref<32x1xi32, #tpu.memory_space<vmem>>, %arg6: memref<32x1xf32, #tpu.memory_space<vmem>>, %arg7: memref<32x1xf32, #tpu.memory_space<vmem>>, %arg8: memref<32x256xbf16, #tpu.memory_space<vmem>>, %arg9: memref<32x1xf32, #tpu.memory_space<vmem>>, %arg10: memref<32x1xf32, #tpu.memory_space<vmem>>, %arg11: memref<32x1xf32, #tpu.memory_space<vmem>>) attributes {dimension_semantics = [#tpu.dimension_semantics<parallel>, #tpu.dimension_semantics<arbitrary>], iteration_bounds = array<i64: 1, 1>, scalar_prefetch = 0 : i64, scratch_operands = 4 : i64, tpu.core_type = #tpu.core_type<tc>, window_params = [{transform_indices = @transform_0, window_bounds = array<i64: 32, 256>}, {pipeline_mode = #tpu.pipeline_mode<synchronous>, transform_indices = @transform_1, window_bounds = array<i64: 1, 256>}, {transform_indices = @transform_2, window_bounds = array<i64: 256, 512>}, {transform_indices = @transform_3, window_bounds = array<i64: 32, 1>}, {transform_indices = @transform_4, window_bounds = array<i64: 32, 1>}, {transform_indices = @transform_5, window_bounds = array<i64: 32, 1>}]} {
    %c0_i32 = arith.constant 0 : i32
    %0 = arith.cmpi eq, %arg1, %c0_i32 : i32
    %1 = arith.extui %0 : i1 to i32
    %c0_i32_0 = arith.constant 0 : i32
    %2 = arith.cmpi ne, %1, %c0_i32_0 : i32
    scf.if %2 {
      %c0_26 = arith.constant 0 : index
      %c0_27 = arith.constant 0 : index
      %40 = vector.load %arg2[%c0_26, %c0_27] : memref<32x256xbf16, #tpu.memory_space<vmem>>, vector<32x256xbf16>
      %41 = arith.extf %40 : vector<32x256xbf16> to vector<32x256xf32>
      %42 = arith.mulf %41, %41 : vector<32x256xf32>
      %cst_28 = arith.constant dense<0.000000e+00> : vector<32xf32>
      %43 = vector.multi_reduction <add>, %42, %cst_28 [1] : vector<32x256xf32> to vector<32xf32>
      %44 = vector.shape_cast %43 : vector<32xf32> to vector<32x1xf32>
      %cst_29 = arith.constant 2.560000e+02 : f32
      %45 = vector.broadcast %cst_29 : f32 to vector<32x1xf32>
      %46 = arith.divf %44, %45 : vector<32x1xf32>
      %cst_30 = arith.constant 9.99999997E-7 : f32
      %47 = vector.broadcast %cst_30 : f32 to vector<32x1xf32>
      %48 = arith.addf %46, %47 : vector<32x1xf32>
      %49 = math.rsqrt %48 : vector<32x1xf32>
      %50 = vector.broadcast %49 : vector<32x1xf32> to vector<32x256xf32>
      %51 = arith.mulf %41, %50 : vector<32x256xf32>
      %c0_31 = arith.constant 0 : index
      %c0_32 = arith.constant 0 : index
      %52 = vector.load %arg3[%c0_31, %c0_32] : memref<1x256xf32, #tpu.memory_space<vmem>>, vector<1x256xf32>
      %53 = vector.broadcast %52 : vector<1x256xf32> to vector<32x256xf32>
      %54 = arith.mulf %51, %53 : vector<32x256xf32>
      %55 = arith.truncf %54 : vector<32x256xf32> to vector<32x256xbf16>
      %c0_33 = arith.constant 0 : index
      %c0_34 = arith.constant 0 : index
      %56 = vector.load %arg8[%c0_33, %c0_34] : memref<32x256xbf16, #tpu.memory_space<vmem>>, vector<32x256xbf16>
      tpu.vector_store %arg8[%c0_33, %c0_34], %55 {strides = array<i32>} : memref<32x256xbf16, #tpu.memory_space<vmem>>, vector<32x256xbf16>,
      %cst_35 = arith.constant -1.000000e+30 : f32
      %57 = vector.broadcast %cst_35 : f32 to vector<32x1xf32>
      %c0_36 = arith.constant 0 : index
      %c0_37 = arith.constant 0 : index
      %58 = vector.load %arg9[%c0_36, %c0_37] : memref<32x1xf32, #tpu.memory_space<vmem>>, vector<32x1xf32>
      tpu.vector_store %arg9[%c0_36, %c0_37], %57 {strides = array<i32>} : memref<32x1xf32, #tpu.memory_space<vmem>>, vector<32x1xf32>,
      %cst_38 = arith.constant 0.000000e+00 : f32
      %59 = vector.broadcast %cst_38 : f32 to vector<32x1xf32>
      %c0_39 = arith.constant 0 : index
      %c0_40 = arith.constant 0 : index
      %60 = vector.load %arg10[%c0_39, %c0_40] : memref<32x1xf32, #tpu.memory_space<vmem>>, vector<32x1xf32>
      tpu.vector_store %arg10[%c0_39, %c0_40], %59 {strides = array<i32>} : memref<32x1xf32, #tpu.memory_space<vmem>>, vector<32x1xf32>,
      %cst_41 = arith.constant 0.000000e+00 : f32
      %61 = vector.broadcast %cst_41 : f32 to vector<32x1xf32>
      %c0_42 = arith.constant 0 : index
      %c0_43 = arith.constant 0 : index
      %62 = vector.load %arg11[%c0_42, %c0_43] : memref<32x1xf32, #tpu.memory_space<vmem>>, vector<32x1xf32>
      tpu.vector_store %arg11[%c0_42, %c0_43], %61 {strides = array<i32>} : memref<32x1xf32, #tpu.memory_space<vmem>>, vector<32x1xf32>,
    } else {
    }
    %c0 = arith.constant 0 : index
    %c0_1 = arith.constant 0 : index
    %3 = vector.load %arg8[%c0, %c0_1] : memref<32x256xbf16, #tpu.memory_space<vmem>>, vector<32x256xbf16>
    %c0_2 = arith.constant 0 : index
    %c0_3 = arith.constant 0 : index
    %4 = vector.load %arg4[%c0_2, %c0_3] : memref<256x512xbf16, #tpu.memory_space<vmem>>, vector<256x512xbf16>
    %cst = arith.constant dense<0.000000e+00> : vector<32x512xf32>
    %5 = tpu.matmul %3, %4, %cst {dimension_numbers = #tpu.dot_dimension_numbers<[1], [0], [0], [1], [0, 0, 1, 1], [], []>} : vector<32x256xbf16>, vector<256x512xbf16>, vector<32x512xf32> -> vector<32x512xf32>
    %c0_4 = arith.constant 0 : index
    %c0_5 = arith.constant 0 : index
    %6 = vector.load %arg5[%c0_4, %c0_5] : memref<32x1xi32, #tpu.memory_space<vmem>>, vector<32x1xi32>
    %c512_i32 = arith.constant 512 : i32
    %7 = arith.muli %arg1, %c512_i32 : i32
    %8 = tpu.iota {dimensions = array<i32: 1>} : vector<32x512xi32>
    %9 = vector.broadcast %7 : i32 to vector<32x512xi32>
    %10 = arith.addi %9, %8 : vector<32x512xi32>
    %c0_6 = arith.constant 0 : index
    %c0_7 = arith.constant 0 : index
    %11 = vector.load %arg11[%c0_6, %c0_7] : memref<32x1xf32, #tpu.memory_space<vmem>>, vector<32x1xf32>
    %12 = vector.broadcast %6 : vector<32x1xi32> to vector<32x512xi32>
    %13 = arith.cmpi eq, %10, %12 : vector<32x512xi32>
    %cst_8 = arith.constant 0.000000e+00 : f32
    %14 = vector.broadcast %cst_8 : f32 to vector<32x512xf32>
    %15 = arith.select %13, %5, %14 : vector<32x512xi1>, vector<32x512xf32>
    %cst_9 = arith.constant dense<0.000000e+00> : vector<32xf32>
    %16 = vector.multi_reduction <add>, %15, %cst_9 [1] : vector<32x512xf32> to vector<32xf32>
    %17 = vector.shape_cast %16 : vector<32xf32> to vector<32x1xf32>
    %18 = arith.addf %11, %17 : vector<32x1xf32>
    %c0_10 = arith.constant 0 : index
    %c0_11 = arith.constant 0 : index
    %19 = vector.load %arg11[%c0_10, %c0_11] : memref<32x1xf32, #tpu.memory_space<vmem>>, vector<32x1xf32>
    tpu.vector_store %arg11[%c0_10, %c0_11], %18 {strides = array<i32>} : memref<32x1xf32, #tpu.memory_space<vmem>>, vector<32x1xf32>,
    %c0_12 = arith.constant 0 : index
    %c0_13 = arith.constant 0 : index
    %20 = vector.load %arg9[%c0_12, %c0_13] : memref<32x1xf32, #tpu.memory_space<vmem>>, vector<32x1xf32>
    %cst_14 = arith.constant dense<0xFF800000> : vector<32xf32>
    %21 = vector.multi_reduction <maximumf>, %5, %cst_14 [1] : vector<32x512xf32> to vector<32xf32>
    %22 = vector.shape_cast %21 : vector<32xf32> to vector<32x1xf32>
    %23 = arith.maximumf %20, %22 : vector<32x1xf32>
    %c0_15 = arith.constant 0 : index
    %c0_16 = arith.constant 0 : index
    %24 = vector.load %arg9[%c0_15, %c0_16] : memref<32x1xf32, #tpu.memory_space<vmem>>, vector<32x1xf32>
    %25 = arith.subf %24, %23 : vector<32x1xf32>
    %26 = math.exp %25 : vector<32x1xf32>
    %c0_17 = arith.constant 0 : index
    %c0_18 = arith.constant 0 : index
    %27 = vector.load %arg10[%c0_17, %c0_18] : memref<32x1xf32, #tpu.memory_space<vmem>>, vector<32x1xf32>
    %28 = arith.mulf %26, %27 : vector<32x1xf32>
    %29 = vector.broadcast %23 : vector<32x1xf32> to vector<32x512xf32>
    %30 = arith.subf %5, %29 : vector<32x512xf32>
    %31 = math.exp %30 : vector<32x512xf32>
    %cst_19 = arith.constant dense<0.000000e+00> : vector<32xf32>
    %32 = vector.multi_reduction <add>, %31, %cst_19 [1] : vector<32x512xf32> to vector<32xf32>
    %33 = vector.shape_cast %32 : vector<32xf32> to vector<32x1xf32>
    %34 = arith.addf %28, %33 : vector<32x1xf32>
    %c0_20 = arith.constant 0 : index
    %c0_21 = arith.constant 0 : index
    %35 = vector.load %arg10[%c0_20, %c0_21] : memref<32x1xf32, #tpu.memory_space<vmem>>, vector<32x1xf32>
    tpu.vector_store %arg10[%c0_20, %c0_21], %34 {strides = array<i32>} : memref<32x1xf32, #tpu.memory_space<vmem>>, vector<32x1xf32>,
    %c0_22 = arith.constant 0 : index
    %c0_23 = arith.constant 0 : index
    %36 = vector.load %arg9[%c0_22, %c0_23] : memref<32x1xf32, #tpu.memory_space<vmem>>, vector<32x1xf32>
    tpu.vector_store %arg9[%c0_22, %c0_23], %23 {strides = array<i32>} : memref<32x1xf32, #tpu.memory_space<vmem>>, vector<32x1xf32>,
    %c0_i32_24 = arith.constant 0 : i32
    %37 = arith.cmpi eq, %arg1, %c0_i32_24 : i32
    %38 = arith.extui %37 : i1 to i32
    %c0_i32_25 = arith.constant 0 : i32
    %39 = arith.cmpi ne, %38, %c0_i32_25 : i32
    scf.if %39 {
      %c-100_i32 = arith.constant -100 : i32
      %40 = vector.broadcast %c-100_i32 : i32 to vector<32x1xi32>
      %41 = arith.cmpi ne, %6, %40 : vector<32x1xi32>
      %42 = arith.extui %41 : vector<32x1xi1> to vector<32x1xi32>
      %43 = arith.sitofp %42 : vector<32x1xi32> to vector<32x1xf32>
      %c0_26 = arith.constant 0 : index
      %c0_27 = arith.constant 0 : index
      %44 = vector.load %arg10[%c0_26, %c0_27] : memref<32x1xf32, #tpu.memory_space<vmem>>, vector<32x1xf32>
      %45 = math.log %44 : vector<32x1xf32>
      %c0_28 = arith.constant 0 : index
      %c0_29 = arith.constant 0 : index
      %46 = vector.load %arg9[%c0_28, %c0_29] : memref<32x1xf32, #tpu.memory_space<vmem>>, vector<32x1xf32>
      %47 = arith.addf %45, %46 : vector<32x1xf32>
      %c0_30 = arith.constant 0 : index
      %c0_31 = arith.constant 0 : index
      %48 = vector.load %arg11[%c0_30, %c0_31] : memref<32x1xf32, #tpu.memory_space<vmem>>, vector<32x1xf32>
      %49 = arith.subf %47, %48 : vector<32x1xf32>
      %50 = arith.mulf %49, %43 : vector<32x1xf32>
      %c0_32 = arith.constant 0 : index
      %c0_33 = arith.constant 0 : index
      %51 = vector.load %arg6[%c0_32, %c0_33] : memref<32x1xf32, #tpu.memory_space<vmem>>, vector<32x1xf32>
      tpu.vector_store %arg6[%c0_32, %c0_33], %50 {strides = array<i32>} : memref<32x1xf32, #tpu.memory_space<vmem>>, vector<32x1xf32>,
      %c0_34 = arith.constant 0 : index
      %c0_35 = arith.constant 0 : index
      %52 = vector.load %arg7[%c0_34, %c0_35] : memref<32x1xf32, #tpu.memory_space<vmem>>, vector<32x1xf32>
      tpu.vector_store %arg7[%c0_34, %c0_35], %43 {strides = array<i32>} : memref<32x1xf32, #tpu.memory_space<vmem>>, vector<32x1xf32>,
    } else {
    }
    return
  }
  func.func @transform_0(%arg0: i32, %arg1: i32) -> (i32, i32) {
    %c0_i32 = arith.constant 0 : i32
    %c0_i32_0 = arith.constant 0 : i32
    return %arg0, %c0_i32 : i32, i32
  }
  func.func @transform_1(%arg0: i32, %arg1: i32) -> (i32, i32) {
    %c0_i32 = arith.constant 0 : i32
    %c0_i32_0 = arith.constant 0 : i32
    %c0_i32_1 = arith.constant 0 : i32
    return %c0_i32, %c0_i32_0 : i32, i32
  }
  func.func @transform_2(%arg0: i32, %arg1: i32) -> (i32, i32) {
    %c0_i32 = arith.constant 0 : i32
    %c0_i32_0 = arith.constant 0 : i32
    return %c0_i32, %arg1 : i32, i32
  }
  func.func @transform_3(%arg0: i32, %arg1: i32) -> (i32, i32) {
    %c0_i32 = arith.constant 0 : i32
    %c0_i32_0 = arith.constant 0 : i32
    return %arg0, %c0_i32 : i32, i32
  }
  func.func @transform_4(%arg0: i32, %arg1: i32) -> (i32, i32) {
    %c0_i32 = arith.constant 0 : i32
    %c0_i32_0 = arith.constant 0 : i32
    return %arg0, %c0_i32 : i32, i32
  }
  func.func @transform_5(%arg0: i32, %arg1: i32) -> (i32, i32) {
    %c0_i32 = arith.constant 0 : i32
    %c0_i32_0 = arith.constant 0 : i32
    return %arg0, %c0_i32 : i32, i32
  }
}

</mosaic_0001>

<bundles_post_ra>
// kernel: baseline_llm_loss.11
= control target key start
LH: loop header
LB: loop body
LE: loop exit
PB: predicated region body
PF: predicated region fallthrough
CT: control target
= control target key end

     0   :  { %8 = vsyncpa [#allocation4], 0  ;;  %s554_s12 = smov [#allocation3]   ;;  %s625_s0 = inlined_call_operand.vmem [shape: bf16[32,256], index: 0, kind: input, shape index: {}]   ;;  %s626_s1 = inlined_call_operand.hbm [shape: bf16[256,256], index: 1, kind: input, shape index: {}]   ;;  %s627_s2 = inlined_call_operand.vmem [shape: bf16[32,256], index: 2, kind: input, shape index: {}]   ;;  %s628_s3 = inlined_call_operand.vmem [shape: bf16[32,256], index: 3, kind: output, shape index: {}]  }
   0x1   :  { %s16_s13 = sshll.u32 %s554_s12, 4  ;;  %s530_s16 = scalar_lea.hbm %s626_s1, 4096  ;;  %s17_s13 = int_to_ptr.vmem [resolvable:$true] %s16_s13 }
   0x2   :  { %p531_p0 = scmp.ne.s32.totalorder %s626_s1, %s530_s16  ;;  %p534_p1 = scmp.lt.u32.totalorder %s530_s16, %s626_s1 }
   0x4   :  { %p536_p2 = pnand %p534_p1, %p531_p0 }
   0x6   :  { %539 = shalt.err (!%p536_p2)
}
   0x7   :  { %s540_s21 = scalar_lea.vmem %s17_s13, 4096  ;;  %p545_p4 = scmp.lt.s32.totalorder %s17_s13, %s17_s13 }
   0x8   :  { %p541_p3 = scmp.ne.s32.totalorder %s17_s13, %s540_s21  ;;  %p546_p5 = scmp.lt.s32.totalorder %s540_s21, %s540_s21 }
   0xa   :  { %p547_p6 = por %p546_p5, %p545_p4 }
   0xc   :  { %p548_p7 = pnand %p547_p6, %p541_p3 }
   0xe   :  { %551 = shalt.err (!%p548_p7)
}
   0xf   :  { %s555_s22 = smov 128   ;;  %s556_s23 = smov 8  }
  0x10   :  { %22 = dma.hbm_to_vmem [thread:$0]  %s626_s1, 4096, %s17_s13, [#allocation4], %s555_s22, %s555_s22, %s556_s23  }
  0x11   :  { %552 = dma.done.wait [#allocation4], 4096  }
  0x12   :  { %553 = vsyncadd [#allocation4], 4294963200  ;;  %v476_v0 = vld [vmem:[#allocation3 + $0x4] ss:$8 sps:$4 sm:$0xff]   ;;  %v478_v1 = vld [vmem:[#allocation3] ss:$8 sps:$4 sm:$0xff]  }
  0x13   :  { %264 = vmatprep.subr.bf16.mxu0 %v476_v0  ;;  %441 = vmatprep.subr.bf16.mxu1 %v476_v0  ;;  %v479_v2 = vld [vmem:[#allocation3 + $0x14] ss:$8 sps:$4 sm:$0xff]   ;;  %v481_v3 = vld [vmem:[#allocation3 + $0x10] ss:$8 sps:$4 sm:$0xff]   ;;  %v482_v4 = vld [vmem:[#allocation3 + $0x24] ss:$8 sps:$4 sm:$0xff]  }
  0x14   :  { %265 = vmatpush1.bf16.msra.mxu0 %v478_v1  ;;  %457 = vmatpush1.bf16.msra.mxu1 %v478_v1  ;;  %v484_v5 = vld [vmem:[#allocation3 + $0x20] ss:$8 sps:$4 sm:$0xff]   ;;  %v485_v6 = vld [vmem:[#allocation3 + $0x34] ss:$8 sps:$4 sm:$0xff]   ;;  %v487_v7 = vld [vmem:[#allocation3 + $0x30] ss:$8 sps:$4 sm:$0xff]  }
  0x15   :  { %266 = vmatprep.subr.bf16.mxu0 %v479_v2  ;;  %442 = vmatprep.subr.bf16.mxu1 %v479_v2  ;;  %v488_v8 = vld [vmem:[#allocation3 + $0x44] ss:$8 sps:$4 sm:$0xff]   ;;  %v490_v9 = vld [vmem:[#allocation3 + $0x40] ss:$8 sps:$4 sm:$0xff]   ;;  %v491_v10 = vld [vmem:[#allocation3 + $0x54] ss:$8 sps:$4 sm:$0xff]  }
  0x16   :  { %v493_v11 = vld [vmem:[#allocation3 + $0x50] ss:$8 sps:$4 sm:$0xff]   ;;  %v494_v12 = vld [vmem:[#allocation3 + $0x64] ss:$8 sps:$4 sm:$0xff]   ;;  %v496_v14 = vld [vmem:[#allocation3 + $0x60] ss:$8 sps:$4 sm:$0xff]  }
  0x17   :  { %v526_v13 = vld [vmem:[%s625_s0 + $0x4] ss:$8 sps:$4 sm:$0xff]   ;;  %v529_v15 = vld [vmem:[%s625_s0 + $0x14] ss:$8 sps:$4 sm:$0xff]   ;;  %v499_v17 = vld [vmem:[#allocation3 + $0x70] ss:$8 sps:$4 sm:$0xff]  }
  0x18   :  { %267 = vmatpush1.bf16.msra.mxu0 %v481_v3  ;;  %458 = vmatpush1.bf16.msra.mxu1 %v481_v3  ;;  %v497_v16 = vld [vmem:[#allocation3 + $0x74] ss:$8 sps:$4 sm:$0xff]   ;;  %v500_v18 = vld [vmem:[#allocation3 + $0x84] ss:$8 sps:$4 sm:$0xff]   ;;  %v502_v19 = vld [vmem:[#allocation3 + $0x80] ss:$8 sps:$4 sm:$0xff]  }
  0x19   :  { %268 = vmatprep.subr.bf16.mxu0 %v482_v4  ;;  %443 = vmatprep.subr.bf16.mxu1 %v482_v4  ;;  %v503_v20 = vld [vmem:[#allocation3 + $0x94] ss:$8 sps:$4 sm:$0xff]   ;;  %v505_v21 = vld [vmem:[#allocation3 + $0x90] ss:$8 sps:$4 sm:$0xff]   ;;  %v506_v22 = vld [vmem:[#allocation3 + $0xa4] ss:$8 sps:$4 sm:$0xff]  }
  0x1a   :  { %296 = vmatprep.mubr.bf16.mxu0 %v526_v13  ;;  %306 = vmatprep.mubr.bf16.mxu1 %v529_v15  ;;  %v508_v23 = vld [vmem:[#allocation3 + $0xa0] ss:$8 sps:$4 sm:$0xff]   ;;  %v509_v24 = vld [vmem:[#allocation3 + $0xb4] ss:$8 sps:$4 sm:$0xff]   ;;  %v511_v25 = vld [vmem:[#allocation3 + $0xb0] ss:$8 sps:$4 sm:$0xff]  }
  0x1b   :  { %v512_v26 = vld [vmem:[#allocation3 + $0xc4] ss:$8 sps:$4 sm:$0xff]   ;;  %v514_v27 = vld [vmem:[#allocation3 + $0xc0] ss:$8 sps:$4 sm:$0xff]   ;;  %v515_v28 = vld [vmem:[#allocation3 + $0xd4] ss:$8 sps:$4 sm:$0xff]  }
  0x1c   :  { %269 = vmatpush1.bf16.msra.mxu0 %v484_v5  ;;  %459 = vmatpush1.bf16.msra.mxu1 %v484_v5  ;;  %v517_v29 = vld [vmem:[#allocation3 + $0xd0] ss:$8 sps:$4 sm:$0xff]   ;;  %v518_v30 = vld [vmem:[#allocation3 + $0xe4] ss:$8 sps:$4 sm:$0xff]   ;;  %v520_v31 = vld [vmem:[#allocation3 + $0xe0] ss:$8 sps:$4 sm:$0xff]  }
  0x1d   :  { %270 = vmatprep.subr.bf16.mxu0 %v485_v6  ;;  %444 = vmatprep.subr.bf16.mxu1 %v485_v6  ;;  %v521_v32 = vld [vmem:[#allocation3 + $0xf4] ss:$8 sps:$4 sm:$0xff]   ;;  %v523_v33 = vld [vmem:[#allocation3 + $0xf0] ss:$8 sps:$4 sm:$0xff]   ;;  %v524_v34 = vld [vmem:[%s625_s0] ss:$8 sps:$4 sm:$0xff]  }
  0x1e   :  { %v527_v35 = vld [vmem:[%s625_s0 + $0x10] ss:$8 sps:$4 sm:$0xff]   ;;  %v344_v36 = vld [vmem:[%s627_s2] sm:$0xff]  ;;  %v345_v38 = vld [vmem:[%s627_s2 + $0x8] sm:$0xff] }
  0x1f   :  { %v346_v37 = vld [vmem:[%s627_s2 + $0x10] sm:$0xff]  ;;  %v347_v39 = vld [vmem:[%s627_s2 + $0x18] sm:$0xff]  ;;  %v348_v40 = vunpack.c.l.bf16 %v344_v36  ;;  %v349_v42 = vunpack.c.h.bf16 %v344_v36  ;;  %v350_v44 = vunpack.c.l.bf16 %v345_v38  ;;  %v351_v48 = vunpack.c.h.bf16 %v345_v38 }
  0x20   :  { %271 = vmatpush1.bf16.msra.mxu0 %v487_v7  ;;  %460 = vmatpush1.bf16.msra.mxu1 %v487_v7  ;;  %v352_v41 = vunpack.c.l.bf16 %v346_v37  ;;  %v353_v43 = vunpack.c.h.bf16 %v346_v37  ;;  %v354_v45 = vunpack.c.l.bf16 %v347_v39  ;;  %v355_v49 = vunpack.c.h.bf16 %v347_v39 }
  0x21   :  { %272 = vmatprep.subr.bf16.mxu0 %v488_v8  ;;  %445 = vmatprep.subr.bf16.mxu1 %v488_v8 }
  0x24   :  { %273 = vmatpush1.bf16.msra.mxu0 %v490_v9  ;;  %461 = vmatpush1.bf16.msra.mxu1 %v490_v9 }
  0x25   :  { %274 = vmatprep.subr.bf16.mxu0 %v491_v10  ;;  %446 = vmatprep.subr.bf16.mxu1 %v491_v10 }
  0x28   :  { %275 = vmatpush1.bf16.msra.mxu0 %v493_v11  ;;  %462 = vmatpush1.bf16.msra.mxu1 %v493_v11 }
  0x29   :  { %276 = vmatprep.subr.bf16.mxu0 %v494_v12  ;;  %447 = vmatprep.subr.bf16.mxu1 %v494_v12 }
  0x2c   :  { %277 = vmatpush1.bf16.msra.mxu0 %v496_v14  ;;  %463 = vmatpush1.bf16.msra.mxu1 %v496_v14 }
  0x2d   :  { %278 = vmatprep.subr.bf16.mxu0 %v497_v16  ;;  %448 = vmatprep.subr.bf16.mxu1 %v497_v16 }
  0x30   :  { %279 = vmatpush1.bf16.msra.mxu0 %v499_v17  ;;  %464 = vmatpush1.bf16.msra.mxu1 %v499_v17 }
  0x31   :  { %280 = vmatprep.subr.bf16.mxu0 %v500_v18  ;;  %449 = vmatprep.subr.bf16.mxu1 %v500_v18 }
  0x34   :  { %281 = vmatpush1.bf16.msra.mxu0 %v502_v19  ;;  %465 = vmatpush1.bf16.msra.mxu1 %v502_v19 }
  0x35   :  { %282 = vmatprep.subr.bf16.mxu0 %v503_v20  ;;  %450 = vmatprep.subr.bf16.mxu1 %v503_v20 }
  0x38   :  { %283 = vmatpush1.bf16.msra.mxu0 %v505_v21  ;;  %466 = vmatpush1.bf16.msra.mxu1 %v505_v21 }
  0x39   :  { %284 = vmatprep.subr.bf16.mxu0 %v506_v22  ;;  %451 = vmatprep.subr.bf16.mxu1 %v506_v22 }
  0x3c   :  { %285 = vmatpush1.bf16.msra.mxu0 %v508_v23  ;;  %467 = vmatpush1.bf16.msra.mxu1 %v508_v23 }
  0x3d   :  { %286 = vmatprep.subr.bf16.mxu0 %v509_v24  ;;  %452 = vmatprep.subr.bf16.mxu1 %v509_v24 }
  0x40   :  { %287 = vmatpush1.bf16.msra.mxu0 %v511_v25  ;;  %468 = vmatpush1.bf16.msra.mxu1 %v511_v25 }
  0x41   :  { %288 = vmatprep.subr.bf16.mxu0 %v512_v26  ;;  %453 = vmatprep.subr.bf16.mxu1 %v512_v26 }
  0x44   :  { %289 = vmatpush1.bf16.msra.mxu0 %v514_v27  ;;  %469 = vmatpush1.bf16.msra.mxu1 %v514_v27 }
  0x45   :  { %290 = vmatprep.subr.bf16.mxu0 %v515_v28  ;;  %454 = vmatprep.subr.bf16.mxu1 %v515_v28 }
  0x48   :  { %291 = vmatpush1.bf16.msra.mxu0 %v517_v29  ;;  %470 = vmatpush1.bf16.msra.mxu1 %v517_v29 }
  0x49   :  { %292 = vmatprep.subr.bf16.mxu0 %v518_v30  ;;  %455 = vmatprep.subr.bf16.mxu1 %v518_v30 }
  0x4c   :  { %293 = vmatpush1.bf16.msra.mxu0 %v520_v31  ;;  %471 = vmatpush1.bf16.msra.mxu1 %v520_v31 }
  0x4d   :  { %294 = vmatprep.subr.bf16.mxu0 %v521_v32  ;;  %456 = vmatprep.subr.bf16.mxu1 %v521_v32 }
  0x50   :  { %295 = vmatpush1.bf16.msra.mxu0 %v523_v33  ;;  %472 = vmatpush1.bf16.msra.mxu1 %v523_v33 }
  0x53   :  { %297 = vmatmul.mubr.bf16.vlgmr.msra.gmra.mrb[0].mxu0 %v524_v34  ;;  %307 = vmatmul.mubr.bf16.vlgmr.msra.gmra.mrb[0].mxu1 %v527_v35 }
 0x126   :  { %v298_v46 = vpop.f32.mrb[0].mxu0  ;;  %v308_v47 = vpop.f32.mrb[0].mxu1 }
 0x127   :  { %v356_v50 = vadd.f32 %v348_v40, %v298_v46  ;;  %v360_v51 = vadd.f32 %v352_v41, %v308_v47  ;;  %v300_v52 = vpop.f32.mrb[1].mxu0  ;;  %v310_v53 = vpop.f32.mrb[1].mxu1 }
 0x128   :  { %v357_v54 = vadd.f32 %v349_v42, %v300_v52  ;;  %v361_v55 = vadd.f32 %v353_v43, %v310_v53  ;;  %v302_v56 = vpop.f32.mrb[2].mxu0  ;;  %v312_v57 = vpop.f32.mrb[2].mxu1 }
 0x129   :  { %v358_v58 = vadd.f32 %v350_v44, %v302_v56  ;;  %v362_v59 = vadd.f32 %v354_v45, %v312_v57  ;;  %v304_v60 = vpop.f32.mrb[3].mxu0  ;;  %v314_v61 = vpop.f32.mrb[3].mxu1 }
 0x12a   :  { %v437_v62 = vpack.c.bf16 %v357_v54, %v356_v50  ;;  %v439_v63 = vpack.c.bf16 %v361_v55, %v360_v51  ;;  %v359_v0 = vadd.f32 %v351_v48, %v304_v60  ;;  %v363_v1 = vadd.f32 %v355_v49, %v314_v61 }
 0x12c   :  { %388 = vst [vmem:[%s628_s3] sm:$0xff] %v437_v62  ;;  %390 = vst [vmem:[%s628_s3 + $0x10] sm:$0xff] %v439_v63  ;;  %v438_v2 = vpack.c.bf16 %v359_v0, %v358_v58  ;;  %v440_v3 = vpack.c.bf16 %v363_v1, %v362_v59 }
 0x12e   :  { %389 = vst [vmem:[%s628_s3 + $0x8] sm:$0xff] %v438_v2  ;;  %391 = vst [vmem:[%s628_s3 + $0x18] sm:$0xff] %v440_v3 }
 0x12f   :  { %396 = vsyncpa [#allocation4], 1 }

// kernel: baseline_llm_loss.9
= control target key start
LH: loop header
LB: loop body
LE: loop exit
PB: predicated region body
PF: predicated region fallthrough
CT: control target
= control target key end

     0   :  { %8 = vsyncpa [#allocation4], 0  ;;  %s1236_s0 = inlined_call_operand.vmem [shape: bf16[32,256], index: 0, kind: input, shape index: {}]   ;;  %s1237_s1 = inlined_call_operand.vmem [shape: f32[1,256], index: 1, kind: input, shape index: {}]   ;;  %s1238_s2 = inlined_call_operand.hbm [shape: bf16[256,768], index: 2, kind: input, shape index: {}]   ;;  %s1239_s3 = inlined_call_operand.vmem [shape: bf16[32,768], index: 3, kind: output, shape index: {}]  }
   0x1   :  { %10 = vsyncpa [#allocation4 + $0x1], 0  ;;  %s1045_s12 = smov 0   ;;  %s1047_s13 = smov 0  }
   0x2   :  { %s1049_s14 = smov 0   ;;  %s1051_s15 = smov 0  }
   0x3   :  { %s1053_s16 = smov 0   ;;  %s1055_s17 = smov 0  }
   0x4 LB: > { %s734_s18 = sadd.s32 4294967295, %s1019_s17   ;;  %s25_s19 = sadd.s32 1, %s1015_s16  ;;  %s1019_s17 = sphi %s1055_s17, %s16_s17   ;;  %s1015_s16 = sphi %s1053_s16, %s1250_s16   ;;  %s1011_s15 = sphi %s1051_s15, %s1249_s15   ;;  %s1007_s14 = sphi %s1049_s14, %s1248_s14   ;;  %s1003_s13 = sphi %s1047_s13, %s1247_s13   ;;  %s999_s12 = sphi %s1045_s12, %s1246_s12  }
   0x5   : > { %p26_p0 = scmp.ge.s32.totalorder %s25_s19, 3  ;;  %s82_s20 = sadd.s32 1, %s1007_s14 }
   0x6   : > { %p89_p1 = scmp.ne.s32.totalorder %s1007_s14, %s1003_s13  ;;  %p90_p2 = scmp.eq.s32.totalorder %s1019_s17, 0 }
   0x7   : > { %s1252_s19 = smov (%p26_p0, %s25_s19), 0  ;;  %p95_p4 = scmp.ne.s32.totalorder %s1003_s13, %s999_s12 }
   0x8   : > { %p1081_p3 = por %p90_p2, %p89_p1  ;;  %s79_s22 = ssub.s32 %s1015_s16, %s1252_s19 }
   0x9   : > { %p96_p5 = scmp.eq.s32.totalorder %s734_s18, 0  ;;  %p80_p6 = scmp.eq.s32.totalorder %s79_s22, 0 }
   0xa   : > { %p121_p7 = scmp.eq.s32.totalorder %s734_s18, 2  ;;  %p831_p10 = scmp.lt.s32.totalorder %s1019_s17, 3 }
   0xb   : > { %p1088_p8 = por %p96_p5, %p95_p4  ;;  %s160_s26 = sand.u32 1, %s1007_s14  }
   0xc   : > { %s1093_s24 = scalar_select %p80_p6, %s1007_s14, %s82_s20  }
   0xd   : > { %p1095_p9 = por %p121_p7, %p89_p1  ;;  %s787_s27 = sshll.u32 %s1015_s16, 7 }
   0xe   : > { %s739_s28 = sshll.u32 %s160_s26, 8  ;;  %s1105_s4 = scalar_lea.hbm %s1238_s2, %s787_s27 }
   0xf   : > { %s1242_s25 = scalar_select %p1095_p9, 1, 0 }
  0x10   : > { %s164_s5 = scalar_lea.vmem [#allocation3], %s739_s28  ;;  %p1109_p11 = pnand %p831_p10, %p1081_p3 }
  0x11   : > { %s171_s6 = sshll.u32 %s164_s5, 4  ;;  %s1116_s8 = scalar_lea.sflag [#allocation4], %s160_s26  ;;  %s1113_s6 = int_to_ptr.vmem [resolvable:$true] %s171_s6 }
  0x12   : > { %s939_s9 = scalar_lea.hbm %s1105_s4, 4096  ;;  %p941_p0 = pneg %p1109_p11 }
  0x13   : > { %p940_p13 = scmp.ne.s32.totalorder %s1105_s4, %s939_s9  ;;  %s944_s12 = scalar_lea.hbm %s1238_s2, 12288 }
  0x14   : > { %p945_p3 = scmp.lt.u32.totalorder %s1105_s4, %s1238_s2  ;;  %p946_p4 = scmp.lt.u32.totalorder %s944_s12, %s939_s9 }
  0x15   : > { %p942_p1 = pnand %p941_p0, %p940_p13  ;;  %p948_p6 = scmp.lt.u32.totalorder %s939_s9, %s1105_s4 }
  0x16   : > { %p947_p5 = por %p946_p4, %p945_p3 }
  0x17   : > { %p943_p2 = pneg %p942_p1 }
  0x18   : > { %p949_p7 = por %p948_p6, %p947_p5 }
  0x1a   : > { %p950_p10 = pnand %p949_p7, %p943_p2 }
  0x1c   : > { %953 = shalt.err (!%p950_p10)
}
  0x1d   : > { %s954_s21 = scalar_lea.vmem %s1113_s6, 4096  ;;  %s1021_s22 = smov [#allocation3]  }
  0x1e   : > { %p955_p13 = scmp.ne.s32.totalorder %s1113_s6, %s954_s21  ;;  %s959_s26 = sshll.u32 %s1021_s22, 4  ;;  %s960_s26 = int_to_ptr.vmem [resolvable:$false] %s959_s26 }
  0x1f   : > { %s961_s27 = scalar_lea.vmem %s960_s26, 8192  ;;  %p962_p9 = scmp.lt.s32.totalorder %s1113_s6, %s960_s26 }
  0x20   : > { %p957_p1 = pnand %p955_p13, %p941_p0  ;;  %p963_p3 = scmp.lt.s32.totalorder %s961_s27, %s954_s21 }
  0x22   : > { %p958_p12 = pneg %p957_p1  ;;  %p964_p4 = por %p963_p3, %p962_p9 }
  0x24   : > { %p965_p5 = pnand %p964_p4, %p958_p12 }
  0x26   : > { %968 = shalt.err (!%p965_p5)
}
  0x27   : > { %s1022_s28 = smov 384   ;;  %s1023_s29 = smov 128  }
  0x28   : > { %s1024_s30 = smov 8   ;;  %p179_p0 = scmp.lt.s32.totalorder %s1019_s17, 4 }
  0x29   : > { %830 = dma.hbm_to_vmem [thread:$0]  (!%p1109_p11), %s1105_s4, 4096, %s1113_s6, %s1116_s8, %s1022_s28, %s1023_s29, %s1024_s30  }
  0x2a   : > { %p1244_p2 = scmp.ge.s32.totalorder %s1019_s17, 1 }
  0x2c   : > { %p180_p6 = pnand %p1244_p2, %p179_p0 }
  0x2d   : > { %s185_s5 = sand.u32 (!%p180_p6), 1, %s1003_s13  }
  0x2e   : > { %183 = sbr.rel (%p180_p6) target bundleno = 522 (0x20a), region = 32  ;;  %s743_s9 = sshll.u32 (!%p180_p6), %s185_s5, 8 }
  0x2f   : > { %s186_s10 = scalar_lea.sflag (!%p180_p6), [#allocation4], %s185_s5  ;;  %s1148_s11 = scalar_lea.vmem (!%p180_p6), [#allocation3], %s743_s9 }
  0x35   : > { %994 = dma.done.wait (%p1088_p8), %s186_s10, 4096  }
  0x36   : > { %996 = vsyncadd (%p1088_p8), %s186_s10, 4294963200  ;;  %s744_s12 = sshll.u32 %s185_s5, 5  ;;  %p745_p9 = scmp.ne.s32.totalorder %s1011_s15, 0 }
  0x37   : > { %s1154_s18 = scalar_lea.vmem [#allocation5], %s744_s12  ;;  %v233_v0 = vld [vmem:[%s1236_s0 + $0x10] sm:$0xff] (!%p745_p9)  ;;  %v231_v1 = vld [vmem:[%s1236_s0] sm:$0xff] (!%p745_p9)  ;;  %v234_v2 = vld [vmem:[%s1236_s0 + $0x18] sm:$0xff] (!%p745_p9)  ;;  %v286_v34 = vlaneseq (!%p745_p9) }
  0x38   : > { %230 = sbr.rel (%p745_p9) target bundleno = 231 (0xe7), region = 40  ;;  %v239_v3 = vunpack.c.l.bf16 (!%p745_p9), %v233_v0  ;;  %v240_v4 = vunpack.c.h.bf16 (!%p745_p9), %v233_v0  ;;  %v235_v5 = vunpack.c.l.bf16 (!%p745_p9), %v231_v1  ;;  %v236_v6 = vunpack.c.h.bf16 (!%p745_p9), %v231_v1  ;;  %v232_v7 = vld [vmem:[%s1236_s0 + $0x8] sm:$0xff] (!%p745_p9)  ;;  %v284_v41 = vld [vmem:[%s1237_s1] sm:$0x3] (!%p745_p9) }
  0x39   : > { %v241_v8 = vunpack.c.l.bf16 (!%p745_p9), %v234_v2  ;;  %v242_v9 = vunpack.c.h.bf16 (!%p745_p9), %v234_v2  ;;  %v237_v10 = vunpack.c.l.bf16 (!%p745_p9), %v232_v7  ;;  %v238_v11 = vunpack.c.h.bf16 (!%p745_p9), %v232_v7 }
  0x3a   : > { %v247_v12 = vmul.f32 (!%p745_p9), %v239_v3, %v239_v3  ;;  %v248_v13 = vmul.f32 (!%p745_p9), %v240_v4, %v240_v4  ;;  %v243_v14 = vmul.f32 (!%p745_p9), %v235_v5, %v235_v5  ;;  %v244_v15 = vmul.f32 (!%p745_p9), %v236_v6, %v236_v6 }
  0x3b   : > { %v249_v16 = vmul.f32 (!%p745_p9), %v241_v8, %v241_v8  ;;  %v250_v17 = vmul.f32 (!%p745_p9), %v242_v9, %v242_v9  ;;  %v245_v18 = vmul.f32 (!%p745_p9), %v237_v10, %v237_v10  ;;  %v246_v19 = vmul.f32 (!%p745_p9), %v238_v11, %v238_v11 }
  0x3c   : > { %v257_v20 = vadd.f32 (!%p745_p9), %v248_v13, %v247_v12  ;;  %v251_v21 = vadd.f32 (!%p745_p9), %v244_v15, %v243_v14  ;;  %v287_v37 = vshrl.u32 (!%p745_p9), %v286_v34, 7 }
  0x3d   : > { %v260_v22 = vadd.f32 (!%p745_p9), %v250_v17, %v249_v16  ;;  %v254_v23 = vadd.f32 (!%p745_p9), %v246_v19, %v245_v18 }
  0x3e   : > { %258 = vadd.xlane.f32.xlu1 (!%p745_p9), %v257_v20  ;;  %252 = vadd.xlane.f32.xlu0 (!%p745_p9), %v251_v21  ;;  %v288_v38 = vsub.s32 (!%p745_p9), 0, %v287_v37  ;;  %v292_v39 = vsub.s32 (!%p745_p9), 1, %v287_v37 }
  0x40   : > { %v289_v43 = vrot.slane %v284_v41, %v288_v38  ;;  %v293_v44 = vrot.slane %v284_v41, %v292_v39 }
  0x42   : > { %261 = vadd.xlane.f32.xlu1 %v260_v22  ;;  %255 = vadd.xlane.f32.xlu0 %v254_v23 }
  0xcb   : > { %v259_v24 = vpop.xlane.xlu1 %258  ;;  %v253_v25 = vpop.xlane.xlu0 %252 }
  0xcc   : > { %v266_v26 = vmul.f32 0.00390625, %v259_v24  ;;  %v264_v27 = vmul.f32 0.00390625, %v253_v25 }
  0xce   : > { %v270_v28 = vadd.f32 1e-06, %v266_v26  ;;  %v268_v29 = vadd.f32 1e-06, %v264_v27 }
  0xcf   : > { %v262_v30 = vpop.xlane.xlu1 %261  ;;  %v256_v31 = vpop.xlane.xlu0 %255 }
  0xd0   : > { %883 = vrsqrt.f32 %v270_v28  ;;  %v267_v32 = vmul.f32 0.00390625, %v262_v30  ;;  %v265_v33 = vmul.f32 0.00390625, %v256_v31 }
  0xd1   : > { %885 = vrsqrt.f32 %v268_v29 }
  0xd2   : > { %v271_v35 = vadd.f32 1e-06, %v267_v32  ;;  %v269_v36 = vadd.f32 1e-06, %v265_v33 }
  0xd4   : > { %887 = vrsqrt.f32 %v271_v35 }
  0xd5   : > { %889 = vrsqrt.f32 %v269_v36 }
  0xda   : > { %v884_v40 = vpop.eup %883 }
  0xdb   : > { %v886_v42 = vpop.eup %885  ;;  %v280_v45 = vmul.f32 %v884_v40, %v239_v3  ;;  %v281_v46 = vmul.f32 %v884_v40, %v240_v4 }
  0xdc   : > { %v276_v48 = vmul.f32 %v886_v42, %v235_v5  ;;  %v277_v49 = vmul.f32 %v886_v42, %v236_v6 }
  0xdd   : > { %v300_v55 = vmul.f32 %v289_v43, %v280_v45  ;;  %v301_v56 = vmul.f32 %v293_v44, %v281_v46 }
  0xde   : > { %v888_v47 = vpop.eup %887  ;;  %v296_v59 = vmul.f32 %v289_v43, %v276_v48  ;;  %v297_v60 = vmul.f32 %v293_v44, %v277_v49 }
  0xdf   : > { %v890_v50 = vpop.eup %889  ;;  %v282_v51 = vmul.f32 %v888_v47, %v241_v8  ;;  %v283_v52 = vmul.f32 %v888_v47, %v242_v9 }
  0xe0   : > { %v278_v53 = vmul.f32 %v890_v50, %v237_v10  ;;  %v279_v54 = vmul.f32 %v890_v50, %v238_v11 }
  0xe1   : > { %v302_v57 = vmul.f32 %v289_v43, %v282_v51  ;;  %v303_v58 = vmul.f32 %v293_v44, %v283_v52 }
  0xe2   : > { %v298_v61 = vmul.f32 %v289_v43, %v278_v53  ;;  %v299_v62 = vmul.f32 %v293_v44, %v279_v54 }
  0xe3   : > { %v306_v63 = vpack.c.bf16 %v302_v57, %v300_v55  ;;  %v307_v0 = vpack.c.bf16 %v303_v58, %v301_v56 }
  0xe4   : > { %v304_v1 = vpack.c.bf16 %v298_v61, %v296_v59  ;;  %v305_v2 = vpack.c.bf16 %v299_v62, %v297_v60 }
  0xe5   : > { %310 = vst [vmem:[#allocation2 + $0x10] sm:$0xff] %v306_v63  ;;  %311 = vst [vmem:[#allocation2 + $0x18] sm:$0xff] %v307_v0 }
  0xe6   : > { %308 = vst [vmem:[#allocation2] sm:$0xff] %v304_v1  ;;  %309 = vst [vmem:[#allocation2 + $0x8] sm:$0xff] %v305_v2 }
  0xe7 PF: > { %v891_v3 = vld [vmem:[%s1148_s11 + $0x4] ss:$8 sps:$4 sm:$0xff]   ;;  %v893_v4 = vld [vmem:[%s1148_s11] ss:$8 sps:$4 sm:$0xff]   ;;  %v894_v5 = vld [vmem:[%s1148_s11 + $0x14] ss:$8 sps:$4 sm:$0xff]  }
  0xe8   : > { %508 = vmatprep.subr.bf16.mxu0 %v891_v3  ;;  %793 = vmatprep.subr.bf16.mxu1 %v891_v3  ;;  %v896_v6 = vld [vmem:[%s1148_s11 + $0x10] ss:$8 sps:$4 sm:$0xff]   ;;  %v897_v7 = vld [vmem:[%s1148_s11 + $0x24] ss:$8 sps:$4 sm:$0xff]   ;;  %v899_v8 = vld [vmem:[%s1148_s11 + $0x20] ss:$8 sps:$4 sm:$0xff]  }
  0xe9   : > { %509 = vmatpush1.bf16.msra.mxu0 %v893_v4  ;;  %809 = vmatpush1.bf16.msra.mxu1 %v893_v4  ;;  %v900_v9 = vld [vmem:[%s1148_s11 + $0x34] ss:$8 sps:$4 sm:$0xff]   ;;  %v902_v10 = vld [vmem:[%s1148_s11 + $0x30] ss:$8 sps:$4 sm:$0xff]   ;;  %v903_v11 = vld [vmem:[%s1148_s11 + $0x44] ss:$8 sps:$4 sm:$0xff]  }
  0xea   : > { %510 = vmatprep.subr.bf16.mxu0 %v894_v5  ;;  %794 = vmatprep.subr.bf16.mxu1 %v894_v5  ;;  %v905_v12 = vld [vmem:[%s1148_s11 + $0x40] ss:$8 sps:$4 sm:$0xff]   ;;  %v906_v13 = vld [vmem:[%s1148_s11 + $0x54] ss:$8 sps:$4 sm:$0xff]   ;;  %v908_v14 = vld [vmem:[%s1148_s11 + $0x50] ss:$8 sps:$4 sm:$0xff]  }
  0xeb   : > { %v909_v15 = vld [vmem:[%s1148_s11 + $0x64] ss:$8 sps:$4 sm:$0xff]   ;;  %v911_v18 = vld [vmem:[%s1148_s11 + $0x60] ss:$8 sps:$4 sm:$0xff]   ;;  %v912_v19 = vld [vmem:[%s1148_s11 + $0x74] ss:$8 sps:$4 sm:$0xff]  }
  0xec   : > { %v315_v17 = vld [vmem:[#allocation2 + $0x18] sm:$0xff]  ;;  %v915_v21 = vld [vmem:[%s1148_s11 + $0x84] ss:$8 sps:$4 sm:$0xff]   ;;  %v917_v22 = vld [vmem:[%s1148_s11 + $0x80] ss:$8 sps:$4 sm:$0xff]   ;;  %p1245_p8 = scmp.ne.s32.totalorder %s1242_s25, 0 }
  0xed   : > { %511 = vmatpush1.bf16.msra.mxu0 %v896_v6  ;;  %810 = vmatpush1.bf16.msra.mxu1 %v896_v6  ;;  %v313_v16 = vld [vmem:[#allocation2 + $0x8] sm:$0xff]  ;;  %v914_v20 = vld [vmem:[%s1148_s11 + $0x70] ss:$8 sps:$4 sm:$0xff]   ;;  %v918_v23 = vld [vmem:[%s1148_s11 + $0x94] ss:$8 sps:$4 sm:$0xff]   ;;  %s792_s28 = sshll.u32 (%p1245_p8), %s1011_s15, 3 }
  0xee   : > { %512 = vmatprep.subr.bf16.mxu0 %v897_v7  ;;  %795 = vmatprep.subr.bf16.mxu1 %v897_v7  ;;  %v920_v24 = vld [vmem:[%s1148_s11 + $0x90] ss:$8 sps:$4 sm:$0xff]   ;;  %v921_v25 = vld [vmem:[%s1148_s11 + $0xa4] ss:$8 sps:$4 sm:$0xff]   ;;  %v923_v26 = vld [vmem:[%s1148_s11 + $0xa0] ss:$8 sps:$4 sm:$0xff]   ;;  %s601_s5 = scalar_lea.vmem (%p1245_p8), %s1239_s3, %s792_s28 }
  0xef   : > { %540 = vmatprep.mubr.bf16.mxu0 %v313_v16  ;;  %550 = vmatprep.mubr.bf16.mxu1 %v315_v17  ;;  %v924_v27 = vld [vmem:[%s1148_s11 + $0xb4] ss:$8 sps:$4 sm:$0xff]   ;;  %v926_v28 = vld [vmem:[%s1148_s11 + $0xb0] ss:$8 sps:$4 sm:$0xff]   ;;  %v927_v29 = vld [vmem:[%s1148_s11 + $0xc4] ss:$8 sps:$4 sm:$0xff]  }
  0xf0   : > { %v929_v30 = vld [vmem:[%s1148_s11 + $0xc0] ss:$8 sps:$4 sm:$0xff]   ;;  %v930_v31 = vld [vmem:[%s1148_s11 + $0xd4] ss:$8 sps:$4 sm:$0xff]   ;;  %v932_v32 = vld [vmem:[%s1148_s11 + $0xd0] ss:$8 sps:$4 sm:$0xff]  }
  0xf1   : > { %513 = vmatpush1.bf16.msra.mxu0 %v899_v8  ;;  %811 = vmatpush1.bf16.msra.mxu1 %v899_v8  ;;  %v933_v33 = vld [vmem:[%s1148_s11 + $0xe4] ss:$8 sps:$4 sm:$0xff]   ;;  %v935_v34 = vld [vmem:[%s1148_s11 + $0xe0] ss:$8 sps:$4 sm:$0xff]   ;;  %v936_v35 = vld [vmem:[%s1148_s11 + $0xf4] ss:$8 sps:$4 sm:$0xff]  }
  0xf2   : > { %514 = vmatprep.subr.bf16.mxu0 %v900_v9  ;;  %796 = vmatprep.subr.bf16.mxu1 %v900_v9  ;;  %v938_v36 = vld [vmem:[%s1148_s11 + $0xf0] ss:$8 sps:$4 sm:$0xff]   ;;  %v312_v37 = vld [vmem:[#allocation2] sm:$0xff] }
  0xf3   : > { %v314_v38 = vld [vmem:[#allocation2 + $0x10] sm:$0xff] }
  0xf5   : > { %515 = vmatpush1.bf16.msra.mxu0 %v902_v10  ;;  %812 = vmatpush1.bf16.msra.mxu1 %v902_v10 }
  0xf6   : > { %516 = vmatprep.subr.bf16.mxu0 %v903_v11  ;;  %797 = vmatprep.subr.bf16.mxu1 %v903_v11 }
  0xf9   : > { %517 = vmatpush1.bf16.msra.mxu0 %v905_v12  ;;  %813 = vmatpush1.bf16.msra.mxu1 %v905_v12 }
  0xfa   : > { %518 = vmatprep.subr.bf16.mxu0 %v906_v13  ;;  %798 = vmatprep.subr.bf16.mxu1 %v906_v13 }
  0xfd   : > { %519 = vmatpush1.bf16.msra.mxu0 %v908_v14  ;;  %814 = vmatpush1.bf16.msra.mxu1 %v908_v14 }
  0xfe   : > { %520 = vmatprep.subr.bf16.mxu0 %v909_v15  ;;  %799 = vmatprep.subr.bf16.mxu1 %v909_v15 }
 0x101   : > { %521 = vmatpush1.bf16.msra.mxu0 %v911_v18  ;;  %815 = vmatpush1.bf16.msra.mxu1 %v911_v18 }
 0x102   : > { %522 = vmatprep.subr.bf16.mxu0 %v912_v19  ;;  %800 = vmatprep.subr.bf16.mxu1 %v912_v19 }
 0x105   : > { %523 = vmatpush1.bf16.msra.mxu0 %v914_v20  ;;  %816 = vmatpush1.bf16.msra.mxu1 %v914_v20 }
 0x106   : > { %524 = vmatprep.subr.bf16.mxu0 %v915_v21  ;;  %801 = vmatprep.subr.bf16.mxu1 %v915_v21 }
 0x109   : > { %525 = vmatpush1.bf16.msra.mxu0 %v917_v22  ;;  %817 = vmatpush1.bf16.msra.mxu1 %v917_v22 }
 0x10a   : > { %526 = vmatprep.subr.bf16.mxu0 %v918_v23  ;;  %802 = vmatprep.subr.bf16.mxu1 %v918_v23 }
 0x10d   : > { %527 = vmatpush1.bf16.msra.mxu0 %v920_v24  ;;  %818 = vmatpush1.bf16.msra.mxu1 %v920_v24 }
 0x10e   : > { %528 = vmatprep.subr.bf16.mxu0 %v921_v25  ;;  %803 = vmatprep.subr.bf16.mxu1 %v921_v25 }
 0x111   : > { %529 = vmatpush1.bf16.msra.mxu0 %v923_v26  ;;  %819 = vmatpush1.bf16.msra.mxu1 %v923_v26 }
 0x112   : > { %530 = vmatprep.subr.bf16.mxu0 %v924_v27  ;;  %804 = vmatprep.subr.bf16.mxu1 %v924_v27 }
 0x115   : > { %531 = vmatpush1.bf16.msra.mxu0 %v926_v28  ;;  %820 = vmatpush1.bf16.msra.mxu1 %v926_v28 }
 0x116   : > { %532 = vmatprep.subr.bf16.mxu0 %v927_v29  ;;  %805 = vmatprep.subr.bf16.mxu1 %v927_v29 }
 0x119   : > { %533 = vmatpush1.bf16.msra.mxu0 %v929_v30  ;;  %821 = vmatpush1.bf16.msra.mxu1 %v929_v30 }
 0x11a   : > { %534 = vmatprep.subr.bf16.mxu0 %v930_v31  ;;  %806 = vmatprep.subr.bf16.mxu1 %v930_v31 }
 0x11d   : > { %535 = vmatpush1.bf16.msra.mxu0 %v932_v32  ;;  %822 = vmatpush1.bf16.msra.mxu1 %v932_v32 }
 0x11e   : > { %536 = vmatprep.subr.bf16.mxu0 %v933_v33  ;;  %807 = vmatprep.subr.bf16.mxu1 %v933_v33 }
 0x121   : > { %537 = vmatpush1.bf16.msra.mxu0 %v935_v34  ;;  %823 = vmatpush1.bf16.msra.mxu1 %v935_v34 }
 0x122   : > { %538 = vmatprep.subr.bf16.mxu0 %v936_v35  ;;  %808 = vmatprep.subr.bf16.mxu1 %v936_v35 }
 0x125   : > { %539 = vmatpush1.bf16.msra.mxu0 %v938_v36  ;;  %824 = vmatpush1.bf16.msra.mxu1 %v938_v36 }
 0x128   : > { %541 = vmatmul.mubr.bf16.vlgmr.msra.gmra.mrb[0].mxu0 %v312_v37  ;;  %551 = vmatmul.mubr.bf16.vlgmr.msra.gmra.mrb[0].mxu1 %v314_v38 }
 0x1fb   : > { %v542_v39 = vpop.f32.mrb[0].mxu0  ;;  %v552_v40 = vpop.f32.mrb[0].mxu1  ;;  %595 = sbr.rel (!%p1245_p8) target bundleno = 522 (0x20a), region = 44 }
 0x1fc   : > { %v544_v41 = vpop.f32.mrb[1].mxu0  ;;  %v554_v42 = vpop.f32.mrb[1].mxu1 }
 0x1fd   : > { %v788_v43 = vpack.c.bf16 %v544_v41, %v542_v39  ;;  %v790_v44 = vpack.c.bf16 %v554_v42, %v552_v40  ;;  %v546_v45 = vpop.f32.mrb[2].mxu0  ;;  %v556_v46 = vpop.f32.mrb[2].mxu1 }
 0x1fe   : > { %v548_v47 = vpop.f32.mrb[3].mxu0  ;;  %v558_v48 = vpop.f32.mrb[3].mxu1 }
 0x1ff   : > { %585 = vst [vmem:[%s1154_s18] sm:$0xff] %v788_v43  ;;  %587 = vst [vmem:[%s1154_s18 + $0x10] sm:$0xff] %v790_v44  ;;  %v789_v49 = vpack.c.bf16 %v548_v47, %v546_v45  ;;  %v791_v50 = vpack.c.bf16 %v558_v48, %v556_v46 }
 0x201   : > { %586 = vst [vmem:[%s1154_s18 + $0x8] sm:$0xff] %v789_v49  ;;  %588 = vst [vmem:[%s1154_s18 + $0x18] sm:$0xff] %v791_v50 }
 0x206   : > { %v635_v51 = vld [vmem:[%s1154_s18] sm:$0xff]  ;;  %v639_v53 = vld [vmem:[%s1154_s18 + $0x10] sm:$0xff] }
 0x207   : > { %636 = vst [vmem:[%s601_s5] sm:$0xff] %v635_v51  ;;  %640 = vst [vmem:[%s601_s5 + $0x30] sm:$0xff] %v639_v53 }
 0x208   : > { %v637_v52 = vld [vmem:[%s1154_s18 + $0x8] sm:$0xff]  ;;  %v641_v54 = vld [vmem:[%s1154_s18 + $0x18] sm:$0xff] }
 0x209   : > { %638 = vst [vmem:[%s601_s5 + $0x18] sm:$0xff] %v637_v52  ;;  %642 = vst [vmem:[%s601_s5 + $0x48] sm:$0xff] %v641_v54 }
 0x20a PF: > { %s16_s17 = sadd.s32 1, %s1019_s17   ;;  %s1246_s12 = smov %s1003_s13 }
 0x20b   : > { %p13_p11 = scmp.ge.s32.totalorder %s16_s17, 5   ;;  %s1247_s13 = smov %s1007_s14 }
 0x20c   : > { %s1248_s14 = smov %s1093_s24  ;;  %s1249_s15 = smov %s1015_s16 }
 0x20d   : > { %s1250_s16 = smov %s1252_s19  ;;  %15 = sbr.rel (!%p13_p11) target bundleno = 4 (0x4), region = 117 }
 0x214   :  { %658 = vsyncpa [#allocation4], 1 }
 0x215   :  { %660 = vsyncpa [#allocation4 + $0x1], 1 }

// kernel: baseline_llm_loss.10
= control target key start
LH: loop header
LB: loop body
LE: loop exit
PB: predicated region body
PF: predicated region fallthrough
CT: control target
= control target key end

     0   :  { %s1405_s0 = inlined_call_operand.vmem [shape: bf16[2,16,768], index: 0, kind: input, shape index: {}, may-alias: {0,1,2}]   ;;  %s1406_s1 = inlined_call_operand.vmem [shape: bf16[2,16,768], index: 1, kind: input, shape index: {}, may-alias: {0,1,2}]   ;;  %s1407_s2 = inlined_call_operand.vmem [shape: bf16[2,16,768], index: 2, kind: input, shape index: {}, may-alias: {0,1,2}]   ;;  %s1408_s3 = inlined_call_operand.vmem [shape: f32[2,1,16], index: 3, kind: input, shape index: {}]   ;;  %s1409_s4 = inlined_call_operand.vmem [shape: bf16[2,16,256], index: 4, kind: output, shape index: {}]  }
   0x1   :  { %1412 = sst [smem:[#allocation14_spill]] %s1409_s4 }
   0x2   :  { %s1193_s15 = smov 0   ;;  %s1195_s16 = smov 0  }
   0x3   :  { %s1197_s17 = smov 0   ;;  %s1199_s18 = smov 0  }
   0x4   :  { %s1201_s19 = smov 0   ;;  %s1203_s20 = smov 0  }
   0x5   :  { %s1205_s21 = smov 0   ;;  %s1207_s22 = smov 0  }
   0x6   :  { %s1209_s23 = smov 0   ;;  %s1211_s24 = smov 0  }
   0x7   :  { %s1213_s25 = smov 0  }
   0x8 LB: > { %1413 = sst [smem:[#allocation10_spill]] %s1146_s21  ;;  %s36_s27 = sadd.s32 1, %s1154_s23  ;;  %s1162_s25 = sphi %s1213_s25, %s14_s25   ;;  %s1158_s24 = sphi %s1211_s24, %s1436_s24   ;;  %s1154_s23 = sphi %s1209_s23, %s1435_s23   ;;  %s1150_s22 = sphi %s1207_s22, %s1434_s22   ;;  %s1146_s21 = sphi %s1205_s21, %s1433_s21   ;;  %s1142_s20 = sphi %s1203_s20, %s1432_s20   ;;  %s1138_s19 = sphi %s1201_s19, %s1431_s19   ;;  %s1134_s18 = sphi %s1199_s18, %s1430_s18   ;;  %s1130_s17 = sphi %s1197_s17, %s1429_s17   ;;  %s1126_s16 = sphi %s1195_s16, %s1428_s16   ;;  %s1122_s15 = sphi %s1193_s15, %s1427_s15  }
   0x9   : > { %p38_p0 = scmp.ge.s32.totalorder %s36_s27, 2  ;;  %s40_s28 = sadd.s32 1, %s1158_s24 }
   0xa   : > { %s51_s29 = sadd.s32 1, %s1142_s20  ;;  %p58_p1 = scmp.ne.s32.totalorder %s1142_s20, %s1138_s19 }
   0xb   : > { %s1438_s27 = smov (%p38_p0, %s36_s27), 0  ;;  %s1440_s28 = smov (!%p38_p0, %s40_s28), %s1158_s24 }
   0xc   : > { %1414 = sst [smem:[#allocation11_spill]] %s1438_s27  ;;  %s47_s30 = ssub.s32 %s1154_s23, %s1438_s27 }
   0xd   : > { %p59_p2 = scmp.eq.s32.totalorder %s1162_s25, 0  ;;  %p42_p3 = scmp.ge.s32.totalorder %s1440_s28, 2 }
   0xe   : > { %s74_s5 = sadd.s32 2, %s1154_s23  ;;  %s75_s7 = sadd.s32 2, %s1438_s27 }
   0xf   : > { %p1266_p4 = por %p59_p2, %p58_p1  ;;  %s1442_s28 = smov (%p42_p3, %s1440_s28), 0 }
  0x10   : > { %1416 = sst [smem:[#allocation12_spill]] %s1442_s28  ;;  %s79_s8 = ssub.s32 %s74_s5, %s75_s7 }
  0x11   : > { %s83_s9 = sadd.s32 1, %s1134_s18  ;;  %s44_s10 = ssub.s32 %s1158_s24, %s1442_s28 }
  0x12   : > { %p90_p5 = scmp.ne.s32.totalorder %s1134_s18, %s1130_s17  ;;  %s48_s11 = sor.u32 %s47_s30, %s44_s10 }
  0x13   : > { %s80_s12 = sor.u32 %s79_s8, %s44_s10  ;;  %p49_p6 = scmp.eq.s32.totalorder %s48_s11, 0 }
  0x14   : > { %p81_p7 = scmp.eq.s32.totalorder %s80_s12, 0  ;;  %p1280_p8 = por %p90_p5, %p59_p2 }
  0x15   : > { %s106_s14 = sadd.s32 4, %s1154_s23  ;;  %s107_s7 = sadd.s32 4, %s1438_s27 }
  0x16   : > { %s1286_s26 = scalar_select %p49_p6, %s1142_s20, %s51_s29  }
  0x17   : > { %s1289_s5 = scalar_select %p81_p7, %s1134_s18, %s83_s9  }
  0x18   : > { %1418 = sst [smem:[#allocation13_spill]] %s1286_s26  ;;  %s115_s28 = sadd.s32 1, %s1126_s16 }
  0x19   : > { %s111_s4 = ssub.s32 %s106_s14, %s107_s7  ;;  %p122_p9 = scmp.ne.s32.totalorder %s1126_s16, %s1122_s15 }
  0x1a   : > { %s112_s30 = sor.u32 %s111_s4, %s44_s10  ;;  %s1419_s21 = sadd.s32 4294967295, %s1162_s25  }
  0x1b   : > { %p184_p10 = scmp.eq.s32.totalorder %s1419_s21, 3  ;;  %p113_p11 = scmp.eq.s32.totalorder %s112_s30, 0 }
  0x1c   : > { %p1299_p12 = por %p122_p9, %p59_p2  ;;  %p914_p0 = scmp.ge.s32.totalorder %s1162_s25, 4 }
  0x1d   : > { %p1306_p13 = por %p184_p10, %p58_p1 }
  0x1e   : > { %s1311_s29 = scalar_select %p113_p11, %s1126_s16, %s115_s28  }
  0x1f   : > { %206 = sbr.rel (%p914_p0) target bundleno = 62 (0x3e), region = 16 }
  0x26   : > { %209 = sbr.rel (!%p1266_p4) target bundleno = 46 (0x2e), region = 20  ;;  %s211_s4 = sand.u32 (%p1266_p4), 1, %s1142_s20  }
  0x27   : > { %s967_s21 = smul.u32 (%p1266_p4), 12, %s1158_s24  ;;  %s915_s9 = sshll.u32 (%p1266_p4), %s211_s4, 3 }
  0x28   : > { %s213_s28 = scalar_lea.vmem (%p1266_p4), [#allocation6], %s915_s9 }
  0x29   : > { %s218_s10 = sadd.s32 (%p1266_p4), %s1154_s23, %s967_s21 }
  0x2a   : > { %s916_s12 = sshll.u32 (%p1266_p4), %s218_s10, 2 }
  0x2b   : > { %s220_s30 = scalar_lea.vmem (%p1266_p4), %s1405_s0, %s916_s12 }
  0x2c   : > { %v236_v0 = vld [vmem:[%s220_s30] sm:$0xf] (%p1266_p4)  ;;  %v238_v1 = vld [vmem:[%s220_s30 + $0x18] sm:$0xf] (%p1266_p4) }
  0x2d   : > { %237 = vst [vmem:[%s213_s28] sm:$0xf] %v236_v0  ;;  %239 = vst [vmem:[%s213_s28 + $0x4] sm:$0xf] %v238_v1 }
  0x2e PF: > { %266 = sbr.rel (!%p1280_p8) target bundleno = 54 (0x36), region = 61  ;;  %s268_s6 = sand.u32 (%p1280_p8), 1, %s1134_s18  }
  0x2f   : > { %s795_s4 = smul.u32 (%p1280_p8), 12, %s1158_s24  ;;  %s917_s21 = sshll.u32 (%p1280_p8), %s268_s6, 3 }
  0x30   : > { %s270_s9 = scalar_lea.vmem (%p1280_p8), [#allocation7], %s917_s21 }
  0x31   : > { %s796_s10 = sadd.s32 (%p1280_p8), %s1154_s23, %s795_s4 }
  0x32   : > { %s918_s27 = sshll.u32 (%p1280_p8), %s796_s10, 2 }
  0x33   : > { %s798_s12 = scalar_lea.vmem (%p1280_p8), %s1406_s1, %s918_s27 }
  0x34   : > { %v919_v2 = vld [vmem:[%s798_s12 + $0x8] sm:$0xf] (%p1280_p8)  ;;  %v920_v3 = vld [vmem:[%s798_s12 + $0x20] sm:$0xf] (%p1280_p8) }
  0x35   : > { %295 = vst [vmem:[%s270_s9] sm:$0xf] %v919_v2  ;;  %297 = vst [vmem:[%s270_s9 + $0x4] sm:$0xf] %v920_v3 }
  0x36 PF: > { %324 = sbr.rel (!%p1299_p12) target bundleno = 62 (0x3e), region = 102  ;;  %s326_s13 = sand.u32 (%p1299_p12), 1, %s1126_s16  }
  0x37   : > { %s804_s7 = smul.u32 (%p1299_p12), 12, %s1158_s24  ;;  %s921_s30 = sshll.u32 (%p1299_p12), %s326_s13, 3 }
  0x38   : > { %s328_s21 = scalar_lea.vmem (%p1299_p12), [#allocation8], %s921_s30 }
  0x39   : > { %s805_s28 = sadd.s32 (%p1299_p12), %s1154_s23, %s804_s7 }
  0x3a   : > { %s922_s6 = sshll.u32 (%p1299_p12), %s805_s28, 2 }
  0x3b   : > { %s807_s27 = scalar_lea.vmem (%p1299_p12), %s1407_s2, %s922_s6 }
  0x3c   : > { %v923_v4 = vld [vmem:[%s807_s27 + $0x10] sm:$0xf] (%p1299_p12)  ;;  %v924_v5 = vld [vmem:[%s807_s27 + $0x28] sm:$0xf] (%p1299_p12) }
  0x3d   : > { %353 = vst [vmem:[%s328_s21] sm:$0xf] %v923_v4  ;;  %355 = vst [vmem:[%s328_s21 + $0x4] sm:$0xf] %v924_v5 }
  0x3e PF: > { %p925_p1 = scmp.ge.s32.totalorder %s1162_s25, 1  ;;  %p390_p2 = scmp.lt.s32.totalorder %s1162_s25, 5 }
  0x40   : > { %p391_p3 = pnand %p925_p1, %p390_p2 }
  0x41   : > { %s404_s8 = sand.u32 (!%p391_p3), 1, %s1130_s17   ;;  %s397_s10 = sand.u32 (!%p391_p3), 1, %s1138_s19   ;;  %v1164_v6 = vmov (!%p391_p3), 0.0   ;;  %vm1165_vm0 = vmmov (!%p391_p3), 0   ;;  %v1166_v14 = vmov (!%p391_p3), 0   ;;  %vm474_vm1 = vcmask (!%p391_p3), 7168  }
  0x42   : > { %394 = sbr.rel (%p391_p3) target bundleno = 886 (0x376), region = 147  ;;  %955 = vmatprep.subr.bf16.mxu0 (!%p391_p3), %v1164_v6  ;;  %s927_s14 = sshll.u32 (!%p391_p3), %s404_s8, 3  ;;  %957 = vmatprep.mubr.msk.bf16.mxu0 (!%p391_p3), %vm1165_vm0, %v1164_v6  ;;  %v1167_v15 = vmov (!%p391_p3), -1e+30   ;;  %477 = vst.msk [vmem:[#allocation4] sm:$0xff] (!%p391_p3), %vm474_vm1, %v1164_v6  ;;  %478 = vst.msk [vmem:[#allocation4 + $0x8] sm:$0xff] (!%p391_p3), %vm474_vm1, %v1164_v6  ;;  %v538_v16 = vlaneseq (!%p391_p3) }
  0x43   : > { %s1342_s12 = sshll.u32 (!%p391_p3), %s397_s10, 3  ;;  %961 = vmatprep.subr.bf16.mxu1 (!%p391_p3), %v1164_v6  ;;  %963 = vmatprep.mubr.msk.bf16.mxu1 (!%p391_p3), %vm1165_vm0, %v1164_v6  ;;  %s406_s9 = scalar_lea.vmem (!%p391_p3), [#allocation7], %s927_s14  ;;  %475 = vst.msk [vmem:[#allocation3] sm:$0xff] (!%p391_p3), %vm474_vm1, %v1167_v15  ;;  %476 = vst.msk [vmem:[#allocation3 + $0x8] sm:$0xff] (!%p391_p3), %vm474_vm1, %v1167_v15  ;;  %vm564_vm7 = vcmask (!%p391_p3), 130048  }
  0x44   : > { %v1062_v7 = vld [vmem:[%s406_s9] sm:$0xff] (!%p391_p3)   ;;  %s399_s13 = scalar_lea.vmem (!%p391_p3), [#allocation6], %s1342_s12  ;;  %1060 = vset.pattern.permute.xlu1 (!%p391_p3), %v1166_v14  ;;  %1061 = vset.pattern.permute.xlu0 (!%p391_p3), %v1166_v14  ;;  %p454_p4 = scmp.lt.s32.totalorder (!%p391_p3), %s1150_s22, 1  ;;  %v539_v18 = vshrl.u32 (!%p391_p3), %v538_v16, 7  ;;  %v545_v21 = vand.u32 (!%p391_p3), 127, %v538_v16 }
  0x45   : > { %v943_v8 = vld [vmem:[%s399_s13] sm:$0xff] (!%p391_p3)   ;;  %956 = vmatpush3.bf16.xpose.msra.mxu0 (!%p391_p3), %v1062_v7  ;;  %s411_s28 = sand.u32 (!%p391_p3), 1, %s1122_s15   ;;  %s448_s15 = scalar_lea.vmem (!%p391_p3), [#allocation9], %s1342_s12 }
  0x46   : > { %v944_v9 = vunpack.c.l.bf16 (!%p391_p3), %v943_v8  ;;  %v945_v10 = vunpack.c.h.bf16 (!%p391_p3), %v943_v8  ;;  %v555_v19 = vsub.s32 (!%p391_p3), 0, %v539_v18  ;;  %v540_v23 = vadd.s32 (!%p391_p3), 8, %v539_v18  ;;  %s928_s6 = sshll.u32 (!%p391_p3), %s411_s28, 3 }
  0x47   : > { %vm548_vm3 = vcmp.le.s32.totalorder (!%p391_p3), %v545_v21, %v539_v18  ;;  %s413_s4 = scalar_lea.vmem (!%p391_p3), [#allocation8], %s928_s6 }
  0x48   : > { %v470_v11 = vmul.f32 (!%p391_p3), 0.088388346, %v944_v9  ;;  %v471_v12 = vmul.f32 (!%p391_p3), 0.088388346, %v945_v10  ;;  %vm549_vm5 = vcmp.le.s32.totalorder (!%p391_p3), %v545_v21, %v540_v23  ;;  %v1063_v40 = vld [vmem:[%s413_s4] sm:$0xff] (!%p391_p3)  }
  0x49   : > { %s455_s17 = scalar_select %p454_p4, %s1150_s22, 1  ;;  %962 = vmatpush3.bf16.msra.mxu1 %v1063_v40  ;;  %v595_v56 = vld [vmem:[#allocation4] sm:$0xff]  ;;  %v596_v59 = vld [vmem:[#allocation4 + $0x8] sm:$0xff] }
  0x4a   : > { %v472_v13 = vpack.c.bf16 %v471_v12, %v470_v11  ;;  %v562_v32 = vld [vmem:[#allocation3] sm:$0xff]  ;;  %v563_v35 = vld [vmem:[#allocation3 + $0x8] sm:$0xff]  ;;  %s1422_s26 = sld [smem:[#allocation10_spill]] (%p1306_p13)  ;;  %s936_s27 = sshll.u32 (%p1306_p13), %s1150_s22, 2 }
  0x4b   : > { %s459_s30 = scalar_lea.vmem %s1408_s3, %s455_s17  ;;  %s1423_s9 = sld [smem:[#allocation14_spill]] (%p1306_p13) }
  0x4c   : > { %958 = vmatmul.mubr.bf16.vlgmr.msra.gmra.mrb[0].mxu0 %v472_v13  ;;  %v550_v17 = vld [vmem:[%s459_s30] sm:$0x1] }
  0x4d   : > { %vm551_vm2 = vcmp.gt.f32.partialorder %v550_v17, 0.5 }
  0x4e   : > { %v552_v20 = vsel %vm551_vm2, 1, %v1166_v14 }
  0x4f   : > { %v556_v22 = vrot.slane %v552_v20, %v555_v19 }
  0x50   : > { %s725_s21 = sadd.s32 (%p1306_p13), %s1422_s26, %s936_s27 }
  0x51   : > { %vm557_vm4 = vcmp.eq.s32.totalorder %v556_v22, 1  ;;  %s937_s8 = sshll.u32 (%p1306_p13), %s725_s21, 2 }
  0x52   : > { %vm558_vm6 = vmand %vm548_vm3, %vm557_vm4  ;;  %s727_s13 = scalar_lea.vmem (%p1306_p13), %s1423_s9, %s937_s8 }
  0x53   : > { %vm559_vm8 = vmand %vm549_vm5, %vm557_vm4 }
 0x11f   : > { %v531_v24 = vpop.f32.mrb[0].mxu0 }
 0x120   : > { %v560_v25 = vsel %vm558_vm6, %v531_v24, -1e+30  ;;  %v959_v26 = vpop.f32.mrb[1].mxu0 }
 0x121   : > { %v534_v27 = vpop.f32.mrb[2].mxu0  ;;  %v565_v28 = vsel %vm564_vm7, %v560_v25, -inf }
 0x122   : > { %v561_v29 = vsel %vm559_vm8, %v534_v27, -1e+30  ;;  %566 = vmax.xlane.f32.xlu0 %v565_v28  ;;  %v960_v30 = vpop.f32.mrb[3].mxu0 }
 0x123   : > { %v568_v31 = vsel %vm564_vm7, %v561_v29, -inf }
 0x126   : > { %569 = vmax.xlane.f32.xlu0 %v568_v31 }
 0x1af   : > { %v567_v33 = vpop.xlane.xlu0 %566 }
 0x1b0   : > { %v571_v34 = vmax.f32 %v562_v32, %v567_v33 }
 0x1b2   : > { %v573_v36 = vsub.f32 %v562_v32, %v571_v34  ;;  %681 = vst.msk [vmem:[#allocation3] sm:$0xff] %vm474_vm1, %v571_v34  ;;  %581 = vperm.xlu1 %1060, %v571_v34  }
 0x1b3   : > { %v570_v37 = vpop.xlane.xlu0 %569 }
 0x1b4   : > { %v572_v38 = vmax.f32 %v563_v35, %v570_v37  ;;  %v575_v53 = vmul.f32 1.442695, %v573_v36 }
 0x1b6   : > { %v574_v39 = vsub.f32 %v563_v35, %v572_v38  ;;  %682 = vst.msk [vmem:[#allocation3 + $0x8] sm:$0xff] %vm474_vm1, %v572_v38  ;;  %586 = vperm.xlu1 %1060, %v572_v38  }
 0x1b8   : > { %v577_v52 = vmul.f32 1.442695, %v574_v39 }
 0x231   : > { %v582_v41 = vpop.permute.xlu1 %581 }
 0x232   : > { %v589_v42 = vsub.f32 %v560_v25, %v582_v41 }
 0x234   : > { %v591_v43 = vmul.f32 1.442695, %v589_v42 }
 0x235   : > { %v587_v44 = vpop.permute.xlu1 %586 }
 0x236   : > { %1064 = vpow2.f32 %v591_v43  ;;  %v590_v45 = vsub.f32 %v561_v29, %v587_v44 }
 0x238   : > { %v593_v46 = vmul.f32 1.442695, %v590_v45 }
 0x23a   : > { %1066 = vpow2.f32 %v593_v46 }
 0x23b   : > { %1068 = vpow2.f32 %v577_v52 }
 0x23c   : > { %1070 = vpow2.f32 %v575_v53 }
 0x240   : > { %v1065_v47 = vpop.eup %1064 }
 0x241   : > { %v599_v48 = vsel %vm564_vm7, %v1065_v47, 0.0 }
 0x242   : > { %600 = vadd.xlane.f32.xlu0 %v599_v48 }
 0x244   : > { %v1067_v49 = vpop.eup %1066 }
 0x245   : > { %v602_v50 = vsel %vm564_vm7, %v1067_v49, 0.0  ;;  %v624_v51 = vpack.c.bf16 %v1067_v49, %v1065_v47  ;;  %v1069_v54 = vpop.eup %1068 }
 0x246   : > { %603 = vadd.xlane.f32.xlu1 %v602_v50  ;;  %v1071_v55 = vpop.eup %1070  ;;  %v598_v61 = vmul.f32 %v1069_v54, %v596_v59 }
 0x247   : > { %964 = vmatmul.mubr.msk.bf16.vlgmr.msra.gmra.mrb[0].mxu1 %vm564_vm7, %v624_v51  ;;  %v597_v57 = vmul.f32 %v1071_v55, %v595_v56 }
 0x257   : > { %619 = vperm.xlu1 %1060, %v1069_v54  }
 0x258   : > { %614 = vperm.xlu0 %1061, %v1071_v55  }
 0x2cf   : > { %v601_v58 = vpop.xlane.xlu0 %600 }
 0x2d0   : > { %v605_v60 = vadd.f32 %v601_v58, %v597_v57 }
 0x2d2   : > { %608 = vst.msk [vmem:[#allocation4] sm:$0xff] %vm474_vm1, %v605_v60 }
 0x2d3   : > { %v604_v62 = vpop.xlane.xlu1 %603 }
 0x2d4   : > { %v606_v63 = vadd.f32 %v604_v62, %v598_v61 }
 0x2d6   : > { %609 = vst.msk [vmem:[#allocation4 + $0x8] sm:$0xff] %vm474_vm1, %v606_v63 }
 0x2d7   : > { %v615_v8 = vpop.permute.xlu0 %614  ;;  %v620_v9 = vpop.permute.xlu1 %619 }
 0x2d8   : > { %v623_v11 = vmul.f32 0.0, %v620_v9  ;;  %v622_v12 = vmul.f32 0.0, %v615_v8 }
 0x2d9   : > { %v688_v0 = vld [vmem:[#allocation4] sm:$0xff] }
 0x2da   : > { %1072 = vrcp.f32 %v688_v0 }
 0x2dd   : > { %v689_v1 = vld [vmem:[#allocation4 + $0x8] sm:$0xff] }
 0x2de   : > { %1074 = vrcp.f32 %v689_v1 }
 0x2e4   : > { %v1073_v2 = vpop.eup %1072 }
 0x2e5   : > { %694 = vperm.xlu0 %1061, %v1073_v2  }
 0x2e8   : > { %v1075_v3 = vpop.eup %1074 }
 0x2e9   : > { %699 = vperm.xlu0 %1061, %v1075_v3  }
 0x31a   : > { %v670_v4 = vpop.f32.mrb[0].mxu1 }
 0x31b   : > { %v965_v5 = vpop.f32.mrb[1].mxu1  ;;  %v677_v13 = vadd.f32 %v670_v4, %v622_v12 }
 0x31c   : > { %v673_v6 = vpop.f32.mrb[2].mxu1 }
 0x31d   : > { %v966_v7 = vpop.f32.mrb[3].mxu1  ;;  %v678_v14 = vadd.f32 %v673_v6, %v623_v11 }
 0x364   : > { %v695_v10 = vpop.permute.xlu0 %694 }
 0x365   : > { %v702_v16 = vmul.f32 %v695_v10, %v677_v13 }
 0x367   : > { %720 = sbr.rel (!%p1306_p13) target bundleno = 886 (0x376), region = 175 }
 0x368   : > { %v700_v15 = vpop.permute.xlu0 %699 }
 0x369   : > { %v703_v17 = vmul.f32 %v700_v15, %v678_v14 }
 0x36b   : > { %v949_v18 = vpack.c.bf16 %v703_v17, %v702_v16 }
 0x36d   : > { %950 = vst [vmem:[%s448_s15] sm:$0xff] %v949_v18  }
 0x374   : > { %v743_v19 = vld [vmem:[%s448_s15] sm:$0xf]  ;;  %v745_v20 = vld [vmem:[%s448_s15 + $0x4] sm:$0xf] }
 0x375   : > { %744 = vst [vmem:[%s727_s13] sm:$0xf] %v743_v19  ;;  %746 = vst [vmem:[%s727_s13 + $0x8] sm:$0xf] %v745_v20 }
 0x376 PF: > { %s14_s25 = sadd.s32 1, %s1162_s25   ;;  %s1424_s22 = sld [smem:[#allocation13_spill]] }
 0x377   : > { %p11_p5 = scmp.ge.s32.totalorder %s14_s25, 6   ;;  %s1425_s11 = sld [smem:[#allocation11_spill]] }
 0x378   : > { %s1426_s12 = sld [smem:[#allocation12_spill]]  ;;  %s1427_s15 = smov %s1126_s16 }
 0x379   : > { %s1428_s16 = smov %s1311_s29  ;;  %s1429_s17 = smov %s1134_s18 }
 0x37a   : > { %s1430_s18 = smov %s1289_s5  ;;  %s1431_s19 = smov %s1142_s20 }
 0x37b   : > { %s1433_s21 = smov %s1154_s23  ;;  %13 = sbr.rel (!%p11_p5) target bundleno = 8 (0x8), region = 266 }
 0x37c   : > { %s1432_s20 = smov %s1424_s22  ;;  %s1434_s22 = smov %s1158_s24 }
 0x37d   : > { %s1435_s23 = smov %s1425_s11 }
 0x37e   : > { %s1436_s24 = smov %s1426_s12 }

// kernel: baseline_llm_loss.13
= control target key start
LH: loop header
LB: loop body
LE: loop exit
PB: predicated region body
PF: predicated region fallthrough
CT: control target
= control target key end

     0   :  { %s1115_s12 = smov 0   ;;  %s1117_s13 = smov 0   ;;  %s1315_s0 = inlined_call_operand.vmem [shape: bf16[32,256], index: 0, kind: input, shape index: {}]   ;;  %s1316_s1 = inlined_call_operand.vmem [shape: f32[1,256], index: 1, kind: input, shape index: {}]   ;;  %s1317_s2 = inlined_call_operand.vmem [shape: bf16[256,768], index: 2, kind: input, shape index: {}]   ;;  %s1318_s3 = inlined_call_operand.vmem [shape: bf16[32,768], index: 3, kind: output, shape index: {}]  }
   0x1   :  { %s1119_s14 = smov 0   ;;  %s1121_s15 = smov 0  }
   0x2   :  { %s1123_s16 = smov 0  }
   0x3 LB: > { %s22_s17 = sadd.s32 1, %s1089_s15  ;;  %s868_s18 = sadd.s32 4294967295, %s1093_s16   ;;  %s1093_s16 = sphi %s1123_s16, %s13_s16   ;;  %s1089_s15 = sphi %s1121_s15, %s1323_s15   ;;  %s1085_s14 = sphi %s1119_s14, %s1322_s14   ;;  %s1081_s13 = sphi %s1117_s13, %s1321_s13   ;;  %s1077_s12 = sphi %s1115_s12, %s1320_s12  }
   0x4   : > { %p23_p0 = scmp.ge.s32.totalorder %s22_s17, 3  ;;  %p86_p1 = scmp.ne.s32.totalorder %s1081_s13, %s1077_s12 }
   0x5   : > { %p87_p2 = scmp.eq.s32.totalorder %s1093_s16, 0  ;;  %p118_p4 = scmp.eq.s32.totalorder %s868_s18, 2 }
   0x6   : > { %s1325_s17 = smov (%p23_p0, %s22_s17), 0  ;;  %s79_s20 = sadd.s32 1, %s1081_s13 }
   0x7   : > { %p88_p3 = por %p87_p2, %p86_p1  ;;  %s76_s19 = ssub.s32 %s1089_s15, %s1325_s17 }
   0x8   : > { %p77_p5 = scmp.eq.s32.totalorder %s76_s19, 0  ;;  %p1150_p6 = por %p118_p4, %p86_p1 }
   0x9   : > { %p872_p7 = scmp.ge.s32.totalorder %s1093_s16, 3 }
   0xa   : > { %s1155_s22 = scalar_select %p77_p5, %s1081_s13, %s79_s20  }
   0xb   : > { %153 = sbr.rel (%p872_p7) target bundleno = 38 (0x26), region = 24 }
  0x12   : > { %156 = sbr.rel (!%p88_p3) target bundleno = 38 (0x26), region = 28  ;;  %s158_s23 = sand.u32 (%p88_p3), 1, %s1081_s13  }
  0x13   : > { %s921_s24 = sshll.u32 (%p88_p3), %s1089_s15, 3  ;;  %s873_s25 = sshll.u32 (%p88_p3), %s158_s23, 8 }
  0x14   : > { %s1163_s28 = scalar_lea.vmem (%p88_p3), %s1317_s2, %s921_s24  ;;  %s1168_s29 = scalar_lea.vmem (%p88_p3), [#allocation3], %s873_s25 }
  0x15   : > { %v253_v0 = vld [vmem:[%s1163_s28] sm:$0xff] (%p88_p3)  ;;  %v255_v1 = vld [vmem:[%s1163_s28 + $0x18] sm:$0xff] (%p88_p3)  ;;  %v257_v2 = vld [vmem:[%s1163_s28 + $0x30] sm:$0xff] (%p88_p3) }
  0x16   : > { %254 = vst [vmem:[%s1168_s29] sm:$0xff] (%p88_p3), %v253_v0  ;;  %256 = vst [vmem:[%s1168_s29 + $0x8] sm:$0xff] (%p88_p3), %v255_v1  ;;  %v259_v3 = vld [vmem:[%s1163_s28 + $0x48] sm:$0xff] (%p88_p3)  ;;  %v261_v4 = vld [vmem:[%s1163_s28 + $0x60] sm:$0xff] (%p88_p3) }
  0x17   : > { %258 = vst [vmem:[%s1168_s29 + $0x10] sm:$0xff] (%p88_p3), %v257_v2  ;;  %v263_v5 = vld [vmem:[%s1163_s28 + $0x78] sm:$0xff] (%p88_p3)  ;;  %260 = vst [vmem:[%s1168_s29 + $0x18] sm:$0xff] (%p88_p3), %v259_v3  ;;  %v265_v6 = vld [vmem:[%s1163_s28 + $0x90] sm:$0xff] (%p88_p3) }
  0x18   : > { %262 = vst [vmem:[%s1168_s29 + $0x20] sm:$0xff] (%p88_p3), %v261_v4  ;;  %264 = vst [vmem:[%s1168_s29 + $0x28] sm:$0xff] (%p88_p3), %v263_v5  ;;  %v267_v7 = vld [vmem:[%s1163_s28 + $0xa8] sm:$0xff] (%p88_p3)  ;;  %v269_v8 = vld [vmem:[%s1163_s28 + $0xc0] sm:$0xff] (%p88_p3) }
  0x19   : > { %266 = vst [vmem:[%s1168_s29 + $0x30] sm:$0xff] %v265_v6  ;;  %268 = vst [vmem:[%s1168_s29 + $0x38] sm:$0xff] %v267_v7  ;;  %v271_v9 = vld [vmem:[%s1163_s28 + $0xd8] sm:$0xff]  ;;  %v273_v10 = vld [vmem:[%s1163_s28 + $0xf0] sm:$0xff] }
  0x1a   : > { %270 = vst [vmem:[%s1168_s29 + $0x40] sm:$0xff] %v269_v8  ;;  %v275_v11 = vld [vmem:[%s1163_s28 + $0x108] sm:$0xff]  ;;  %272 = vst [vmem:[%s1168_s29 + $0x48] sm:$0xff] %v271_v9  ;;  %v277_v12 = vld [vmem:[%s1163_s28 + $0x120] sm:$0xff] }
  0x1b   : > { %274 = vst [vmem:[%s1168_s29 + $0x50] sm:$0xff] %v273_v10  ;;  %276 = vst [vmem:[%s1168_s29 + $0x58] sm:$0xff] %v275_v11  ;;  %v279_v13 = vld [vmem:[%s1163_s28 + $0x138] sm:$0xff]  ;;  %v281_v14 = vld [vmem:[%s1163_s28 + $0x150] sm:$0xff] }
  0x1c   : > { %278 = vst [vmem:[%s1168_s29 + $0x60] sm:$0xff] %v277_v12  ;;  %280 = vst [vmem:[%s1168_s29 + $0x68] sm:$0xff] %v279_v13  ;;  %v283_v15 = vld [vmem:[%s1163_s28 + $0x168] sm:$0xff]  ;;  %v285_v16 = vld [vmem:[%s1163_s28 + $0x180] sm:$0xff] }
  0x1d   : > { %282 = vst [vmem:[%s1168_s29 + $0x70] sm:$0xff] %v281_v14  ;;  %v287_v17 = vld [vmem:[%s1163_s28 + $0x198] sm:$0xff]  ;;  %284 = vst [vmem:[%s1168_s29 + $0x78] sm:$0xff] %v283_v15  ;;  %v289_v18 = vld [vmem:[%s1163_s28 + $0x1b0] sm:$0xff] }
  0x1e   : > { %286 = vst [vmem:[%s1168_s29 + $0x80] sm:$0xff] %v285_v16  ;;  %288 = vst [vmem:[%s1168_s29 + $0x88] sm:$0xff] %v287_v17  ;;  %v291_v19 = vld [vmem:[%s1163_s28 + $0x1c8] sm:$0xff]  ;;  %v293_v20 = vld [vmem:[%s1163_s28 + $0x1e0] sm:$0xff] }
  0x1f   : > { %290 = vst [vmem:[%s1168_s29 + $0x90] sm:$0xff] %v289_v18  ;;  %292 = vst [vmem:[%s1168_s29 + $0x98] sm:$0xff] %v291_v19  ;;  %v295_v21 = vld [vmem:[%s1163_s28 + $0x1f8] sm:$0xff]  ;;  %v297_v22 = vld [vmem:[%s1163_s28 + $0x210] sm:$0xff] }
  0x20   : > { %294 = vst [vmem:[%s1168_s29 + $0xa0] sm:$0xff] %v293_v20  ;;  %v299_v23 = vld [vmem:[%s1163_s28 + $0x228] sm:$0xff]  ;;  %296 = vst [vmem:[%s1168_s29 + $0xa8] sm:$0xff] %v295_v21  ;;  %v301_v24 = vld [vmem:[%s1163_s28 + $0x240] sm:$0xff] }
  0x21   : > { %298 = vst [vmem:[%s1168_s29 + $0xb0] sm:$0xff] %v297_v22  ;;  %300 = vst [vmem:[%s1168_s29 + $0xb8] sm:$0xff] %v299_v23  ;;  %v303_v25 = vld [vmem:[%s1163_s28 + $0x258] sm:$0xff]  ;;  %v305_v26 = vld [vmem:[%s1163_s28 + $0x270] sm:$0xff] }
  0x22   : > { %302 = vst [vmem:[%s1168_s29 + $0xc0] sm:$0xff] %v301_v24  ;;  %304 = vst [vmem:[%s1168_s29 + $0xc8] sm:$0xff] %v303_v25  ;;  %v307_v27 = vld [vmem:[%s1163_s28 + $0x288] sm:$0xff]  ;;  %v309_v28 = vld [vmem:[%s1163_s28 + $0x2a0] sm:$0xff] }
  0x23   : > { %306 = vst [vmem:[%s1168_s29 + $0xd0] sm:$0xff] %v305_v26  ;;  %v311_v29 = vld [vmem:[%s1163_s28 + $0x2b8] sm:$0xff]  ;;  %308 = vst [vmem:[%s1168_s29 + $0xd8] sm:$0xff] %v307_v27  ;;  %v313_v30 = vld [vmem:[%s1163_s28 + $0x2d0] sm:$0xff] }
  0x24   : > { %310 = vst [vmem:[%s1168_s29 + $0xe0] sm:$0xff] %v309_v28  ;;  %312 = vst [vmem:[%s1168_s29 + $0xe8] sm:$0xff] %v311_v29  ;;  %v315_v31 = vld [vmem:[%s1163_s28 + $0x2e8] sm:$0xff] }
  0x25   : > { %314 = vst [vmem:[%s1168_s29 + $0xf0] sm:$0xff] %v313_v30  ;;  %316 = vst [vmem:[%s1168_s29 + $0xf8] sm:$0xff] %v315_v31 }
  0x26 PF: > { %p876_p8 = scmp.ge.s32.totalorder %s1093_s16, 1  ;;  %p321_p9 = scmp.lt.s32.totalorder %s1093_s16, 4 }
  0x28   : > { %p322_p10 = pnand %p876_p8, %p321_p9 }
  0x29   : > { %s328_s30 = sand.u32 (!%p322_p10), 1, %s1077_s12   ;;  %p879_p11 = scmp.ne.s32.totalorder (!%p322_p10), %s1085_s14, 0 }
  0x2a   : > { %325 = sbr.rel (%p322_p10) target bundleno = 516 (0x204), region = 66  ;;  %s877_s4 = sshll.u32 (!%p322_p10), %s328_s30, 8 }
  0x2b   : > { %s878_s5 = sshll.u32 (!%p322_p10), %s328_s30, 5  ;;  %s1234_s6 = scalar_lea.vmem (!%p322_p10), [#allocation3], %s877_s4 }
  0x2c   : > { %s1236_s7 = scalar_lea.vmem (!%p322_p10), [#allocation4], %s878_s5 }
  0x31   : > { %369 = sbr.rel (%p879_p11) target bundleno = 225 (0xe1), region = 74  ;;  %v372_v32 = vld [vmem:[%s1315_s0 + $0x10] sm:$0xff] (!%p879_p11)  ;;  %v370_v33 = vld [vmem:[%s1315_s0] sm:$0xff] (!%p879_p11)  ;;  %v373_v34 = vld [vmem:[%s1315_s0 + $0x18] sm:$0xff] (!%p879_p11)  ;;  %v425_v2 = vlaneseq (!%p879_p11) }
  0x32   : > { %v378_v35 = vunpack.c.l.bf16 (!%p879_p11), %v372_v32  ;;  %v379_v36 = vunpack.c.h.bf16 (!%p879_p11), %v372_v32  ;;  %v374_v37 = vunpack.c.l.bf16 (!%p879_p11), %v370_v33  ;;  %v375_v38 = vunpack.c.h.bf16 (!%p879_p11), %v370_v33  ;;  %v371_v39 = vld [vmem:[%s1315_s0 + $0x8] sm:$0xff] (!%p879_p11)  ;;  %v423_v9 = vld [vmem:[%s1316_s1] sm:$0x3] (!%p879_p11) }
  0x33   : > { %v380_v40 = vunpack.c.l.bf16 (!%p879_p11), %v373_v34  ;;  %v381_v41 = vunpack.c.h.bf16 (!%p879_p11), %v373_v34  ;;  %v376_v42 = vunpack.c.l.bf16 (!%p879_p11), %v371_v39  ;;  %v377_v43 = vunpack.c.h.bf16 (!%p879_p11), %v371_v39 }
  0x34   : > { %v386_v44 = vmul.f32 (!%p879_p11), %v378_v35, %v378_v35  ;;  %v387_v45 = vmul.f32 (!%p879_p11), %v379_v36, %v379_v36  ;;  %v382_v46 = vmul.f32 (!%p879_p11), %v374_v37, %v374_v37  ;;  %v383_v47 = vmul.f32 (!%p879_p11), %v375_v38, %v375_v38 }
  0x35   : > { %v388_v48 = vmul.f32 (!%p879_p11), %v380_v40, %v380_v40  ;;  %v389_v49 = vmul.f32 (!%p879_p11), %v381_v41, %v381_v41  ;;  %v384_v50 = vmul.f32 (!%p879_p11), %v376_v42, %v376_v42  ;;  %v385_v51 = vmul.f32 (!%p879_p11), %v377_v43, %v377_v43 }
  0x36   : > { %v396_v52 = vadd.f32 (!%p879_p11), %v387_v45, %v386_v44  ;;  %v390_v53 = vadd.f32 (!%p879_p11), %v383_v47, %v382_v46  ;;  %v426_v5 = vshrl.u32 (!%p879_p11), %v425_v2, 7 }
  0x37   : > { %v399_v54 = vadd.f32 (!%p879_p11), %v389_v49, %v388_v48  ;;  %v393_v55 = vadd.f32 (!%p879_p11), %v385_v51, %v384_v50 }
  0x38   : > { %397 = vadd.xlane.f32.xlu1 %v396_v52  ;;  %391 = vadd.xlane.f32.xlu0 %v390_v53  ;;  %v427_v6 = vsub.s32 0, %v426_v5  ;;  %v431_v7 = vsub.s32 1, %v426_v5 }
  0x3a   : > { %v428_v11 = vrot.slane %v423_v9, %v427_v6  ;;  %v432_v12 = vrot.slane %v423_v9, %v431_v7 }
  0x3c   : > { %400 = vadd.xlane.f32.xlu1 %v399_v54  ;;  %394 = vadd.xlane.f32.xlu0 %v393_v55 }
  0xc5   : > { %v398_v56 = vpop.xlane.xlu1 %397  ;;  %v392_v57 = vpop.xlane.xlu0 %391 }
  0xc6   : > { %v405_v58 = vmul.f32 0.00390625, %v398_v56  ;;  %v403_v59 = vmul.f32 0.00390625, %v392_v57 }
  0xc8   : > { %v409_v60 = vadd.f32 1e-06, %v405_v58  ;;  %v407_v61 = vadd.f32 1e-06, %v403_v59 }
  0xc9   : > { %v401_v62 = vpop.xlane.xlu1 %400  ;;  %v395_v63 = vpop.xlane.xlu0 %394 }
  0xca   : > { %999 = vrsqrt.f32 %v409_v60  ;;  %v406_v0 = vmul.f32 0.00390625, %v401_v62  ;;  %v404_v1 = vmul.f32 0.00390625, %v395_v63 }
  0xcb   : > { %1001 = vrsqrt.f32 %v407_v61 }
  0xcc   : > { %v410_v3 = vadd.f32 1e-06, %v406_v0  ;;  %v408_v4 = vadd.f32 1e-06, %v404_v1 }
  0xce   : > { %1003 = vrsqrt.f32 %v410_v3 }
  0xcf   : > { %1005 = vrsqrt.f32 %v408_v4 }
  0xd4   : > { %v1000_v8 = vpop.eup %999 }
  0xd5   : > { %v1002_v10 = vpop.eup %1001  ;;  %v419_v13 = vmul.f32 %v1000_v8, %v378_v35  ;;  %v420_v14 = vmul.f32 %v1000_v8, %v379_v36 }
  0xd6   : > { %v415_v16 = vmul.f32 %v1002_v10, %v374_v37  ;;  %v416_v17 = vmul.f32 %v1002_v10, %v375_v38 }
  0xd7   : > { %v439_v23 = vmul.f32 %v428_v11, %v419_v13  ;;  %v440_v24 = vmul.f32 %v432_v12, %v420_v14 }
  0xd8   : > { %v1004_v15 = vpop.eup %1003  ;;  %v435_v27 = vmul.f32 %v428_v11, %v415_v16  ;;  %v436_v28 = vmul.f32 %v432_v12, %v416_v17 }
  0xd9   : > { %v1006_v18 = vpop.eup %1005  ;;  %v421_v19 = vmul.f32 %v1004_v15, %v380_v40  ;;  %v422_v20 = vmul.f32 %v1004_v15, %v381_v41 }
  0xda   : > { %v417_v21 = vmul.f32 %v1006_v18, %v376_v42  ;;  %v418_v22 = vmul.f32 %v1006_v18, %v377_v43 }
  0xdb   : > { %v441_v25 = vmul.f32 %v428_v11, %v421_v19  ;;  %v442_v26 = vmul.f32 %v432_v12, %v422_v20 }
  0xdc   : > { %v437_v29 = vmul.f32 %v428_v11, %v417_v21  ;;  %v438_v30 = vmul.f32 %v432_v12, %v418_v22 }
  0xdd   : > { %v445_v31 = vpack.c.bf16 %v441_v25, %v439_v23  ;;  %v446_v32 = vpack.c.bf16 %v442_v26, %v440_v24 }
  0xde   : > { %v443_v33 = vpack.c.bf16 %v437_v29, %v435_v27  ;;  %v444_v34 = vpack.c.bf16 %v438_v30, %v436_v28 }
  0xdf   : > { %449 = vst [vmem:[#allocation2 + $0x10] sm:$0xff] %v445_v31  ;;  %450 = vst [vmem:[#allocation2 + $0x18] sm:$0xff] %v446_v32 }
  0xe0   : > { %447 = vst [vmem:[#allocation2] sm:$0xff] %v443_v33  ;;  %448 = vst [vmem:[#allocation2 + $0x8] sm:$0xff] %v444_v34 }
  0xe1 PF: > { %v1007_v35 = vld [vmem:[%s1234_s6 + $0x4] ss:$8 sps:$4 sm:$0xff]   ;;  %v1009_v36 = vld [vmem:[%s1234_s6] ss:$8 sps:$4 sm:$0xff]   ;;  %v1010_v37 = vld [vmem:[%s1234_s6 + $0x14] ss:$8 sps:$4 sm:$0xff]  }
  0xe2   : > { %647 = vmatprep.subr.bf16.mxu0 %v1007_v35  ;;  %927 = vmatprep.subr.bf16.mxu1 %v1007_v35  ;;  %v1012_v38 = vld [vmem:[%s1234_s6 + $0x10] ss:$8 sps:$4 sm:$0xff]   ;;  %v1013_v39 = vld [vmem:[%s1234_s6 + $0x24] ss:$8 sps:$4 sm:$0xff]   ;;  %v1015_v40 = vld [vmem:[%s1234_s6 + $0x20] ss:$8 sps:$4 sm:$0xff]  }
  0xe3   : > { %648 = vmatpush1.bf16.msra.mxu0 %v1009_v36  ;;  %943 = vmatpush1.bf16.msra.mxu1 %v1009_v36  ;;  %v1016_v41 = vld [vmem:[%s1234_s6 + $0x34] ss:$8 sps:$4 sm:$0xff]   ;;  %v1018_v42 = vld [vmem:[%s1234_s6 + $0x30] ss:$8 sps:$4 sm:$0xff]   ;;  %v1019_v43 = vld [vmem:[%s1234_s6 + $0x44] ss:$8 sps:$4 sm:$0xff]  }
  0xe4   : > { %649 = vmatprep.subr.bf16.mxu0 %v1010_v37  ;;  %928 = vmatprep.subr.bf16.mxu1 %v1010_v37  ;;  %v1021_v44 = vld [vmem:[%s1234_s6 + $0x40] ss:$8 sps:$4 sm:$0xff]   ;;  %v1022_v45 = vld [vmem:[%s1234_s6 + $0x54] ss:$8 sps:$4 sm:$0xff]   ;;  %v1024_v46 = vld [vmem:[%s1234_s6 + $0x50] ss:$8 sps:$4 sm:$0xff]  }
  0xe5   : > { %v1025_v47 = vld [vmem:[%s1234_s6 + $0x64] ss:$8 sps:$4 sm:$0xff]   ;;  %v1027_v50 = vld [vmem:[%s1234_s6 + $0x60] ss:$8 sps:$4 sm:$0xff]   ;;  %v1028_v51 = vld [vmem:[%s1234_s6 + $0x74] ss:$8 sps:$4 sm:$0xff]  }
  0xe6   : > { %v454_v49 = vld [vmem:[#allocation2 + $0x18] sm:$0xff]  ;;  %v1031_v53 = vld [vmem:[%s1234_s6 + $0x84] ss:$8 sps:$4 sm:$0xff]   ;;  %v1033_v54 = vld [vmem:[%s1234_s6 + $0x80] ss:$8 sps:$4 sm:$0xff]   ;;  %s926_s25 = sshll.u32 (%p1150_p6), %s1085_s14, 3 }
  0xe7   : > { %650 = vmatpush1.bf16.msra.mxu0 %v1012_v38  ;;  %944 = vmatpush1.bf16.msra.mxu1 %v1012_v38  ;;  %v452_v48 = vld [vmem:[#allocation2 + $0x8] sm:$0xff]  ;;  %v1030_v52 = vld [vmem:[%s1234_s6 + $0x70] ss:$8 sps:$4 sm:$0xff]   ;;  %v1034_v55 = vld [vmem:[%s1234_s6 + $0x94] ss:$8 sps:$4 sm:$0xff]   ;;  %s740_s28 = scalar_lea.vmem (%p1150_p6), %s1318_s3, %s926_s25 }
  0xe8   : > { %651 = vmatprep.subr.bf16.mxu0 %v1013_v39  ;;  %929 = vmatprep.subr.bf16.mxu1 %v1013_v39  ;;  %v1036_v56 = vld [vmem:[%s1234_s6 + $0x90] ss:$8 sps:$4 sm:$0xff]   ;;  %v1037_v57 = vld [vmem:[%s1234_s6 + $0xa4] ss:$8 sps:$4 sm:$0xff]   ;;  %v1039_v58 = vld [vmem:[%s1234_s6 + $0xa0] ss:$8 sps:$4 sm:$0xff]  }
  0xe9   : > { %679 = vmatprep.mubr.bf16.mxu0 %v452_v48  ;;  %689 = vmatprep.mubr.bf16.mxu1 %v454_v49  ;;  %v1040_v59 = vld [vmem:[%s1234_s6 + $0xb4] ss:$8 sps:$4 sm:$0xff]   ;;  %v1042_v60 = vld [vmem:[%s1234_s6 + $0xb0] ss:$8 sps:$4 sm:$0xff]   ;;  %v1043_v61 = vld [vmem:[%s1234_s6 + $0xc4] ss:$8 sps:$4 sm:$0xff]  }
  0xea   : > { %v1045_v62 = vld [vmem:[%s1234_s6 + $0xc0] ss:$8 sps:$4 sm:$0xff]   ;;  %v1046_v63 = vld [vmem:[%s1234_s6 + $0xd4] ss:$8 sps:$4 sm:$0xff]   ;;  %v1048_v0 = vld [vmem:[%s1234_s6 + $0xd0] ss:$8 sps:$4 sm:$0xff]  }
  0xeb   : > { %652 = vmatpush1.bf16.msra.mxu0 %v1015_v40  ;;  %945 = vmatpush1.bf16.msra.mxu1 %v1015_v40  ;;  %v1049_v1 = vld [vmem:[%s1234_s6 + $0xe4] ss:$8 sps:$4 sm:$0xff]   ;;  %v1051_v2 = vld [vmem:[%s1234_s6 + $0xe0] ss:$8 sps:$4 sm:$0xff]   ;;  %v1052_v3 = vld [vmem:[%s1234_s6 + $0xf4] ss:$8 sps:$4 sm:$0xff]  }
  0xec   : > { %653 = vmatprep.subr.bf16.mxu0 %v1016_v41  ;;  %930 = vmatprep.subr.bf16.mxu1 %v1016_v41  ;;  %v1054_v4 = vld [vmem:[%s1234_s6 + $0xf0] ss:$8 sps:$4 sm:$0xff]   ;;  %v451_v5 = vld [vmem:[#allocation2] sm:$0xff] }
  0xed   : > { %v453_v6 = vld [vmem:[#allocation2 + $0x10] sm:$0xff] }
  0xef   : > { %654 = vmatpush1.bf16.msra.mxu0 %v1018_v42  ;;  %946 = vmatpush1.bf16.msra.mxu1 %v1018_v42 }
  0xf0   : > { %655 = vmatprep.subr.bf16.mxu0 %v1019_v43  ;;  %931 = vmatprep.subr.bf16.mxu1 %v1019_v43 }
  0xf3   : > { %656 = vmatpush1.bf16.msra.mxu0 %v1021_v44  ;;  %947 = vmatpush1.bf16.msra.mxu1 %v1021_v44 }
  0xf4   : > { %657 = vmatprep.subr.bf16.mxu0 %v1022_v45  ;;  %932 = vmatprep.subr.bf16.mxu1 %v1022_v45 }
  0xf7   : > { %658 = vmatpush1.bf16.msra.mxu0 %v1024_v46  ;;  %948 = vmatpush1.bf16.msra.mxu1 %v1024_v46 }
  0xf8   : > { %659 = vmatprep.subr.bf16.mxu0 %v1025_v47  ;;  %933 = vmatprep.subr.bf16.mxu1 %v1025_v47 }
  0xfb   : > { %660 = vmatpush1.bf16.msra.mxu0 %v1027_v50  ;;  %949 = vmatpush1.bf16.msra.mxu1 %v1027_v50 }
  0xfc   : > { %661 = vmatprep.subr.bf16.mxu0 %v1028_v51  ;;  %934 = vmatprep.subr.bf16.mxu1 %v1028_v51 }
  0xff   : > { %662 = vmatpush1.bf16.msra.mxu0 %v1030_v52  ;;  %950 = vmatpush1.bf16.msra.mxu1 %v1030_v52 }
 0x100   : > { %663 = vmatprep.subr.bf16.mxu0 %v1031_v53  ;;  %935 = vmatprep.subr.bf16.mxu1 %v1031_v53 }
 0x103   : > { %664 = vmatpush1.bf16.msra.mxu0 %v1033_v54  ;;  %951 = vmatpush1.bf16.msra.mxu1 %v1033_v54 }
 0x104   : > { %665 = vmatprep.subr.bf16.mxu0 %v1034_v55  ;;  %936 = vmatprep.subr.bf16.mxu1 %v1034_v55 }
 0x107   : > { %666 = vmatpush1.bf16.msra.mxu0 %v1036_v56  ;;  %952 = vmatpush1.bf16.msra.mxu1 %v1036_v56 }
 0x108   : > { %667 = vmatprep.subr.bf16.mxu0 %v1037_v57  ;;  %937 = vmatprep.subr.bf16.mxu1 %v1037_v57 }
 0x10b   : > { %668 = vmatpush1.bf16.msra.mxu0 %v1039_v58  ;;  %953 = vmatpush1.bf16.msra.mxu1 %v1039_v58 }
 0x10c   : > { %669 = vmatprep.subr.bf16.mxu0 %v1040_v59  ;;  %938 = vmatprep.subr.bf16.mxu1 %v1040_v59 }
 0x10f   : > { %670 = vmatpush1.bf16.msra.mxu0 %v1042_v60  ;;  %954 = vmatpush1.bf16.msra.mxu1 %v1042_v60 }
 0x110   : > { %671 = vmatprep.subr.bf16.mxu0 %v1043_v61  ;;  %939 = vmatprep.subr.bf16.mxu1 %v1043_v61 }
 0x113   : > { %672 = vmatpush1.bf16.msra.mxu0 %v1045_v62  ;;  %955 = vmatpush1.bf16.msra.mxu1 %v1045_v62 }
 0x114   : > { %673 = vmatprep.subr.bf16.mxu0 %v1046_v63  ;;  %940 = vmatprep.subr.bf16.mxu1 %v1046_v63 }
 0x117   : > { %674 = vmatpush1.bf16.msra.mxu0 %v1048_v0  ;;  %956 = vmatpush1.bf16.msra.mxu1 %v1048_v0 }
 0x118   : > { %675 = vmatprep.subr.bf16.mxu0 %v1049_v1  ;;  %941 = vmatprep.subr.bf16.mxu1 %v1049_v1 }
 0x11b   : > { %676 = vmatpush1.bf16.msra.mxu0 %v1051_v2  ;;  %957 = vmatpush1.bf16.msra.mxu1 %v1051_v2 }
 0x11c   : > { %677 = vmatprep.subr.bf16.mxu0 %v1052_v3  ;;  %942 = vmatprep.subr.bf16.mxu1 %v1052_v3 }
 0x11f   : > { %678 = vmatpush1.bf16.msra.mxu0 %v1054_v4  ;;  %958 = vmatpush1.bf16.msra.mxu1 %v1054_v4 }
 0x122   : > { %680 = vmatmul.mubr.bf16.vlgmr.msra.gmra.mrb[0].mxu0 %v451_v5  ;;  %690 = vmatmul.mubr.bf16.vlgmr.msra.gmra.mrb[0].mxu1 %v453_v6 }
 0x1f5   : > { %v681_v7 = vpop.f32.mrb[0].mxu0  ;;  %v691_v8 = vpop.f32.mrb[0].mxu1  ;;  %734 = sbr.rel (!%p1150_p6) target bundleno = 516 (0x204), region = 78 }
 0x1f6   : > { %v683_v9 = vpop.f32.mrb[1].mxu0  ;;  %v693_v10 = vpop.f32.mrb[1].mxu1 }
 0x1f7   : > { %v922_v11 = vpack.c.bf16 %v683_v9, %v681_v7  ;;  %v924_v12 = vpack.c.bf16 %v693_v10, %v691_v8  ;;  %v685_v13 = vpop.f32.mrb[2].mxu0  ;;  %v695_v14 = vpop.f32.mrb[2].mxu1 }
 0x1f8   : > { %v687_v15 = vpop.f32.mrb[3].mxu0  ;;  %v697_v16 = vpop.f32.mrb[3].mxu1 }
 0x1f9   : > { %724 = vst [vmem:[%s1236_s7] sm:$0xff] %v922_v11  ;;  %726 = vst [vmem:[%s1236_s7 + $0x10] sm:$0xff] %v924_v12  ;;  %v923_v17 = vpack.c.bf16 %v687_v15, %v685_v13  ;;  %v925_v18 = vpack.c.bf16 %v697_v16, %v695_v14 }
 0x1fb   : > { %725 = vst [vmem:[%s1236_s7 + $0x8] sm:$0xff] %v923_v17  ;;  %727 = vst [vmem:[%s1236_s7 + $0x18] sm:$0xff] %v925_v18 }
 0x200   : > { %v774_v19 = vld [vmem:[%s1236_s7] sm:$0xff]  ;;  %v778_v21 = vld [vmem:[%s1236_s7 + $0x10] sm:$0xff] }
 0x201   : > { %775 = vst [vmem:[%s740_s28] sm:$0xff] %v774_v19  ;;  %779 = vst [vmem:[%s740_s28 + $0x30] sm:$0xff] %v778_v21 }
 0x202   : > { %v776_v20 = vld [vmem:[%s1236_s7 + $0x8] sm:$0xff]  ;;  %v780_v22 = vld [vmem:[%s1236_s7 + $0x18] sm:$0xff] }
 0x203   : > { %777 = vst [vmem:[%s740_s28 + $0x18] sm:$0xff] %v776_v20  ;;  %781 = vst [vmem:[%s740_s28 + $0x48] sm:$0xff] %v780_v22 }
 0x204 PF: > { %s13_s16 = sadd.s32 1, %s1093_s16   ;;  %s1320_s12 = smov %s1081_s13 }
 0x205   : > { %p10_p12 = scmp.ge.s32.totalorder %s13_s16, 5   ;;  %s1321_s13 = smov %s1155_s22 }
 0x206   : > { %s1322_s14 = smov %s1089_s15  ;;  %s1323_s15 = smov %s1325_s17 }
 0x207   :  { %12 = sbr.rel (!%p10_p12) target bundleno = 3 (0x3), region = 150 }

// kernel: baseline_llm_loss.15
= control target key start
LH: loop header
LB: loop body
LE: loop exit
PB: predicated region body
PF: predicated region fallthrough
CT: control target
= control target key end

     0   :  { %s664_s1 = inlined_call_operand.vmem [shape: bf16[256,256], index: 1, kind: input, shape index: {}]   ;;  %s665_s0 = inlined_call_operand.vmem [shape: bf16[32,256], index: 0, kind: input, shape index: {}]   ;;  %s666_s2 = inlined_call_operand.vmem [shape: bf16[32,256], index: 2, kind: input, shape index: {}]   ;;  %s667_s3 = inlined_call_operand.vmem [shape: bf16[32,256], index: 3, kind: output, shape index: {}]  }
   0x1   :  { %v458_v0 = vld [vmem:[%s664_s1 + $0x4] ss:$8 sps:$4 sm:$0xff]   ;;  %v460_v1 = vld [vmem:[%s664_s1] ss:$8 sps:$4 sm:$0xff]   ;;  %v461_v2 = vld [vmem:[%s664_s1 + $0x14] ss:$8 sps:$4 sm:$0xff]  }
   0x2   :  { %250 = vmatprep.subr.bf16.mxu0 %v458_v0  ;;  %426 = vmatprep.subr.bf16.mxu1 %v458_v0  ;;  %v463_v3 = vld [vmem:[%s664_s1 + $0x10] ss:$8 sps:$4 sm:$0xff]   ;;  %v464_v4 = vld [vmem:[%s664_s1 + $0x24] ss:$8 sps:$4 sm:$0xff]   ;;  %v466_v5 = vld [vmem:[%s664_s1 + $0x20] ss:$8 sps:$4 sm:$0xff]  }
   0x3   :  { %251 = vmatpush1.bf16.msra.mxu0 %v460_v1  ;;  %442 = vmatpush1.bf16.msra.mxu1 %v460_v1  ;;  %v467_v6 = vld [vmem:[%s664_s1 + $0x34] ss:$8 sps:$4 sm:$0xff]   ;;  %v469_v7 = vld [vmem:[%s664_s1 + $0x30] ss:$8 sps:$4 sm:$0xff]   ;;  %v470_v8 = vld [vmem:[%s664_s1 + $0x44] ss:$8 sps:$4 sm:$0xff]  }
   0x4   :  { %252 = vmatprep.subr.bf16.mxu0 %v461_v2  ;;  %427 = vmatprep.subr.bf16.mxu1 %v461_v2  ;;  %v472_v9 = vld [vmem:[%s664_s1 + $0x40] ss:$8 sps:$4 sm:$0xff]   ;;  %v473_v10 = vld [vmem:[%s664_s1 + $0x54] ss:$8 sps:$4 sm:$0xff]   ;;  %v475_v11 = vld [vmem:[%s664_s1 + $0x50] ss:$8 sps:$4 sm:$0xff]  }
   0x5   :  { %v476_v12 = vld [vmem:[%s664_s1 + $0x64] ss:$8 sps:$4 sm:$0xff]   ;;  %v478_v14 = vld [vmem:[%s664_s1 + $0x60] ss:$8 sps:$4 sm:$0xff]   ;;  %v511_v15 = vld [vmem:[%s665_s0 + $0x14] ss:$8 sps:$4 sm:$0xff]  }
   0x6   :  { %v508_v13 = vld [vmem:[%s665_s0 + $0x4] ss:$8 sps:$4 sm:$0xff]   ;;  %v479_v16 = vld [vmem:[%s664_s1 + $0x74] ss:$8 sps:$4 sm:$0xff]   ;;  %292 = vmatprep.mubr.bf16.mxu1 %v511_v15  ;;  %v481_v17 = vld [vmem:[%s664_s1 + $0x70] ss:$8 sps:$4 sm:$0xff]  }
   0x7   :  { %253 = vmatpush1.bf16.msra.mxu0 %v463_v3  ;;  %443 = vmatpush1.bf16.msra.mxu1 %v463_v3  ;;  %v482_v18 = vld [vmem:[%s664_s1 + $0x84] ss:$8 sps:$4 sm:$0xff]   ;;  %v484_v19 = vld [vmem:[%s664_s1 + $0x80] ss:$8 sps:$4 sm:$0xff]   ;;  %v485_v20 = vld [vmem:[%s664_s1 + $0x94] ss:$8 sps:$4 sm:$0xff]  }
   0x8   :  { %254 = vmatprep.subr.bf16.mxu0 %v464_v4  ;;  %428 = vmatprep.subr.bf16.mxu1 %v464_v4  ;;  %v487_v21 = vld [vmem:[%s664_s1 + $0x90] ss:$8 sps:$4 sm:$0xff]   ;;  %v488_v22 = vld [vmem:[%s664_s1 + $0xa4] ss:$8 sps:$4 sm:$0xff]   ;;  %v490_v23 = vld [vmem:[%s664_s1 + $0xa0] ss:$8 sps:$4 sm:$0xff]  }
   0x9   :  { %282 = vmatprep.mubr.bf16.mxu0 %v508_v13  ;;  %v491_v24 = vld [vmem:[%s664_s1 + $0xb4] ss:$8 sps:$4 sm:$0xff]   ;;  %v493_v25 = vld [vmem:[%s664_s1 + $0xb0] ss:$8 sps:$4 sm:$0xff]   ;;  %v494_v26 = vld [vmem:[%s664_s1 + $0xc4] ss:$8 sps:$4 sm:$0xff]  }
   0xa   :  { %v496_v27 = vld [vmem:[%s664_s1 + $0xc0] ss:$8 sps:$4 sm:$0xff]   ;;  %v497_v28 = vld [vmem:[%s664_s1 + $0xd4] ss:$8 sps:$4 sm:$0xff]   ;;  %v499_v29 = vld [vmem:[%s664_s1 + $0xd0] ss:$8 sps:$4 sm:$0xff]  }
   0xb   :  { %255 = vmatpush1.bf16.msra.mxu0 %v466_v5  ;;  %444 = vmatpush1.bf16.msra.mxu1 %v466_v5  ;;  %v500_v30 = vld [vmem:[%s664_s1 + $0xe4] ss:$8 sps:$4 sm:$0xff]   ;;  %v502_v31 = vld [vmem:[%s664_s1 + $0xe0] ss:$8 sps:$4 sm:$0xff]   ;;  %v503_v32 = vld [vmem:[%s664_s1 + $0xf4] ss:$8 sps:$4 sm:$0xff]  }
   0xc   :  { %256 = vmatprep.subr.bf16.mxu0 %v467_v6  ;;  %429 = vmatprep.subr.bf16.mxu1 %v467_v6  ;;  %v505_v33 = vld [vmem:[%s664_s1 + $0xf0] ss:$8 sps:$4 sm:$0xff]   ;;  %v506_v34 = vld [vmem:[%s665_s0] ss:$8 sps:$4 sm:$0xff]  }
   0xd   :  { %v509_v35 = vld [vmem:[%s665_s0 + $0x10] ss:$8 sps:$4 sm:$0xff]   ;;  %v330_v36 = vld [vmem:[%s666_s2] sm:$0xff]  ;;  %v331_v38 = vld [vmem:[%s666_s2 + $0x8] sm:$0xff] }
   0xe   :  { %v332_v37 = vld [vmem:[%s666_s2 + $0x10] sm:$0xff]  ;;  %v333_v39 = vld [vmem:[%s666_s2 + $0x18] sm:$0xff]  ;;  %v334_v40 = vunpack.c.l.bf16 %v330_v36  ;;  %v335_v42 = vunpack.c.h.bf16 %v330_v36  ;;  %v336_v44 = vunpack.c.l.bf16 %v331_v38  ;;  %v337_v48 = vunpack.c.h.bf16 %v331_v38 }
   0xf   :  { %257 = vmatpush1.bf16.msra.mxu0 %v469_v7  ;;  %445 = vmatpush1.bf16.msra.mxu1 %v469_v7  ;;  %v338_v41 = vunpack.c.l.bf16 %v332_v37  ;;  %v339_v43 = vunpack.c.h.bf16 %v332_v37  ;;  %v340_v45 = vunpack.c.l.bf16 %v333_v39  ;;  %v341_v49 = vunpack.c.h.bf16 %v333_v39 }
  0x10   :  { %258 = vmatprep.subr.bf16.mxu0 %v470_v8  ;;  %430 = vmatprep.subr.bf16.mxu1 %v470_v8 }
  0x13   :  { %259 = vmatpush1.bf16.msra.mxu0 %v472_v9  ;;  %446 = vmatpush1.bf16.msra.mxu1 %v472_v9 }
  0x14   :  { %260 = vmatprep.subr.bf16.mxu0 %v473_v10  ;;  %431 = vmatprep.subr.bf16.mxu1 %v473_v10 }
  0x17   :  { %261 = vmatpush1.bf16.msra.mxu0 %v475_v11  ;;  %447 = vmatpush1.bf16.msra.mxu1 %v475_v11 }
  0x18   :  { %262 = vmatprep.subr.bf16.mxu0 %v476_v12  ;;  %432 = vmatprep.subr.bf16.mxu1 %v476_v12 }
  0x1b   :  { %263 = vmatpush1.bf16.msra.mxu0 %v478_v14  ;;  %448 = vmatpush1.bf16.msra.mxu1 %v478_v14 }
  0x1c   :  { %264 = vmatprep.subr.bf16.mxu0 %v479_v16  ;;  %433 = vmatprep.subr.bf16.mxu1 %v479_v16 }
  0x1f   :  { %265 = vmatpush1.bf16.msra.mxu0 %v481_v17  ;;  %449 = vmatpush1.bf16.msra.mxu1 %v481_v17 }
  0x20   :  { %266 = vmatprep.subr.bf16.mxu0 %v482_v18  ;;  %434 = vmatprep.subr.bf16.mxu1 %v482_v18 }
  0x23   :  { %267 = vmatpush1.bf16.msra.mxu0 %v484_v19  ;;  %450 = vmatpush1.bf16.msra.mxu1 %v484_v19 }
  0x24   :  { %268 = vmatprep.subr.bf16.mxu0 %v485_v20  ;;  %435 = vmatprep.subr.bf16.mxu1 %v485_v20 }
  0x27   :  { %269 = vmatpush1.bf16.msra.mxu0 %v487_v21  ;;  %451 = vmatpush1.bf16.msra.mxu1 %v487_v21 }
  0x28   :  { %270 = vmatprep.subr.bf16.mxu0 %v488_v22  ;;  %436 = vmatprep.subr.bf16.mxu1 %v488_v22 }
  0x2b   :  { %271 = vmatpush1.bf16.msra.mxu0 %v490_v23  ;;  %452 = vmatpush1.bf16.msra.mxu1 %v490_v23 }
  0x2c   :  { %272 = vmatprep.subr.bf16.mxu0 %v491_v24  ;;  %437 = vmatprep.subr.bf16.mxu1 %v491_v24 }
  0x2f   :  { %273 = vmatpush1.bf16.msra.mxu0 %v493_v25  ;;  %453 = vmatpush1.bf16.msra.mxu1 %v493_v25 }
  0x30   :  { %274 = vmatprep.subr.bf16.mxu0 %v494_v26  ;;  %438 = vmatprep.subr.bf16.mxu1 %v494_v26 }
  0x33   :  { %275 = vmatpush1.bf16.msra.mxu0 %v496_v27  ;;  %454 = vmatpush1.bf16.msra.mxu1 %v496_v27 }
  0x34   :  { %276 = vmatprep.subr.bf16.mxu0 %v497_v28  ;;  %439 = vmatprep.subr.bf16.mxu1 %v497_v28 }
  0x37   :  { %277 = vmatpush1.bf16.msra.mxu0 %v499_v29  ;;  %455 = vmatpush1.bf16.msra.mxu1 %v499_v29 }
  0x38   :  { %278 = vmatprep.subr.bf16.mxu0 %v500_v30  ;;  %440 = vmatprep.subr.bf16.mxu1 %v500_v30 }
  0x3b   :  { %279 = vmatpush1.bf16.msra.mxu0 %v502_v31  ;;  %456 = vmatpush1.bf16.msra.mxu1 %v502_v31 }
  0x3c   :  { %280 = vmatprep.subr.bf16.mxu0 %v503_v32  ;;  %441 = vmatprep.subr.bf16.mxu1 %v503_v32 }
  0x3f   :  { %281 = vmatpush1.bf16.msra.mxu0 %v505_v33  ;;  %457 = vmatpush1.bf16.msra.mxu1 %v505_v33 }
  0x42   :  { %283 = vmatmul.mubr.bf16.vlgmr.msra.gmra.mrb[0].mxu0 %v506_v34  ;;  %293 = vmatmul.mubr.bf16.vlgmr.msra.gmra.mrb[0].mxu1 %v509_v35 }
 0x115   :  { %v284_v46 = vpop.f32.mrb[0].mxu0  ;;  %v294_v47 = vpop.f32.mrb[0].mxu1 }
 0x116   :  { %v342_v50 = vadd.f32 %v334_v40, %v284_v46  ;;  %v346_v51 = vadd.f32 %v338_v41, %v294_v47  ;;  %v286_v52 = vpop.f32.mrb[1].mxu0  ;;  %v296_v53 = vpop.f32.mrb[1].mxu1 }
 0x117   :  { %v343_v54 = vadd.f32 %v335_v42, %v286_v52  ;;  %v347_v55 = vadd.f32 %v339_v43, %v296_v53  ;;  %v288_v56 = vpop.f32.mrb[2].mxu0  ;;  %v298_v57 = vpop.f32.mrb[2].mxu1 }
 0x118   :  { %v344_v58 = vadd.f32 %v336_v44, %v288_v56  ;;  %v348_v59 = vadd.f32 %v340_v45, %v298_v57  ;;  %v290_v60 = vpop.f32.mrb[3].mxu0  ;;  %v300_v61 = vpop.f32.mrb[3].mxu1 }
 0x119   :  { %v422_v62 = vpack.c.bf16 %v343_v54, %v342_v50  ;;  %v424_v63 = vpack.c.bf16 %v347_v55, %v346_v51  ;;  %v345_v0 = vadd.f32 %v337_v48, %v290_v60  ;;  %v349_v1 = vadd.f32 %v341_v49, %v300_v61 }
 0x11b   :  { %374 = vst [vmem:[%s667_s3] sm:$0xff] %v422_v62  ;;  %376 = vst [vmem:[%s667_s3 + $0x10] sm:$0xff] %v424_v63  ;;  %v423_v2 = vpack.c.bf16 %v345_v0, %v344_v58  ;;  %v425_v3 = vpack.c.bf16 %v349_v1, %v348_v59 }
 0x11d   :  { %375 = vst [vmem:[%s667_s3 + $0x8] sm:$0xff] %v423_v2  ;;  %377 = vst [vmem:[%s667_s3 + $0x18] sm:$0xff] %v425_v3 }

// kernel: baseline_llm_loss.12
= control target key start
LH: loop header
LB: loop body
LE: loop exit
PB: predicated region body
PF: predicated region fallthrough
CT: control target
= control target key end

     0   :  { %s3144_s0 = inlined_call_operand.vmem [shape: bf16[32,256], index: 0, kind: input, shape index: {}]   ;;  %s3145_s2 = inlined_call_operand.vmem [shape: bf16[256,512], index: 2, kind: input, shape index: {}]   ;;  %s3146_s3 = inlined_call_operand.vmem [shape: bf16[256,512], index: 3, kind: input, shape index: {}]   ;;  %s3147_s1 = inlined_call_operand.vmem [shape: f32[1,256], index: 1, kind: input, shape index: {}]   ;;  %s3148_s4 = inlined_call_operand.vmem [shape: bf16[512,256], index: 4, kind: input, shape index: {}]   ;;  %s3149_s5 = inlined_call_operand.vmem [shape: bf16[32,256], index: 5, kind: output, shape index: {}]  }
   0x1   :  { %v24_v0 = vld [vmem:[%s3144_s0] sm:$0xff]  ;;  %v25_v1 = vld [vmem:[%s3144_s0 + $0x8] sm:$0xff]  ;;  %v26_v2 = vld [vmem:[%s3144_s0 + $0x10] sm:$0xff] }
   0x2   :  { %v2433_v3 = vunpack.c.l.bf16 %v24_v0  ;;  %v2435_v4 = vunpack.c.h.bf16 %v24_v0  ;;  %v2437_v5 = vunpack.c.l.bf16 %v25_v1  ;;  %v2439_v6 = vunpack.c.h.bf16 %v25_v1  ;;  %v27_v7 = vld [vmem:[%s3144_s0 + $0x18] sm:$0xff]  ;;  %v2034_v12 = vld [vmem:[%s3145_s2 + $0x4] ss:$16 sps:$4 sm:$0xff]   ;;  %v2036_v13 = vld [vmem:[%s3145_s2] ss:$16 sps:$4 sm:$0xff]  }
   0x3   :  { %v2444_v8 = vunpack.c.l.bf16 %v26_v2  ;;  %v2446_v9 = vunpack.c.h.bf16 %v26_v2  ;;  %v2448_v10 = vunpack.c.l.bf16 %v27_v7  ;;  %v2450_v11 = vunpack.c.h.bf16 %v27_v7  ;;  %v2037_v18 = vld [vmem:[%s3146_s3 + $0x4] ss:$16 sps:$4 sm:$0xff]   ;;  %v2039_v19 = vld [vmem:[%s3146_s3] ss:$16 sps:$4 sm:$0xff]   ;;  %501 = vmatprep.subr.bf16.mxu1 %v2034_v12 }
   0x4   :  { %v36_v14 = vmul.f32 %v2433_v3, %v2433_v3  ;;  %v37_v15 = vmul.f32 %v2435_v4, %v2435_v4  ;;  %v38_v16 = vmul.f32 %v2437_v5, %v2437_v5  ;;  %v39_v17 = vmul.f32 %v2439_v6, %v2439_v6  ;;  %v2040_v24 = vld [vmem:[%s3145_s2 + $0x24] ss:$16 sps:$4 sm:$0xff]   ;;  %502 = vmatpush1.bf16.msra.mxu1 %v2036_v13  ;;  %v2042_v26 = vld [vmem:[%s3145_s2 + $0x20] ss:$16 sps:$4 sm:$0xff]  }
   0x5   :  { %v40_v20 = vmul.f32 %v2444_v8, %v2444_v8  ;;  %v41_v21 = vmul.f32 %v2446_v9, %v2446_v9  ;;  %v42_v22 = vmul.f32 %v2448_v10, %v2448_v10  ;;  %v43_v23 = vmul.f32 %v2450_v11, %v2450_v11  ;;  %991 = vmatprep.subr.bf16.mxu0 %v2037_v18  ;;  %v2043_v28 = vld [vmem:[%s3146_s3 + $0x24] ss:$16 sps:$4 sm:$0xff]   ;;  %v2045_v29 = vld [vmem:[%s3146_s3 + $0x20] ss:$16 sps:$4 sm:$0xff]  }
   0x6   :  { %v44_v25 = vadd.f32 %v37_v15, %v36_v14  ;;  %992 = vmatpush1.bf16.msra.mxu0 %v2039_v19  ;;  %503 = vmatprep.subr.bf16.mxu1 %v2040_v24  ;;  %v47_v30 = vadd.f32 %v39_v17, %v38_v16  ;;  %v2046_v31 = vld [vmem:[%s3145_s2 + $0x44] ss:$16 sps:$4 sm:$0xff]   ;;  %v2048_v34 = vld [vmem:[%s3145_s2 + $0x40] ss:$16 sps:$4 sm:$0xff]  }
   0x7   :  { %v50_v27 = vadd.f32 %v41_v21, %v40_v20  ;;  %v53_v32 = vadd.f32 %v43_v23, %v42_v22  ;;  %993 = vmatprep.subr.bf16.mxu0 %v2043_v28  ;;  %v2049_v33 = vld [vmem:[%s3146_s3 + $0x44] ss:$16 sps:$4 sm:$0xff]   ;;  %v2051_v35 = vld [vmem:[%s3146_s3 + $0x40] ss:$16 sps:$4 sm:$0xff]  }
   0x8   :  { %45 = vadd.xlane.f32.xlu0 %v44_v25  ;;  %504 = vmatpush1.bf16.msra.mxu1 %v2042_v26  ;;  %v2052_v36 = vld [vmem:[%s3145_s2 + $0x64] ss:$16 sps:$4 sm:$0xff]   ;;  %v2054_v38 = vld [vmem:[%s3145_s2 + $0x60] ss:$16 sps:$4 sm:$0xff]  }
   0x9   :  { %51 = vadd.xlane.f32.xlu1 %v50_v27  ;;  %505 = vmatprep.subr.bf16.mxu1 %v2046_v31  ;;  %v2055_v37 = vld [vmem:[%s3146_s3 + $0x64] ss:$16 sps:$4 sm:$0xff]   ;;  %v2057_v39 = vld [vmem:[%s3146_s3 + $0x60] ss:$16 sps:$4 sm:$0xff]  }
   0xa   :  { %994 = vmatpush1.bf16.msra.mxu0 %v2045_v29  ;;  %v2058_v40 = vld [vmem:[%s3145_s2 + $0x84] ss:$16 sps:$4 sm:$0xff]   ;;  %v2060_v42 = vld [vmem:[%s3145_s2 + $0x80] ss:$16 sps:$4 sm:$0xff]  }
   0xb   :  { %995 = vmatprep.subr.bf16.mxu0 %v2049_v33  ;;  %v2061_v41 = vld [vmem:[%s3146_s3 + $0x84] ss:$16 sps:$4 sm:$0xff]   ;;  %v2063_v43 = vld [vmem:[%s3146_s3 + $0x80] ss:$16 sps:$4 sm:$0xff]  }
   0xc   :  { %48 = vadd.xlane.f32.xlu0 %v47_v30  ;;  %506 = vmatpush1.bf16.msra.mxu1 %v2048_v34  ;;  %v2064_v44 = vld [vmem:[%s3145_s2 + $0xa4] ss:$16 sps:$4 sm:$0xff]   ;;  %v2066_v46 = vld [vmem:[%s3145_s2 + $0xa0] ss:$16 sps:$4 sm:$0xff]  }
   0xd   :  { %54 = vadd.xlane.f32.xlu1 %v53_v32  ;;  %507 = vmatprep.subr.bf16.mxu1 %v2052_v36  ;;  %v2067_v45 = vld [vmem:[%s3146_s3 + $0xa4] ss:$16 sps:$4 sm:$0xff]   ;;  %v2069_v47 = vld [vmem:[%s3146_s3 + $0xa0] ss:$16 sps:$4 sm:$0xff]   ;;  %v2132_v32 = vld [vmem:[%s3145_s2 + $0xc] ss:$16 sps:$4 sm:$0xff]  }
   0xe   :  { %996 = vmatpush1.bf16.msra.mxu0 %v2051_v35  ;;  %v2070_v48 = vld [vmem:[%s3145_s2 + $0xc4] ss:$16 sps:$4 sm:$0xff]   ;;  %v2072_v50 = vld [vmem:[%s3145_s2 + $0xc0] ss:$16 sps:$4 sm:$0xff]  }
   0xf   :  { %997 = vmatprep.subr.bf16.mxu0 %v2055_v37  ;;  %v2073_v49 = vld [vmem:[%s3146_s3 + $0xc4] ss:$16 sps:$4 sm:$0xff]   ;;  %v2075_v51 = vld [vmem:[%s3146_s3 + $0xc0] ss:$16 sps:$4 sm:$0xff]  }
  0x10   :  { %508 = vmatpush1.bf16.msra.mxu1 %v2054_v38  ;;  %v2076_v52 = vld [vmem:[%s3145_s2 + $0xe4] ss:$16 sps:$4 sm:$0xff]   ;;  %v2078_v54 = vld [vmem:[%s3145_s2 + $0xe0] ss:$16 sps:$4 sm:$0xff]  }
  0x11   :  { %509 = vmatprep.subr.bf16.mxu1 %v2058_v40  ;;  %v2079_v53 = vld [vmem:[%s3146_s3 + $0xe4] ss:$16 sps:$4 sm:$0xff]   ;;  %v2081_v55 = vld [vmem:[%s3146_s3 + $0xe0] ss:$16 sps:$4 sm:$0xff]  }
  0x12   :  { %998 = vmatpush1.bf16.msra.mxu0 %v2057_v39  ;;  %v2082_v56 = vld [vmem:[%s3145_s2 + $0x104] ss:$16 sps:$4 sm:$0xff]   ;;  %v2084_v58 = vld [vmem:[%s3145_s2 + $0x100] ss:$16 sps:$4 sm:$0xff]  }
  0x13   :  { %999 = vmatprep.subr.bf16.mxu0 %v2061_v41  ;;  %v2085_v57 = vld [vmem:[%s3146_s3 + $0x104] ss:$16 sps:$4 sm:$0xff]   ;;  %v2087_v59 = vld [vmem:[%s3146_s3 + $0x100] ss:$16 sps:$4 sm:$0xff]  }
  0x14   :  { %510 = vmatpush1.bf16.msra.mxu1 %v2060_v42  ;;  %v2088_v60 = vld [vmem:[%s3145_s2 + $0x124] ss:$16 sps:$4 sm:$0xff]   ;;  %v2090_v62 = vld [vmem:[%s3145_s2 + $0x120] ss:$16 sps:$4 sm:$0xff]  }
  0x15   :  { %511 = vmatprep.subr.bf16.mxu1 %v2064_v44  ;;  %v2091_v61 = vld [vmem:[%s3146_s3 + $0x124] ss:$16 sps:$4 sm:$0xff]   ;;  %v2093_v63 = vld [vmem:[%s3146_s3 + $0x120] ss:$16 sps:$4 sm:$0xff]  }
  0x16   :  { %1000 = vmatpush1.bf16.msra.mxu0 %v2063_v43  ;;  %v2094_v0 = vld [vmem:[%s3145_s2 + $0x144] ss:$16 sps:$4 sm:$0xff]   ;;  %v2096_v2 = vld [vmem:[%s3145_s2 + $0x140] ss:$16 sps:$4 sm:$0xff]   ;;  %v79_v43 = vlaneseq }
  0x17   :  { %1001 = vmatprep.subr.bf16.mxu0 %v2067_v45  ;;  %v2097_v1 = vld [vmem:[%s3146_s3 + $0x144] ss:$16 sps:$4 sm:$0xff]   ;;  %v2099_v7 = vld [vmem:[%s3146_s3 + $0x140] ss:$16 sps:$4 sm:$0xff]  }
  0x18   :  { %512 = vmatpush1.bf16.msra.mxu1 %v2066_v46  ;;  %v2100_v12 = vld [vmem:[%s3145_s2 + $0x164] ss:$16 sps:$4 sm:$0xff]   ;;  %v2102_v13 = vld [vmem:[%s3145_s2 + $0x160] ss:$16 sps:$4 sm:$0xff]   ;;  %v80_v46 = vshrl.u32 %v79_v43, 7 }
  0x19   :  { %513 = vmatprep.subr.bf16.mxu1 %v2070_v48  ;;  %v2103_v14 = vld [vmem:[%s3146_s3 + $0x164] ss:$16 sps:$4 sm:$0xff]   ;;  %v2105_v15 = vld [vmem:[%s3146_s3 + $0x160] ss:$16 sps:$4 sm:$0xff]   ;;  %v2157_v43 = vld [vmem:[%s3145_s2 + $0x128] ss:$16 sps:$4 sm:$0xff]  }
  0x1a   :  { %1002 = vmatpush1.bf16.msra.mxu0 %v2069_v47  ;;  %v2106_v16 = vld [vmem:[%s3145_s2 + $0x184] ss:$16 sps:$4 sm:$0xff]   ;;  %v2108_v18 = vld [vmem:[%s3145_s2 + $0x180] ss:$16 sps:$4 sm:$0xff]   ;;  %v85_v47 = vsub.s32 1, %v80_v46  ;;  %v81_v48 = vsub.s32 0, %v80_v46 }
  0x1b   :  { %1003 = vmatprep.subr.bf16.mxu0 %v2073_v49  ;;  %v2109_v17 = vld [vmem:[%s3146_s3 + $0x184] ss:$16 sps:$4 sm:$0xff]   ;;  %v2111_v19 = vld [vmem:[%s3146_s3 + $0x180] ss:$16 sps:$4 sm:$0xff]   ;;  %v2160_v46 = vld [vmem:[%s3145_s2 + $0x148] ss:$16 sps:$4 sm:$0xff]  }
  0x1c   :  { %514 = vmatpush1.bf16.msra.mxu1 %v2072_v50  ;;  %v2112_v20 = vld [vmem:[%s3145_s2 + $0x1a4] ss:$16 sps:$4 sm:$0xff]   ;;  %v2114_v22 = vld [vmem:[%s3145_s2 + $0x1a0] ss:$16 sps:$4 sm:$0xff]  }
  0x1d   :  { %515 = vmatprep.subr.bf16.mxu1 %v2076_v52  ;;  %v2115_v21 = vld [vmem:[%s3146_s3 + $0x1a4] ss:$16 sps:$4 sm:$0xff]   ;;  %v2117_v23 = vld [vmem:[%s3146_s3 + $0x1a0] ss:$16 sps:$4 sm:$0xff]  }
  0x1e   :  { %1004 = vmatpush1.bf16.msra.mxu0 %v2075_v51  ;;  %v2118_v24 = vld [vmem:[%s3145_s2 + $0x1c4] ss:$16 sps:$4 sm:$0xff]   ;;  %v2120_v26 = vld [vmem:[%s3145_s2 + $0x1c0] ss:$16 sps:$4 sm:$0xff]  }
  0x1f   :  { %1005 = vmatprep.subr.bf16.mxu0 %v2079_v53  ;;  %v2121_v25 = vld [vmem:[%s3146_s3 + $0x1c4] ss:$16 sps:$4 sm:$0xff]   ;;  %v2123_v27 = vld [vmem:[%s3146_s3 + $0x1c0] ss:$16 sps:$4 sm:$0xff]  }
  0x20   :  { %516 = vmatpush1.bf16.msra.mxu1 %v2078_v54  ;;  %v2124_v28 = vld [vmem:[%s3145_s2 + $0x1e4] ss:$16 sps:$4 sm:$0xff]   ;;  %v2126_v30 = vld [vmem:[%s3145_s2 + $0x1e0] ss:$16 sps:$4 sm:$0xff]  }
  0x21   :  { %517 = vmatprep.subr.bf16.mxu1 %v2082_v56  ;;  %v2127_v29 = vld [vmem:[%s3146_s3 + $0x1e4] ss:$16 sps:$4 sm:$0xff]   ;;  %v2129_v31 = vld [vmem:[%s3146_s3 + $0x1e0] ss:$16 sps:$4 sm:$0xff]  }
  0x22   :  { %1006 = vmatpush1.bf16.msra.mxu0 %v2081_v55  ;;  %v77_v50 = vld [vmem:[%s3147_s1] sm:$0x3] }
  0x23   :  { %1007 = vmatprep.subr.bf16.mxu0 %v2085_v57  ;;  %v86_v54 = vrot.slane %v77_v50, %v85_v47  ;;  %v82_v56 = vrot.slane %v77_v50, %v81_v48  ;;  %v2165_v47 = vld [vmem:[%s3145_s2 + $0x16c] ss:$16 sps:$4 sm:$0xff]   ;;  %v2163_v48 = vld [vmem:[%s3145_s2 + $0x168] ss:$16 sps:$4 sm:$0xff]  }
  0x24   :  { %518 = vmatpush1.bf16.msra.mxu1 %v2084_v58  ;;  %v2166_v50 = vld [vmem:[%s3145_s2 + $0x188] ss:$16 sps:$4 sm:$0xff]  }
  0x25   :  { %519 = vmatprep.subr.bf16.mxu1 %v2088_v60 }
  0x26   :  { %1008 = vmatpush1.bf16.msra.mxu0 %v2087_v59 }
  0x27   :  { %1009 = vmatprep.subr.bf16.mxu0 %v2091_v61 }
  0x28   :  { %520 = vmatpush1.bf16.msra.mxu1 %v2090_v62 }
  0x29   :  { %521 = vmatprep.subr.bf16.mxu1 %v2094_v0 }
  0x2a   :  { %1010 = vmatpush1.bf16.msra.mxu0 %v2093_v63 }
  0x2b   :  { %1011 = vmatprep.subr.bf16.mxu0 %v2097_v1 }
  0x2c   :  { %522 = vmatpush1.bf16.msra.mxu1 %v2096_v2 }
  0x2d   :  { %523 = vmatprep.subr.bf16.mxu1 %v2100_v12 }
  0x2e   :  { %1012 = vmatpush1.bf16.msra.mxu0 %v2099_v7 }
  0x2f   :  { %1013 = vmatprep.subr.bf16.mxu0 %v2103_v14  ;;  %v2138_v14 = vld [vmem:[%s3145_s2 + $0x4c] ss:$16 sps:$4 sm:$0xff]  }
  0x30   :  { %524 = vmatpush1.bf16.msra.mxu1 %v2102_v13  ;;  %v2133_v13 = vld [vmem:[%s3145_s2 + $0x28] ss:$16 sps:$4 sm:$0xff]  }
  0x31   :  { %525 = vmatprep.subr.bf16.mxu1 %v2106_v16  ;;  %v2136_v16 = vld [vmem:[%s3145_s2 + $0x48] ss:$16 sps:$4 sm:$0xff]  }
  0x32   :  { %1014 = vmatpush1.bf16.msra.mxu0 %v2105_v15 }
  0x33   :  { %1015 = vmatprep.subr.bf16.mxu0 %v2109_v17  ;;  %v2141_v17 = vld [vmem:[%s3145_s2 + $0x6c] ss:$16 sps:$4 sm:$0xff]  }
  0x34   :  { %526 = vmatpush1.bf16.msra.mxu1 %v2108_v18  ;;  %v2139_v18 = vld [vmem:[%s3145_s2 + $0x68] ss:$16 sps:$4 sm:$0xff]  }
  0x35   :  { %527 = vmatprep.subr.bf16.mxu1 %v2112_v20  ;;  %v2226_v20 = vld [vmem:[%s3148_s4] ss:$8 sps:$4 sm:$0xff]  }
  0x36   :  { %1016 = vmatpush1.bf16.msra.mxu0 %v2111_v19  ;;  %v2144_v19 = vld [vmem:[%s3145_s2 + $0x8c] ss:$16 sps:$4 sm:$0xff]  }
  0x37   :  { %1017 = vmatprep.subr.bf16.mxu0 %v2115_v21  ;;  %v2228_v21 = vld [vmem:[%s3148_s4 + $0x4] ss:$8 sps:$4 sm:$0xff]  }
  0x38   :  { %528 = vmatpush1.bf16.msra.mxu1 %v2114_v22  ;;  %v2231_v22 = vld [vmem:[%s3148_s4 + $0x14] ss:$8 sps:$4 sm:$0xff]  }
  0x39   :  { %529 = vmatprep.subr.bf16.mxu1 %v2118_v24  ;;  %v2147_v24 = vld [vmem:[%s3145_s2 + $0xac] ss:$16 sps:$4 sm:$0xff]  }
  0x3a   :  { %1018 = vmatpush1.bf16.msra.mxu0 %v2117_v23  ;;  %v2142_v23 = vld [vmem:[%s3145_s2 + $0x88] ss:$16 sps:$4 sm:$0xff]  }
  0x3b   :  { %1019 = vmatprep.subr.bf16.mxu0 %v2121_v25  ;;  %v2229_v25 = vld [vmem:[%s3148_s4 + $0x10] ss:$8 sps:$4 sm:$0xff]  }
  0x3c   :  { %530 = vmatpush1.bf16.msra.mxu1 %v2120_v26  ;;  %v2234_v26 = vld [vmem:[%s3148_s4 + $0x24] ss:$8 sps:$4 sm:$0xff]  }
  0x3d   :  { %531 = vmatprep.subr.bf16.mxu1 %v2124_v28  ;;  %v2150_v28 = vld [vmem:[%s3145_s2 + $0xcc] ss:$16 sps:$4 sm:$0xff]  }
  0x3e   :  { %1020 = vmatpush1.bf16.msra.mxu0 %v2123_v27  ;;  %v2145_v27 = vld [vmem:[%s3145_s2 + $0xa8] ss:$16 sps:$4 sm:$0xff]  }
  0x3f   :  { %1021 = vmatprep.subr.bf16.mxu0 %v2127_v29  ;;  %v2232_v29 = vld [vmem:[%s3148_s4 + $0x20] ss:$8 sps:$4 sm:$0xff]  }
  0x40   :  { %532 = vmatpush1.bf16.msra.mxu1 %v2126_v30  ;;  %v2237_v30 = vld [vmem:[%s3148_s4 + $0x34] ss:$8 sps:$4 sm:$0xff]  }
  0x41   :  { %554 = vmatprep.subr.bf16.mxu1 %v2132_v32  ;;  %v2235_v32 = vld [vmem:[%s3148_s4 + $0x30] ss:$8 sps:$4 sm:$0xff]  }
  0x42   :  { %1022 = vmatpush1.bf16.msra.mxu0 %v2129_v31  ;;  %v2148_v31 = vld [vmem:[%s3145_s2 + $0xc8] ss:$16 sps:$4 sm:$0xff]  }
  0x43   :  { %1625 = vmatprep.subr.bf16.mxu0 %v2228_v21  ;;  %v2258_v21 = vld [vmem:[%s3148_s4 + $0xa4] ss:$8 sps:$4 sm:$0xff]  }
  0x95   :  { %v46_v33 = vpop.xlane.xlu0 %45 }
  0x96   :  { %v57_v34 = vmul.f32 0.00390625, %v46_v33  ;;  %v52_v35 = vpop.xlane.xlu1 %51  ;;  %v2153_v33 = vld [vmem:[%s3145_s2 + $0xec] ss:$16 sps:$4 sm:$0xff]  }
  0x97   :  { %v59_v36 = vmul.f32 0.00390625, %v52_v35  ;;  %v2151_v35 = vld [vmem:[%s3145_s2 + $0xe8] ss:$16 sps:$4 sm:$0xff]  }
  0x98   :  { %v61_v37 = vadd.f32 1e-06, %v57_v34  ;;  %v2240_v34 = vld [vmem:[%s3148_s4 + $0x44] ss:$8 sps:$4 sm:$0xff]  }
  0x99   :  { %v49_v38 = vpop.xlane.xlu0 %48  ;;  %v63_v39 = vadd.f32 1e-06, %v59_v36  ;;  %v2238_v36 = vld [vmem:[%s3148_s4 + $0x40] ss:$8 sps:$4 sm:$0xff]  }
  0x9a   :  { %2322 = vrsqrt.f32 %v61_v37  ;;  %v58_v40 = vmul.f32 0.00390625, %v49_v38  ;;  %v55_v41 = vpop.xlane.xlu1 %54  ;;  %v2156_v37 = vld [vmem:[%s3145_s2 + $0x10c] ss:$16 sps:$4 sm:$0xff]  }
  0x9b   :  { %2324 = vrsqrt.f32 %v63_v39  ;;  %v60_v42 = vmul.f32 0.00390625, %v55_v41  ;;  %v2243_v38 = vld [vmem:[%s3148_s4 + $0x54] ss:$8 sps:$4 sm:$0xff]   ;;  %v2154_v39 = vld [vmem:[%s3145_s2 + $0x108] ss:$16 sps:$4 sm:$0xff]  }
  0x9c   :  { %v62_v44 = vadd.f32 1e-06, %v58_v40  ;;  %v2241_v40 = vld [vmem:[%s3148_s4 + $0x50] ss:$8 sps:$4 sm:$0xff]   ;;  %v2159_v41 = vld [vmem:[%s3145_s2 + $0x12c] ss:$16 sps:$4 sm:$0xff]  }
  0x9d   :  { %v64_v45 = vadd.f32 1e-06, %v60_v42  ;;  %v2246_v42 = vld [vmem:[%s3148_s4 + $0x64] ss:$8 sps:$4 sm:$0xff]  }
  0x9e   :  { %2326 = vrsqrt.f32 %v62_v44  ;;  %v2244_v44 = vld [vmem:[%s3148_s4 + $0x60] ss:$8 sps:$4 sm:$0xff]  }
  0x9f   :  { %2328 = vrsqrt.f32 %v64_v45  ;;  %v2162_v45 = vld [vmem:[%s3145_s2 + $0x14c] ss:$16 sps:$4 sm:$0xff]  }
  0xa4   :  { %v2323_v49 = vpop.eup %2322 }
  0xa5   :  { %v2325_v51 = vpop.eup %2324  ;;  %v70_v53 = vmul.f32 %v2323_v49, %v2435_v4  ;;  %v69_v55 = vmul.f32 %v2323_v49, %v2433_v3  ;;  %v2168_v49 = vld [vmem:[%s3145_s2 + $0x18c] ss:$16 sps:$4 sm:$0xff]  }
  0xa6   :  { %v74_v52 = vmul.f32 %v2325_v51, %v2446_v9  ;;  %v73_v4 = vmul.f32 %v2325_v51, %v2444_v8  ;;  %v2171_v51 = vld [vmem:[%s3145_s2 + $0x1ac] ss:$16 sps:$4 sm:$0xff]  }
  0xa7   :  { %v90_v63 = vmul.f32 %v86_v54, %v70_v53  ;;  %v89_v1 = vmul.f32 %v82_v56, %v69_v55  ;;  %v2174_v53 = vld [vmem:[%s3145_s2 + $0x1cc] ss:$16 sps:$4 sm:$0xff]  }
  0xa8   :  { %v2327_v57 = vpop.eup %2326  ;;  %v94_v62 = vmul.f32 %v86_v54, %v74_v52  ;;  %v93_v8 = vmul.f32 %v82_v56, %v73_v4  ;;  %v2169_v52 = vld [vmem:[%s3145_s2 + $0x1a8] ss:$16 sps:$4 sm:$0xff]   ;;  %v2177_v55 = vld [vmem:[%s3145_s2 + $0x1ec] ss:$16 sps:$4 sm:$0xff]  }
  0xa9   :  { %v2329_v58 = vpop.eup %2328  ;;  %v72_v59 = vmul.f32 %v2327_v57, %v2439_v6  ;;  %v71_v60 = vmul.f32 %v2327_v57, %v2437_v5  ;;  %v2130_v6 = vld [vmem:[%s3145_s2 + $0x8] ss:$16 sps:$4 sm:$0xff]   ;;  %v2135_v5 = vld [vmem:[%s3145_s2 + $0x2c] ss:$16 sps:$4 sm:$0xff]  }
  0xaa   :  { %v76_v61 = vmul.f32 %v2329_v58, %v2450_v11  ;;  %v75_v7 = vmul.f32 %v2329_v58, %v2448_v10  ;;  %v2180_v57 = vld [vmem:[%s3146_s3 + $0xc] ss:$16 sps:$4 sm:$0xff]   ;;  %v2178_v58 = vld [vmem:[%s3146_s3 + $0x8] ss:$16 sps:$4 sm:$0xff]  }
  0xab   :  { %v92_v0 = vmul.f32 %v86_v54, %v72_v59  ;;  %v91_v2 = vmul.f32 %v82_v56, %v71_v60  ;;  %v2183_v59 = vld [vmem:[%s3146_s3 + $0x2c] ss:$16 sps:$4 sm:$0xff]   ;;  %v2181_v60 = vld [vmem:[%s3146_s3 + $0x28] ss:$16 sps:$4 sm:$0xff]  }
  0xac   :  { %v96_v9 = vmul.f32 %v86_v54, %v76_v61  ;;  %v95_v10 = vmul.f32 %v82_v56, %v75_v7  ;;  %v2172_v54 = vld [vmem:[%s3145_s2 + $0x1c8] ss:$16 sps:$4 sm:$0xff]   ;;  %v2186_v61 = vld [vmem:[%s3146_s3 + $0x4c] ss:$16 sps:$4 sm:$0xff]  }
  0xad   :  { %v2674_v3 = vpack.c.bf16 %v92_v0, %v90_v63  ;;  %v2679_v12 = vpack.c.bf16 %v91_v2, %v89_v1  ;;  %v2175_v56 = vld [vmem:[%s3145_s2 + $0x1e8] ss:$16 sps:$4 sm:$0xff]   ;;  %v2189_v63 = vld [vmem:[%s3146_s3 + $0x6c] ss:$16 sps:$4 sm:$0xff]  }
  0xae   :  { %v2684_v11 = vpack.c.bf16 %v96_v9, %v94_v62  ;;  %v2698_v15 = vpack.c.bf16 %v95_v10, %v93_v8  ;;  %v2184_v62 = vld [vmem:[%s3146_s3 + $0x48] ss:$16 sps:$4 sm:$0xff]   ;;  %v2192_v1 = vld [vmem:[%s3146_s3 + $0x8c] ss:$16 sps:$4 sm:$0xff]  }
  0xaf   :  { %533 = vmatprep.mubr.bf16.mxu1 %v2674_v3  ;;  %1023 = vmatprep.mubr.bf16.mxu0 %v2674_v3  ;;  %v2187_v0 = vld [vmem:[%s3146_s3 + $0x68] ss:$16 sps:$4 sm:$0xff]   ;;  %v2195_v9 = vld [vmem:[%s3146_s3 + $0xac] ss:$16 sps:$4 sm:$0xff]  }
  0xb0   :  { %534 = vmatmul.mubr.bf16.vlgmr.msra.gmra.mrb[0].mxu1 %v2679_v12  ;;  %1024 = vmatmul.mubr.bf16.vlgmr.msra.gmra.mrb[0].mxu0 %v2679_v12  ;;  %v2190_v2 = vld [vmem:[%s3146_s3 + $0x88] ss:$16 sps:$4 sm:$0xff]   ;;  %v2198_v7 = vld [vmem:[%s3146_s3 + $0xcc] ss:$16 sps:$4 sm:$0xff]  }
  0xb1   :  { %555 = vmatpush1.bf16.msra.mxu1 %v2130_v6  ;;  %543 = vmatprep.mubr.bf16.mxu1 %v2684_v11  ;;  %v2193_v4 = vld [vmem:[%s3146_s3 + $0xa8] ss:$16 sps:$4 sm:$0xff]   ;;  %v2201_v8 = vld [vmem:[%s3146_s3 + $0xec] ss:$16 sps:$4 sm:$0xff]  }
  0xb2   :  { %556 = vmatprep.subr.bf16.mxu1 %v2135_v5  ;;  %1033 = vmatprep.mubr.bf16.mxu0 %v2684_v11  ;;  %v2247_v6 = vld [vmem:[%s3148_s4 + $0x70] ss:$8 sps:$4 sm:$0xff]   ;;  %v2252_v10 = vld [vmem:[%s3148_s4 + $0x84] ss:$8 sps:$4 sm:$0xff]  }
  0xb3   :  { %1626 = vmatpush1.bf16.msra.mxu0 %v2226_v20  ;;  %v2196_v5 = vld [vmem:[%s3146_s3 + $0xc8] ss:$16 sps:$4 sm:$0xff]   ;;  %v2207_v20 = vld [vmem:[%s3146_s3 + $0x12c] ss:$16 sps:$4 sm:$0xff]  }
  0xb4   :  { %1627 = vmatprep.subr.bf16.mxu0 %v2231_v22  ;;  %v2256_v22 = vld [vmem:[%s3148_s4 + $0xa0] ss:$8 sps:$4 sm:$0xff]  }
  0xb5   :  { %557 = vmatpush1.bf16.msra.mxu1 %v2133_v13  ;;  %v2250_v13 = vld [vmem:[%s3148_s4 + $0x80] ss:$8 sps:$4 sm:$0xff]  }
  0xb6   :  { %558 = vmatprep.subr.bf16.mxu1 %v2138_v14  ;;  %v2199_v14 = vld [vmem:[%s3146_s3 + $0xe8] ss:$16 sps:$4 sm:$0xff]  }
  0xb7   :  { %1628 = vmatpush1.bf16.msra.mxu0 %v2229_v25  ;;  %v2261_v25 = vld [vmem:[%s3148_s4 + $0xb4] ss:$8 sps:$4 sm:$0xff]  }
  0xb8   :  { %544 = vmatmul.mubr.bf16.gmra.mrb[4].mxu1 %v2698_v15  ;;  %1034 = vmatmul.mubr.bf16.gmra.mrb[4].mxu0 %v2698_v15 }
  0xb9   :  { %559 = vmatpush1.bf16.msra.mxu1 %v2136_v16  ;;  %586 = vmatprep.mubr.bf16.mxu1 %v2674_v3  ;;  %v2204_v16 = vld [vmem:[%s3146_s3 + $0x10c] ss:$16 sps:$4 sm:$0xff]  }
  0xba   :  { %560 = vmatprep.subr.bf16.mxu1 %v2141_v17  ;;  %1629 = vmatprep.subr.bf16.mxu0 %v2234_v26  ;;  %v2255_v17 = vld [vmem:[%s3148_s4 + $0x94] ss:$8 sps:$4 sm:$0xff]   ;;  %v2259_v26 = vld [vmem:[%s3148_s4 + $0xb0] ss:$8 sps:$4 sm:$0xff]  }
  0xbb   :  { %1630 = vmatpush1.bf16.msra.mxu0 %v2232_v29  ;;  %v2264_v29 = vld [vmem:[%s3148_s4 + $0xc4] ss:$8 sps:$4 sm:$0xff]  }
  0xbc   :  { %1631 = vmatprep.subr.bf16.mxu0 %v2237_v30  ;;  %v2262_v30 = vld [vmem:[%s3148_s4 + $0xc0] ss:$8 sps:$4 sm:$0xff]  }
  0xbd   :  { %561 = vmatpush1.bf16.msra.mxu1 %v2139_v18  ;;  %v2253_v18 = vld [vmem:[%s3148_s4 + $0x90] ss:$8 sps:$4 sm:$0xff]  }
  0xbe   :  { %562 = vmatprep.subr.bf16.mxu1 %v2144_v19  ;;  %v2202_v19 = vld [vmem:[%s3146_s3 + $0x108] ss:$16 sps:$4 sm:$0xff]  }
  0xbf   :  { %1632 = vmatpush1.bf16.msra.mxu0 %v2235_v32  ;;  %v2216_v32 = vld [vmem:[%s3146_s3 + $0x18c] ss:$16 sps:$4 sm:$0xff]  }
  0xc0   :  { %1633 = vmatprep.subr.bf16.mxu0 %v2240_v34  ;;  %v2265_v34 = vld [vmem:[%s3148_s4 + $0xd0] ss:$8 sps:$4 sm:$0xff]  }
  0xc1   :  { %563 = vmatpush1.bf16.msra.mxu1 %v2142_v23  ;;  %v2205_v23 = vld [vmem:[%s3146_s3 + $0x128] ss:$16 sps:$4 sm:$0xff]  }
  0xc2   :  { %564 = vmatprep.subr.bf16.mxu1 %v2147_v24  ;;  %v2210_v24 = vld [vmem:[%s3146_s3 + $0x14c] ss:$16 sps:$4 sm:$0xff]  }
  0xc3   :  { %1634 = vmatpush1.bf16.msra.mxu0 %v2238_v36  ;;  %v2219_v36 = vld [vmem:[%s3146_s3 + $0x1ac] ss:$16 sps:$4 sm:$0xff]  }
  0xc4   :  { %1635 = vmatprep.subr.bf16.mxu0 %v2243_v38  ;;  %v2268_v38 = vld [vmem:[%s3148_s4 + $0xe0] ss:$8 sps:$4 sm:$0xff]  }
  0xc5   :  { %565 = vmatpush1.bf16.msra.mxu1 %v2145_v27  ;;  %v2208_v27 = vld [vmem:[%s3146_s3 + $0x148] ss:$16 sps:$4 sm:$0xff]  }
  0xc6   :  { %566 = vmatprep.subr.bf16.mxu1 %v2150_v28  ;;  %v2213_v28 = vld [vmem:[%s3146_s3 + $0x16c] ss:$16 sps:$4 sm:$0xff]  }
  0xc7   :  { %1636 = vmatpush1.bf16.msra.mxu0 %v2241_v40  ;;  %v2222_v40 = vld [vmem:[%s3146_s3 + $0x1cc] ss:$16 sps:$4 sm:$0xff]  }
  0xc8   :  { %1637 = vmatprep.subr.bf16.mxu0 %v2246_v42  ;;  %v2271_v42 = vld [vmem:[%s3148_s4 + $0xf0] ss:$8 sps:$4 sm:$0xff]  }
  0xc9   :  { %567 = vmatpush1.bf16.msra.mxu1 %v2148_v31  ;;  %v2211_v31 = vld [vmem:[%s3146_s3 + $0x168] ss:$16 sps:$4 sm:$0xff]  }
  0xca   :  { %568 = vmatprep.subr.bf16.mxu1 %v2153_v33  ;;  %v2267_v33 = vld [vmem:[%s3148_s4 + $0xd4] ss:$8 sps:$4 sm:$0xff]  }
  0xcb   :  { %1638 = vmatpush1.bf16.msra.mxu0 %v2244_v44  ;;  %v2225_v44 = vld [vmem:[%s3146_s3 + $0x1ec] ss:$16 sps:$4 sm:$0xff]  }
  0xcd   :  { %569 = vmatpush1.bf16.msra.mxu1 %v2151_v35  ;;  %v2214_v35 = vld [vmem:[%s3146_s3 + $0x188] ss:$16 sps:$4 sm:$0xff]  }
  0xce   :  { %570 = vmatprep.subr.bf16.mxu1 %v2156_v37  ;;  %v2270_v37 = vld [vmem:[%s3148_s4 + $0xe4] ss:$8 sps:$4 sm:$0xff]  }
  0xd1   :  { %571 = vmatpush1.bf16.msra.mxu1 %v2154_v39  ;;  %v2217_v39 = vld [vmem:[%s3146_s3 + $0x1a8] ss:$16 sps:$4 sm:$0xff]  }
  0xd2   :  { %572 = vmatprep.subr.bf16.mxu1 %v2159_v41  ;;  %v2273_v41 = vld [vmem:[%s3148_s4 + $0xf4] ss:$8 sps:$4 sm:$0xff]  }
  0xd5   :  { %573 = vmatpush1.bf16.msra.mxu1 %v2157_v43  ;;  %v2220_v43 = vld [vmem:[%s3146_s3 + $0x1c8] ss:$16 sps:$4 sm:$0xff]  }
  0xd6   :  { %574 = vmatprep.subr.bf16.mxu1 %v2162_v45  ;;  %v2223_v45 = vld [vmem:[%s3146_s3 + $0x1e8] ss:$16 sps:$4 sm:$0xff]  }
  0xd9   :  { %575 = vmatpush1.bf16.msra.mxu1 %v2160_v46  ;;  %v2276_v46 = vld [vmem:[%s3148_s4 + $0x104] ss:$8 sps:$4 sm:$0xff]  }
  0xda   :  { %576 = vmatprep.subr.bf16.mxu1 %v2165_v47 }
  0xdd   :  { %577 = vmatpush1.bf16.msra.mxu1 %v2163_v48 }
  0xde   :  { %578 = vmatprep.subr.bf16.mxu1 %v2168_v49 }
  0xe1   :  { %579 = vmatpush1.bf16.msra.mxu1 %v2166_v50 }
  0xe2   :  { %580 = vmatprep.subr.bf16.mxu1 %v2171_v51 }
  0xe5   :  { %581 = vmatpush1.bf16.msra.mxu1 %v2169_v52 }
  0xe6   :  { %582 = vmatprep.subr.bf16.mxu1 %v2174_v53 }
  0xe9   :  { %583 = vmatpush1.bf16.msra.mxu1 %v2172_v54 }
  0xea   :  { %584 = vmatprep.subr.bf16.mxu1 %v2177_v55 }
  0xed   :  { %585 = vmatpush1.bf16.msra.mxu1 %v2175_v56 }
  0xee   :  { %1044 = vmatprep.subr.bf16.mxu1 %v2180_v57 }
  0xf0   :  { %587 = vmatmul.mubr.bf16.vlgmr.msra.gmra.mrb[8].mxu1 %v2679_v12 }
  0xf1   :  { %596 = vmatprep.mubr.bf16.mxu1 %v2684_v11  ;;  %1045 = vmatpush1.bf16.msra.mxu1 %v2178_v58 }
  0xf2   :  { %1046 = vmatprep.subr.bf16.mxu1 %v2183_v59 }
  0xf5   :  { %1047 = vmatpush1.bf16.msra.mxu1 %v2181_v60 }
  0xf6   :  { %1048 = vmatprep.subr.bf16.mxu1 %v2186_v61 }
  0xf8   :  { %597 = vmatmul.mubr.bf16.gmra.mrb[12].mxu1 %v2698_v15 }
  0xf9   :  { %1049 = vmatpush1.bf16.msra.mxu1 %v2184_v62  ;;  %1076 = vmatprep.mubr.bf16.mxu1 %v2674_v3  ;;  %v2249_v3 = vld [vmem:[%s3148_s4 + $0x74] ss:$8 sps:$4 sm:$0xff]  }
  0xfa   :  { %1050 = vmatprep.subr.bf16.mxu1 %v2189_v63  ;;  %1639 = vmatprep.subr.bf16.mxu0 %v2249_v3 }
  0xfb   :  { %1640 = vmatpush1.bf16.msra.mxu0 %v2247_v6 }
  0xfc   :  { %1641 = vmatprep.subr.bf16.mxu0 %v2252_v10 }
  0xfd   :  { %1051 = vmatpush1.bf16.msra.mxu1 %v2187_v0 }
  0xfe   :  { %1052 = vmatprep.subr.bf16.mxu1 %v2192_v1 }
  0xff   :  { %1642 = vmatpush1.bf16.msra.mxu0 %v2250_v13 }
 0x100   :  { %1643 = vmatprep.subr.bf16.mxu0 %v2255_v17 }
 0x101   :  { %1053 = vmatpush1.bf16.msra.mxu1 %v2190_v2 }
 0x102   :  { %1054 = vmatprep.subr.bf16.mxu1 %v2195_v9 }
 0x103   :  { %1644 = vmatpush1.bf16.msra.mxu0 %v2253_v18 }
 0x104   :  { %1645 = vmatprep.subr.bf16.mxu0 %v2258_v21 }
 0x105   :  { %1055 = vmatpush1.bf16.msra.mxu1 %v2193_v4 }
 0x106   :  { %1056 = vmatprep.subr.bf16.mxu1 %v2198_v7 }
 0x107   :  { %1646 = vmatpush1.bf16.msra.mxu0 %v2256_v22 }
 0x108   :  { %1647 = vmatprep.subr.bf16.mxu0 %v2261_v25 }
 0x109   :  { %1057 = vmatpush1.bf16.msra.mxu1 %v2196_v5 }
 0x10a   :  { %1058 = vmatprep.subr.bf16.mxu1 %v2201_v8 }
 0x10b   :  { %1648 = vmatpush1.bf16.msra.mxu0 %v2259_v26 }
 0x10c   :  { %1649 = vmatprep.subr.bf16.mxu0 %v2264_v29 }
 0x10d   :  { %1059 = vmatpush1.bf16.msra.mxu1 %v2199_v14 }
 0x10e   :  { %1060 = vmatprep.subr.bf16.mxu1 %v2204_v16 }
 0x10f   :  { %1650 = vmatpush1.bf16.msra.mxu0 %v2262_v30 }
 0x110   :  { %1651 = vmatprep.subr.bf16.mxu0 %v2267_v33 }
 0x111   :  { %1061 = vmatpush1.bf16.msra.mxu1 %v2202_v19 }
 0x112   :  { %1062 = vmatprep.subr.bf16.mxu1 %v2207_v20 }
 0x113   :  { %1652 = vmatpush1.bf16.msra.mxu0 %v2265_v34 }
 0x114   :  { %1653 = vmatprep.subr.bf16.mxu0 %v2270_v37 }
 0x115   :  { %1063 = vmatpush1.bf16.msra.mxu1 %v2205_v23 }
 0x116   :  { %1064 = vmatprep.subr.bf16.mxu1 %v2210_v24 }
 0x117   :  { %1654 = vmatpush1.bf16.msra.mxu0 %v2268_v38  ;;  %v2274_v38 = vld [vmem:[%s3148_s4 + $0x100] ss:$8 sps:$4 sm:$0xff]  }
 0x118   :  { %1655 = vmatprep.subr.bf16.mxu0 %v2273_v41  ;;  %v2279_v41 = vld [vmem:[%s3148_s4 + $0x114] ss:$8 sps:$4 sm:$0xff]  }
 0x119   :  { %1065 = vmatpush1.bf16.msra.mxu1 %v2208_v27 }
 0x11a   :  { %1066 = vmatprep.subr.bf16.mxu1 %v2213_v28 }
 0x11b   :  { %1656 = vmatpush1.bf16.msra.mxu0 %v2271_v42 }
 0x11c   :  { %1678 = vmatprep.subr.bf16.mxu0 %v2276_v46 }
 0x11d   :  { %1067 = vmatpush1.bf16.msra.mxu1 %v2211_v31 }
 0x11e   :  { %1068 = vmatprep.subr.bf16.mxu1 %v2216_v32 }
 0x121   :  { %1069 = vmatpush1.bf16.msra.mxu1 %v2214_v35 }
 0x122   :  { %1070 = vmatprep.subr.bf16.mxu1 %v2219_v36 }
 0x125   :  { %1071 = vmatpush1.bf16.msra.mxu1 %v2217_v39 }
 0x126   :  { %1072 = vmatprep.subr.bf16.mxu1 %v2222_v40 }
 0x129   :  { %1073 = vmatpush1.bf16.msra.mxu1 %v2220_v43 }
 0x12a   :  { %1074 = vmatprep.subr.bf16.mxu1 %v2225_v44 }
 0x12d   :  { %1075 = vmatpush1.bf16.msra.mxu1 %v2223_v45 }
 0x130   :  { %1077 = vmatmul.mubr.bf16.vlgmr.msra.gmra.mrb[16].mxu1 %v2679_v12 }
 0x131   :  { %1086 = vmatprep.mubr.bf16.mxu1 %v2684_v11 }
 0x138   :  { %1087 = vmatmul.mubr.bf16.gmra.mrb[20].mxu1 %v2698_v15 }
 0x183   :  { %v535_v47 = vpop.f32.mrb[0].mxu1  ;;  %v1025_v48 = vpop.f32.mrb[0].mxu0 }
 0x184   :  { %v1938_v49 = vmul.f32 -1.442695, %v535_v47  ;;  %v537_v50 = vpop.f32.mrb[1].mxu1  ;;  %v1027_v51 = vpop.f32.mrb[1].mxu0 }
 0x185   :  { %v1939_v52 = vmul.f32 -1.442695, %v537_v50  ;;  %v539_v53 = vpop.f32.mrb[2].mxu1  ;;  %v1029_v54 = vpop.f32.mrb[2].mxu0 }
 0x186   :  { %2330 = vpow2.f32 %v1938_v49  ;;  %v1942_v55 = vmul.f32 -1.442695, %v539_v53  ;;  %v541_v12 = vpop.f32.mrb[3].mxu1  ;;  %v1031_v56 = vpop.f32.mrb[3].mxu0  ;;  %v2277_v49 = vld [vmem:[%s3148_s4 + $0x110] ss:$8 sps:$4 sm:$0xff]  }
 0x187   :  { %2332 = vpow2.f32 %v1939_v52  ;;  %v1943_v11 = vmul.f32 -1.442695, %v541_v12 }
 0x188   :  { %2334 = vpow2.f32 %v1942_v55  ;;  %v2280_v55 = vld [vmem:[%s3148_s4 + $0x120] ss:$8 sps:$4 sm:$0xff]  }
 0x189   :  { %2336 = vpow2.f32 %v1943_v11  ;;  %v2288_v11 = vld [vmem:[%s3148_s4 + $0x144] ss:$8 sps:$4 sm:$0xff]  }
 0x18b   :  { %v545_v15 = vpop.f32.mrb[4].mxu1  ;;  %v2986_v57 = vpop.f32.mrb[4].mxu0 }
 0x18c   :  { %v1946_v58 = vmul.f32 -1.442695, %v545_v15  ;;  %v547_v59 = vpop.f32.mrb[5].mxu1  ;;  %v2988_v60 = vpop.f32.mrb[5].mxu0 }
 0x18d   :  { %v1947_v61 = vmul.f32 -1.442695, %v547_v59  ;;  %v549_v62 = vpop.f32.mrb[6].mxu1  ;;  %v2990_v63 = vpop.f32.mrb[6].mxu0 }
 0x18e   :  { %2338 = vpow2.f32 %v1946_v58  ;;  %v1950_v0 = vmul.f32 -1.442695, %v549_v62  ;;  %v551_v1 = vpop.f32.mrb[7].mxu1  ;;  %v1041_v2 = vpop.f32.mrb[7].mxu0  ;;  %v2289_v58 = vld [vmem:[%s3148_s4 + $0x150] ss:$8 sps:$4 sm:$0xff]  }
 0x18f   :  { %2340 = vpow2.f32 %v1947_v61  ;;  %v1951_v9 = vmul.f32 -1.442695, %v551_v1  ;;  %v2297_v61 = vld [vmem:[%s3148_s4 + $0x174] ss:$8 sps:$4 sm:$0xff]  }
 0x190   :  { %v2331_v4 = vpop.eup %2330  ;;  %2342 = vpow2.f32 %v1950_v0 }
 0x191   :  { %v2333_v7 = vpop.eup %2332  ;;  %v1145_v3 = vadd.f32 1.0, %v2331_v4  ;;  %2344 = vpow2.f32 %v1951_v9  ;;  %v2298_v9 = vld [vmem:[%s3148_s4 + $0x180] ss:$8 sps:$4 sm:$0xff]  }
 0x192   :  { %v2335_v6 = vpop.eup %2334  ;;  %v1146_v5 = vadd.f32 1.0, %v2333_v7  ;;  %v2303_v7 = vld [vmem:[%s3148_s4 + $0x194] ss:$8 sps:$4 sm:$0xff]  }
 0x193   :  { %v2337_v8 = vpop.eup %2336  ;;  %2346 = vrcp.f32 %v1145_v3  ;;  %v1149_v10 = vadd.f32 1.0, %v2335_v6  ;;  %v2301_v3 = vld [vmem:[%s3148_s4 + $0x190] ss:$8 sps:$4 sm:$0xff]   ;;  %v2306_v6 = vld [vmem:[%s3148_s4 + $0x1a4] ss:$8 sps:$4 sm:$0xff]  }
 0x194   :  { %2348 = vrcp.f32 %v1146_v5  ;;  %v1150_v13 = vadd.f32 1.0, %v2337_v8 }
 0x195   :  { %2350 = vrcp.f32 %v1149_v10 }
 0x196   :  { %2352 = vrcp.f32 %v1150_v13  ;;  %v2304_v13 = vld [vmem:[%s3148_s4 + $0x1a0] ss:$8 sps:$4 sm:$0xff]  }
 0x198   :  { %v2339_v14 = vpop.eup %2338 }
 0x199   :  { %v2341_v16 = vpop.eup %2340  ;;  %v1153_v17 = vadd.f32 1.0, %v2339_v14 }
 0x19a   :  { %v2343_v18 = vpop.eup %2342  ;;  %v1154_v19 = vadd.f32 1.0, %v2341_v16  ;;  %v2309_v16 = vld [vmem:[%s3148_s4 + $0x1b4] ss:$8 sps:$4 sm:$0xff]  }
 0x19b   :  { %v2345_v20 = vpop.eup %2344  ;;  %2354 = vrcp.f32 %v1153_v17  ;;  %v1157_v21 = vadd.f32 1.0, %v2343_v18  ;;  %v2307_v17 = vld [vmem:[%s3148_s4 + $0x1b0] ss:$8 sps:$4 sm:$0xff]   ;;  %v2312_v18 = vld [vmem:[%s3148_s4 + $0x1c4] ss:$8 sps:$4 sm:$0xff]  }
 0x19c   :  { %2356 = vrcp.f32 %v1154_v19  ;;  %v1158_v22 = vadd.f32 1.0, %v2345_v20  ;;  %v2310_v19 = vld [vmem:[%s3148_s4 + $0x1c0] ss:$8 sps:$4 sm:$0xff]   ;;  %v2315_v20 = vld [vmem:[%s3148_s4 + $0x1d4] ss:$8 sps:$4 sm:$0xff]  }
 0x19d   :  { %v2347_v23 = vpop.eup %2346  ;;  %2358 = vrcp.f32 %v1157_v21  ;;  %v2313_v21 = vld [vmem:[%s3148_s4 + $0x1d0] ss:$8 sps:$4 sm:$0xff]  }
 0x19e   :  { %v2349_v24 = vpop.eup %2348  ;;  %v1193_v25 = vmul.f32 %v2347_v23, %v535_v47  ;;  %2360 = vrcp.f32 %v1158_v22  ;;  %v2318_v22 = vld [vmem:[%s3148_s4 + $0x1e4] ss:$8 sps:$4 sm:$0xff]   ;;  %v2316_v23 = vld [vmem:[%s3148_s4 + $0x1e0] ss:$8 sps:$4 sm:$0xff]  }
 0x19f   :  { %v2351_v26 = vpop.eup %2350  ;;  %v1194_v27 = vmul.f32 %v2349_v24, %v537_v50  ;;  %v2321_v24 = vld [vmem:[%s3148_s4 + $0x1f4] ss:$8 sps:$4 sm:$0xff]  }
 0x1a0   :  { %v2353_v28 = vpop.eup %2352  ;;  %v1209_v29 = vmul.f32 %v1193_v25, %v1025_v48  ;;  %v1197_v30 = vmul.f32 %v2351_v26, %v539_v53 }
 0x1a1   :  { %v1210_v31 = vmul.f32 %v1194_v27, %v1027_v51  ;;  %v1198_v32 = vmul.f32 %v2353_v28, %v541_v12  ;;  %v2282_v51 = vld [vmem:[%s3148_s4 + $0x124] ss:$8 sps:$4 sm:$0xff]   ;;  %v2285_v12 = vld [vmem:[%s3148_s4 + $0x134] ss:$8 sps:$4 sm:$0xff]   ;;  %v2319_v27 = vld [vmem:[%s3148_s4 + $0x1f0] ss:$8 sps:$4 sm:$0xff]  }
 0x1a2   :  { %v1213_v33 = vmul.f32 %v1197_v30, %v1029_v54 }
 0x1a3   :  { %v1214_v34 = vmul.f32 %v1198_v32, %v1031_v56  ;;  %v2283_v56 = vld [vmem:[%s3148_s4 + $0x130] ss:$8 sps:$4 sm:$0xff]  }
 0x1a4   :  { %v1225_v35 = vpack.c.bf16 %v1213_v33, %v1209_v29 }
 0x1a5   :  { %v2355_v36 = vpop.eup %2354  ;;  %v1226_v37 = vpack.c.bf16 %v1214_v34, %v1210_v31 }
 0x1a6   :  { %v2357_v39 = vpop.eup %2356  ;;  %v1201_v40 = vmul.f32 %v2355_v36, %v545_v15  ;;  %v2286_v15 = vld [vmem:[%s3148_s4 + $0x140] ss:$8 sps:$4 sm:$0xff]  }
 0x1a7   :  { %v2359_v42 = vpop.eup %2358  ;;  %v1202_v43 = vmul.f32 %v2357_v39, %v547_v59  ;;  %1657 = vmatprep.mubr.bf16.mxu0 %v1226_v37  ;;  %v2294_v59 = vld [vmem:[%s3148_s4 + $0x164] ss:$8 sps:$4 sm:$0xff]  }
 0x1a8   :  { %v2361_v44 = vpop.eup %2360  ;;  %v1205_v45 = vmul.f32 %v2359_v42, %v549_v62  ;;  %1658 = vmatmul.mubr.bf16.vlgmr.msra.gmra.mrb[8].mxu0 %v1225_v35  ;;  %v1217_v46 = vmul.f32 %v1201_v40, %v2986_v57  ;;  %v2291_v57 = vld [vmem:[%s3148_s4 + $0x154] ss:$8 sps:$4 sm:$0xff]   ;;  %v2295_v62 = vld [vmem:[%s3148_s4 + $0x170] ss:$8 sps:$4 sm:$0xff]  }
 0x1a9   :  { %v1206_v47 = vmul.f32 %v2361_v44, %v551_v1  ;;  %v1218_v48 = vmul.f32 %v1202_v43, %v2988_v60  ;;  %1679 = vmatpush1.bf16.msra.mxu0 %v2274_v38  ;;  %v2292_v60 = vld [vmem:[%s3148_s4 + $0x160] ss:$8 sps:$4 sm:$0xff]  }
 0x1aa   :  { %v1221_v50 = vmul.f32 %v1205_v45, %v2990_v63  ;;  %1680 = vmatprep.subr.bf16.mxu0 %v2279_v41  ;;  %v2300_v63 = vld [vmem:[%s3148_s4 + $0x184] ss:$8 sps:$4 sm:$0xff]  }
 0x1ab   :  { %v1222_v52 = vmul.f32 %v1206_v47, %v1041_v2 }
 0x1ac   :  { %v1229_v53 = vpack.c.bf16 %v1221_v50, %v1217_v46 }
 0x1ad   :  { %v1230_v54 = vpack.c.bf16 %v1222_v52, %v1218_v48  ;;  %1681 = vmatpush1.bf16.msra.mxu0 %v2277_v49 }
 0x1ae   :  { %1682 = vmatprep.subr.bf16.mxu0 %v2282_v51 }
 0x1af   :  { %1667 = vmatprep.mubr.bf16.mxu0 %v1230_v54 }
 0x1b0   :  { %1668 = vmatmul.mubr.bf16.gmra.mrb[12].mxu0 %v1229_v53 }
 0x1b1   :  { %1683 = vmatpush1.bf16.msra.mxu0 %v2280_v55 }
 0x1b2   :  { %1684 = vmatprep.subr.bf16.mxu0 %v2285_v12 }
 0x1b5   :  { %1685 = vmatpush1.bf16.msra.mxu0 %v2283_v56 }
 0x1b6   :  { %1686 = vmatprep.subr.bf16.mxu0 %v2288_v11 }
 0x1b9   :  { %1687 = vmatpush1.bf16.msra.mxu0 %v2286_v15 }
 0x1ba   :  { %1688 = vmatprep.subr.bf16.mxu0 %v2291_v57 }
 0x1bd   :  { %1689 = vmatpush1.bf16.msra.mxu0 %v2289_v58 }
 0x1be   :  { %1690 = vmatprep.subr.bf16.mxu0 %v2294_v59 }
 0x1c1   :  { %1691 = vmatpush1.bf16.msra.mxu0 %v2292_v60 }
 0x1c2   :  { %1692 = vmatprep.subr.bf16.mxu0 %v2297_v61 }
 0x1c3   :  { %v3043_v0 = vpop.f32.mrb[8].mxu1 }
 0x1c4   :  { %v3045_v1 = vpop.f32.mrb[9].mxu1  ;;  %v1940_v25 = vmul.f32 -1.442695, %v3043_v0 }
 0x1c5   :  { %v3047_v2 = vpop.f32.mrb[10].mxu1  ;;  %1693 = vmatpush1.bf16.msra.mxu0 %v2295_v62  ;;  %v1941_v26 = vmul.f32 -1.442695, %v3045_v1 }
 0x1c6   :  { %v3052_v4 = vpop.f32.mrb[11].mxu1  ;;  %1694 = vmatprep.subr.bf16.mxu0 %v2300_v63  ;;  %v1944_v28 = vmul.f32 -1.442695, %v3047_v2  ;;  %2362 = vpow2.f32 %v1940_v25 }
 0x1c7   :  { %v1945_v29 = vmul.f32 -1.442695, %v3052_v4  ;;  %2364 = vpow2.f32 %v1941_v26 }
 0x1c8   :  { %2366 = vpow2.f32 %v1944_v28 }
 0x1c9   :  { %1695 = vmatpush1.bf16.msra.mxu0 %v2298_v9  ;;  %2368 = vpow2.f32 %v1945_v29 }
 0x1ca   :  { %1696 = vmatprep.subr.bf16.mxu0 %v2303_v7 }
 0x1cb   :  { %v3063_v5 = vpop.f32.mrb[12].mxu1 }
 0x1cc   :  { %v3065_v8 = vpop.f32.mrb[13].mxu1  ;;  %v1948_v30 = vmul.f32 -1.442695, %v3063_v5 }
 0x1cd   :  { %v3067_v10 = vpop.f32.mrb[14].mxu1  ;;  %1697 = vmatpush1.bf16.msra.mxu0 %v2301_v3  ;;  %v1949_v31 = vmul.f32 -1.442695, %v3065_v8 }
 0x1ce   :  { %v3072_v14 = vpop.f32.mrb[15].mxu1  ;;  %1698 = vmatprep.subr.bf16.mxu0 %v2306_v6  ;;  %v1952_v32 = vmul.f32 -1.442695, %v3067_v10  ;;  %2370 = vpow2.f32 %v1948_v30 }
 0x1cf   :  { %v1953_v33 = vmul.f32 -1.442695, %v3072_v14  ;;  %2372 = vpow2.f32 %v1949_v31 }
 0x1d0   :  { %v2363_v34 = vpop.eup %2362  ;;  %2374 = vpow2.f32 %v1952_v32 }
 0x1d1   :  { %1699 = vmatpush1.bf16.msra.mxu0 %v2304_v13  ;;  %v2365_v35 = vpop.eup %2364  ;;  %2376 = vpow2.f32 %v1953_v33  ;;  %v1147_v38 = vadd.f32 1.0, %v2363_v34  ;;  %v1760_v33 = vld [vmem:[%s3144_s0 + $0x10] sm:$0xff] }
 0x1d2   :  { %1700 = vmatprep.subr.bf16.mxu0 %v2309_v16  ;;  %v2367_v36 = vpop.eup %2366  ;;  %v1148_v39 = vadd.f32 1.0, %v2365_v35 }
 0x1d3   :  { %v2369_v37 = vpop.eup %2368  ;;  %v1151_v40 = vadd.f32 1.0, %v2367_v36  ;;  %2378 = vrcp.f32 %v1147_v38  ;;  %v1761_v38 = vld [vmem:[%s3144_s0 + $0x18] sm:$0xff] }
 0x1d4   :  { %v1152_v41 = vadd.f32 1.0, %v2369_v37  ;;  %2380 = vrcp.f32 %v1148_v39  ;;  %v1766_v39 = vunpack.c.l.bf16 %v1760_v33 }
 0x1d5   :  { %1701 = vmatpush1.bf16.msra.mxu0 %v2307_v17  ;;  %2382 = vrcp.f32 %v1151_v40 }
 0x1d6   :  { %1702 = vmatprep.subr.bf16.mxu0 %v2312_v18  ;;  %2384 = vrcp.f32 %v1152_v41  ;;  %v1767_v41 = vunpack.c.h.bf16 %v1760_v33 }
 0x1d8   :  { %v2371_v42 = vpop.eup %2370 }
 0x1d9   :  { %1703 = vmatpush1.bf16.msra.mxu0 %v2310_v19  ;;  %v2373_v43 = vpop.eup %2372  ;;  %v1155_v46 = vadd.f32 1.0, %v2371_v42  ;;  %v1768_v42 = vunpack.c.l.bf16 %v1761_v38 }
 0x1da   :  { %1704 = vmatprep.subr.bf16.mxu0 %v2315_v20  ;;  %v2375_v44 = vpop.eup %2374  ;;  %v1156_v47 = vadd.f32 1.0, %v2373_v43 }
 0x1db   :  { %v2377_v45 = vpop.eup %2376  ;;  %v1159_v48 = vadd.f32 1.0, %v2375_v44  ;;  %2386 = vrcp.f32 %v1155_v46  ;;  %v1769_v44 = vunpack.c.h.bf16 %v1761_v38 }
 0x1dc   :  { %v1160_v49 = vadd.f32 1.0, %v2377_v45  ;;  %2388 = vrcp.f32 %v1156_v47 }
 0x1dd   :  { %1705 = vmatpush1.bf16.msra.mxu0 %v2313_v21  ;;  %v2379_v50 = vpop.eup %2378  ;;  %2390 = vrcp.f32 %v1159_v48 }
 0x1de   :  { %1706 = vmatprep.subr.bf16.mxu0 %v2318_v22  ;;  %v2381_v51 = vpop.eup %2380  ;;  %2392 = vrcp.f32 %v1160_v49  ;;  %v1195_v54 = vmul.f32 %v2379_v50, %v3043_v0 }
 0x1df   :  { %v2383_v52 = vpop.eup %2382  ;;  %v1196_v55 = vmul.f32 %v2381_v51, %v3045_v1 }
 0x1e0   :  { %v2385_v53 = vpop.eup %2384  ;;  %v1199_v56 = vmul.f32 %v2383_v52, %v3047_v2 }
 0x1e1   :  { %1707 = vmatpush1.bf16.msra.mxu0 %v2316_v23  ;;  %v1200_v57 = vmul.f32 %v2385_v53, %v3052_v4 }
 0x1e2   :  { %1708 = vmatprep.subr.bf16.mxu0 %v2321_v24 }
 0x1e5   :  { %1709 = vmatpush1.bf16.msra.mxu0 %v2319_v27  ;;  %v2387_v62 = vpop.eup %2386 }
 0x1e6   :  { %v2389_v9 = vpop.eup %2388  ;;  %v1203_v1 = vmul.f32 %v2387_v62, %v3063_v5  ;;  %v1758_v5 = vld [vmem:[%s3144_s0] sm:$0xff] }
 0x1e7   :  { %v2391_v3 = vpop.eup %2390  ;;  %v1204_v13 = vmul.f32 %v2389_v9, %v3065_v8  ;;  %v1759_v8 = vld [vmem:[%s3144_s0 + $0x8] sm:$0xff]  ;;  %v1763_v26 = vunpack.c.h.bf16 %v1758_v5 }
 0x1e8   :  { %v2393_v0 = vpop.eup %2392  ;;  %v1207_v16 = vmul.f32 %v2391_v3, %v3067_v10  ;;  %v1762_v10 = vunpack.c.l.bf16 %v1758_v5  ;;  %v1765_v28 = vunpack.c.h.bf16 %v1759_v8 }
 0x1e9   :  { %v1208_v18 = vmul.f32 %v2393_v0, %v3072_v14  ;;  %v1764_v14 = vunpack.c.l.bf16 %v1759_v8 }
 0x203   :  { %v1078_v12 = vpop.f32.mrb[16].mxu1 }
 0x204   :  { %v1211_v11 = vmul.f32 %v1195_v54, %v1078_v12  ;;  %v1080_v15 = vpop.f32.mrb[17].mxu1 }
 0x205   :  { %v1212_v58 = vmul.f32 %v1196_v55, %v1080_v15  ;;  %v1082_v59 = vpop.f32.mrb[18].mxu1 }
 0x206   :  { %v1215_v60 = vmul.f32 %v1199_v56, %v1082_v59  ;;  %v1084_v61 = vpop.f32.mrb[19].mxu1 }
 0x207   :  { %v1216_v63 = vmul.f32 %v1200_v57, %v1084_v61 }
 0x208   :  { %v1227_v7 = vpack.c.bf16 %v1215_v60, %v1211_v11 }
 0x209   :  { %v1228_v6 = vpack.c.bf16 %v1216_v63, %v1212_v58 }
 0x20b   :  { %v1088_v2 = vpop.f32.mrb[20].mxu1  ;;  %1710 = vmatprep.mubr.bf16.mxu0 %v1228_v6 }
 0x20c   :  { %v1219_v4 = vmul.f32 %v1203_v1, %v1088_v2  ;;  %v1090_v17 = vpop.f32.mrb[21].mxu1  ;;  %1711 = vmatmul.mubr.bf16.vlgmr.msra.gmra.mrb[8].mxu0 %v1227_v7 }
 0x20d   :  { %v1220_v19 = vmul.f32 %v1204_v13, %v1090_v17  ;;  %v1092_v20 = vpop.f32.mrb[22].mxu1 }
 0x20e   :  { %v1223_v21 = vmul.f32 %v1207_v16, %v1092_v20  ;;  %v1094_v22 = vpop.f32.mrb[23].mxu1 }
 0x20f   :  { %v1224_v23 = vmul.f32 %v1208_v18, %v1094_v22 }
 0x210   :  { %v1231_v24 = vpack.c.bf16 %v1223_v21, %v1219_v4 }
 0x211   :  { %v1232_v25 = vpack.c.bf16 %v1224_v23, %v1220_v19 }
 0x213   :  { %1720 = vmatprep.mubr.bf16.mxu0 %v1232_v25 }
 0x214   :  { %1721 = vmatmul.mubr.bf16.gmra.mrb[12].mxu0 %v1231_v24 }
 0x2df   :  { %v1712_v27 = vpop.f32.mrb[8].mxu0 }
 0x2e0   :  { %v1770_v29 = vadd.f32 %v1762_v10, %v1712_v27  ;;  %v1714_v30 = vpop.f32.mrb[9].mxu0 }
 0x2e1   :  { %v1771_v31 = vadd.f32 %v1763_v26, %v1714_v30  ;;  %v1716_v32 = vpop.f32.mrb[10].mxu0 }
 0x2e2   :  { %v1772_v34 = vadd.f32 %v1764_v14, %v1716_v32  ;;  %v1718_v35 = vpop.f32.mrb[11].mxu0 }
 0x2e3   :  { %v2022_v36 = vpack.c.bf16 %v1771_v31, %v1770_v29  ;;  %v1773_v37 = vadd.f32 %v1765_v28, %v1718_v35 }
 0x2e5   :  { %1802 = vst [vmem:[%s3149_s5] sm:$0xff] %v2022_v36  ;;  %v2023_v40 = vpack.c.bf16 %v1773_v37, %v1772_v34 }
 0x2e7   :  { %1803 = vst [vmem:[%s3149_s5 + $0x8] sm:$0xff] %v2023_v40  ;;  %v1722_v43 = vpop.f32.mrb[12].mxu0 }
 0x2e8   :  { %v1774_v45 = vadd.f32 %v1766_v39, %v1722_v43  ;;  %v1724_v46 = vpop.f32.mrb[13].mxu0 }
 0x2e9   :  { %v1775_v47 = vadd.f32 %v1767_v41, %v1724_v46  ;;  %v1726_v48 = vpop.f32.mrb[14].mxu0 }
 0x2ea   :  { %v1776_v49 = vadd.f32 %v1768_v42, %v1726_v48  ;;  %v1728_v50 = vpop.f32.mrb[15].mxu0 }
 0x2eb   :  { %v2024_v51 = vpack.c.bf16 %v1775_v47, %v1774_v45  ;;  %v1777_v52 = vadd.f32 %v1769_v44, %v1728_v50 }
 0x2ed   :  { %1804 = vst [vmem:[%s3149_s5 + $0x10] sm:$0xff] %v2024_v51  ;;  %v2025_v53 = vpack.c.bf16 %v1777_v52, %v1776_v49 }
 0x2ef   :  { %1805 = vst [vmem:[%s3149_s5 + $0x18] sm:$0xff] %v2025_v53 }

// kernel: baseline_llm_loss.17
= control target key start
LH: loop header
LB: loop body
LE: loop exit
PB: predicated region body
PF: predicated region fallthrough
CT: control target
= control target key end

     0   :  { %vm104_vm0 = vcmask 7168   ;;  %s1660_s0 = inlined_call_operand.vmem [shape: bf16[32,256], index: 0, kind: input, shape index: {}]   ;;  %s1661_s2 = inlined_call_operand.vmem [shape: bf16[256,512], index: 2, kind: input, shape index: {}]   ;;  %s1662_s1 = inlined_call_operand.vmem [shape: f32[1,256], index: 1, kind: input, shape index: {}]   ;;  %s1663_s3 = inlined_call_operand.vmem [shape: s32[32,1], index: 3, kind: input, shape index: {}]   ;;  %s1664_s5 = inlined_call_operand.vmem [shape: f32[32,1], index: 5, kind: output, shape index: {1}]   ;;  %s1665_s4 = inlined_call_operand.vmem [shape: f32[32,1], index: 4, kind: output, shape index: {0}]  }
   0x1   :  { %v23_v0 = vld [vmem:[%s1660_s0] sm:$0xff]  ;;  %v25_v1 = vld [vmem:[%s1660_s0 + $0x10] sm:$0xff]  ;;  %v24_v2 = vld [vmem:[%s1660_s0 + $0x8] sm:$0xff] }
   0x2   :  { %v1181_v3 = vunpack.c.l.bf16 %v23_v0  ;;  %v1183_v4 = vunpack.c.h.bf16 %v23_v0  ;;  %v1185_v5 = vunpack.c.l.bf16 %v25_v1  ;;  %v1187_v6 = vunpack.c.h.bf16 %v25_v1  ;;  %v26_v7 = vld [vmem:[%s1660_s0 + $0x18] sm:$0xff]  ;;  %v987_v12 = vld [vmem:[%s1661_s2 + $0x4] ss:$16 sps:$4 sm:$0xff]   ;;  %v991_v18 = vld [vmem:[%s1661_s2] ss:$16 sps:$4 sm:$0xff]  }
   0x3   :  { %v1192_v8 = vunpack.c.l.bf16 %v24_v2  ;;  %v1194_v9 = vunpack.c.h.bf16 %v24_v2  ;;  %v1196_v10 = vunpack.c.l.bf16 %v26_v7  ;;  %v1198_v11 = vunpack.c.h.bf16 %v26_v7  ;;  %v989_v17 = vld [vmem:[%s1661_s2 + $0xc] ss:$16 sps:$4 sm:$0xff]   ;;  %v992_v19 = vld [vmem:[%s1661_s2 + $0x8] ss:$16 sps:$4 sm:$0xff]   ;;  %505 = vmatprep.subr.bf16.mxu0 %v987_v12  ;;  %v993_v24 = vld [vmem:[%s1661_s2 + $0x24] ss:$16 sps:$4 sm:$0xff]  }
   0x4   :  { %v35_v13 = vmul.f32 %v1181_v3, %v1181_v3  ;;  %v36_v14 = vmul.f32 %v1183_v4, %v1183_v4  ;;  %v39_v15 = vmul.f32 %v1185_v5, %v1185_v5  ;;  %v40_v16 = vmul.f32 %v1187_v6, %v1187_v6  ;;  %558 = vmatprep.subr.bf16.mxu1 %v989_v17  ;;  %v995_v27 = vld [vmem:[%s1661_s2 + $0x2c] ss:$16 sps:$4 sm:$0xff]   ;;  %v997_v28 = vld [vmem:[%s1661_s2 + $0x20] ss:$16 sps:$4 sm:$0xff]   ;;  %v998_v29 = vld [vmem:[%s1661_s2 + $0x28] ss:$16 sps:$4 sm:$0xff]  }
   0x5   :  { %v37_v20 = vmul.f32 %v1192_v8, %v1192_v8  ;;  %v38_v21 = vmul.f32 %v1194_v9, %v1194_v9  ;;  %v41_v22 = vmul.f32 %v1196_v10, %v1196_v10  ;;  %v42_v23 = vmul.f32 %v1198_v11, %v1198_v11  ;;  %506 = vmatpush1.bf16.msra.mxu0 %v991_v18  ;;  %v999_v32 = vld [vmem:[%s1661_s2 + $0x44] ss:$16 sps:$4 sm:$0xff]   ;;  %v1001_v33 = vld [vmem:[%s1661_s2 + $0x4c] ss:$16 sps:$4 sm:$0xff]   ;;  %v1003_v34 = vld [vmem:[%s1661_s2 + $0x40] ss:$16 sps:$4 sm:$0xff]  }
   0x6   :  { %v43_v25 = vadd.f32 %v36_v14, %v35_v13  ;;  %v49_v26 = vadd.f32 %v40_v16, %v39_v15  ;;  %559 = vmatpush1.bf16.msra.mxu1 %v992_v19  ;;  %507 = vmatprep.subr.bf16.mxu0 %v993_v24  ;;  %v1004_v35 = vld [vmem:[%s1661_s2 + $0x48] ss:$16 sps:$4 sm:$0xff]   ;;  %v1005_v36 = vld [vmem:[%s1661_s2 + $0x64] ss:$16 sps:$4 sm:$0xff]   ;;  %v1007_v37 = vld [vmem:[%s1661_s2 + $0x6c] ss:$16 sps:$4 sm:$0xff]  }
   0x7   :  { %v46_v30 = vadd.f32 %v38_v21, %v37_v20  ;;  %v52_v31 = vadd.f32 %v42_v23, %v41_v22  ;;  %560 = vmatprep.subr.bf16.mxu1 %v995_v27  ;;  %v1009_v38 = vld [vmem:[%s1661_s2 + $0x60] ss:$16 sps:$4 sm:$0xff]   ;;  %v1010_v39 = vld [vmem:[%s1661_s2 + $0x68] ss:$16 sps:$4 sm:$0xff]   ;;  %v1011_v40 = vld [vmem:[%s1661_s2 + $0x84] ss:$16 sps:$4 sm:$0xff]  }
   0x8   :  { %44 = vadd.xlane.f32.xlu0 %v43_v25  ;;  %50 = vadd.xlane.f32.xlu1 %v49_v26  ;;  %v1013_v41 = vld [vmem:[%s1661_s2 + $0x8c] ss:$16 sps:$4 sm:$0xff]   ;;  %v1015_v42 = vld [vmem:[%s1661_s2 + $0x80] ss:$16 sps:$4 sm:$0xff]   ;;  %v1016_v43 = vld [vmem:[%s1661_s2 + $0x88] ss:$16 sps:$4 sm:$0xff]  }
   0x9   :  { %508 = vmatpush1.bf16.msra.mxu0 %v997_v28  ;;  %v1017_v44 = vld [vmem:[%s1661_s2 + $0xa4] ss:$16 sps:$4 sm:$0xff]   ;;  %v1019_v45 = vld [vmem:[%s1661_s2 + $0xac] ss:$16 sps:$4 sm:$0xff]   ;;  %v1021_v46 = vld [vmem:[%s1661_s2 + $0xa0] ss:$16 sps:$4 sm:$0xff]  }
   0xa   :  { %561 = vmatpush1.bf16.msra.mxu1 %v998_v29  ;;  %509 = vmatprep.subr.bf16.mxu0 %v999_v32  ;;  %v1022_v47 = vld [vmem:[%s1661_s2 + $0xa8] ss:$16 sps:$4 sm:$0xff]   ;;  %v1023_v48 = vld [vmem:[%s1661_s2 + $0xc4] ss:$16 sps:$4 sm:$0xff]   ;;  %v1025_v49 = vld [vmem:[%s1661_s2 + $0xcc] ss:$16 sps:$4 sm:$0xff]  }
   0xb   :  { %562 = vmatprep.subr.bf16.mxu1 %v1001_v33  ;;  %v1027_v50 = vld [vmem:[%s1661_s2 + $0xc0] ss:$16 sps:$4 sm:$0xff]   ;;  %v1028_v51 = vld [vmem:[%s1661_s2 + $0xc8] ss:$16 sps:$4 sm:$0xff]   ;;  %v1029_v52 = vld [vmem:[%s1661_s2 + $0xe4] ss:$16 sps:$4 sm:$0xff]  }
   0xc   :  { %47 = vadd.xlane.f32.xlu0 %v46_v30  ;;  %53 = vadd.xlane.f32.xlu1 %v52_v31  ;;  %v1031_v53 = vld [vmem:[%s1661_s2 + $0xec] ss:$16 sps:$4 sm:$0xff]   ;;  %v1033_v54 = vld [vmem:[%s1661_s2 + $0xe0] ss:$16 sps:$4 sm:$0xff]   ;;  %v1034_v55 = vld [vmem:[%s1661_s2 + $0xe8] ss:$16 sps:$4 sm:$0xff]  }
   0xd   :  { %510 = vmatpush1.bf16.msra.mxu0 %v1003_v34  ;;  %v1035_v56 = vld [vmem:[%s1661_s2 + $0x104] ss:$16 sps:$4 sm:$0xff]   ;;  %v1037_v57 = vld [vmem:[%s1661_s2 + $0x10c] ss:$16 sps:$4 sm:$0xff]   ;;  %v1039_v58 = vld [vmem:[%s1661_s2 + $0x100] ss:$16 sps:$4 sm:$0xff]  }
   0xe   :  { %563 = vmatpush1.bf16.msra.mxu1 %v1004_v35  ;;  %511 = vmatprep.subr.bf16.mxu0 %v1005_v36  ;;  %v1040_v59 = vld [vmem:[%s1661_s2 + $0x108] ss:$16 sps:$4 sm:$0xff]   ;;  %v1041_v60 = vld [vmem:[%s1661_s2 + $0x124] ss:$16 sps:$4 sm:$0xff]   ;;  %v1043_v61 = vld [vmem:[%s1661_s2 + $0x12c] ss:$16 sps:$4 sm:$0xff]  }
   0xf   :  { %564 = vmatprep.subr.bf16.mxu1 %v1007_v37  ;;  %v1045_v62 = vld [vmem:[%s1661_s2 + $0x120] ss:$16 sps:$4 sm:$0xff]   ;;  %v1046_v63 = vld [vmem:[%s1661_s2 + $0x128] ss:$16 sps:$4 sm:$0xff]   ;;  %v1047_v0 = vld [vmem:[%s1661_s2 + $0x144] ss:$16 sps:$4 sm:$0xff]  }
  0x10   :  { %v1049_v1 = vld [vmem:[%s1661_s2 + $0x14c] ss:$16 sps:$4 sm:$0xff]   ;;  %v1051_v2 = vld [vmem:[%s1661_s2 + $0x140] ss:$16 sps:$4 sm:$0xff]   ;;  %v1052_v7 = vld [vmem:[%s1661_s2 + $0x148] ss:$16 sps:$4 sm:$0xff]  }
  0x11   :  { %512 = vmatpush1.bf16.msra.mxu0 %v1009_v38  ;;  %v1053_v12 = vld [vmem:[%s1661_s2 + $0x164] ss:$16 sps:$4 sm:$0xff]   ;;  %v1055_v13 = vld [vmem:[%s1661_s2 + $0x16c] ss:$16 sps:$4 sm:$0xff]   ;;  %v1057_v14 = vld [vmem:[%s1661_s2 + $0x160] ss:$16 sps:$4 sm:$0xff]  }
  0x12   :  { %565 = vmatpush1.bf16.msra.mxu1 %v1010_v39  ;;  %513 = vmatprep.subr.bf16.mxu0 %v1011_v40  ;;  %v1058_v15 = vld [vmem:[%s1661_s2 + $0x168] ss:$16 sps:$4 sm:$0xff]   ;;  %v1059_v16 = vld [vmem:[%s1661_s2 + $0x184] ss:$16 sps:$4 sm:$0xff]   ;;  %v1061_v17 = vld [vmem:[%s1661_s2 + $0x18c] ss:$16 sps:$4 sm:$0xff]  }
  0x13   :  { %566 = vmatprep.subr.bf16.mxu1 %v1013_v41  ;;  %v1063_v18 = vld [vmem:[%s1661_s2 + $0x180] ss:$16 sps:$4 sm:$0xff]   ;;  %v1064_v19 = vld [vmem:[%s1661_s2 + $0x188] ss:$16 sps:$4 sm:$0xff]   ;;  %v1065_v20 = vld [vmem:[%s1661_s2 + $0x1a4] ss:$16 sps:$4 sm:$0xff]  }
  0x14   :  { %v1067_v21 = vld [vmem:[%s1661_s2 + $0x1ac] ss:$16 sps:$4 sm:$0xff]   ;;  %v1069_v22 = vld [vmem:[%s1661_s2 + $0x1a0] ss:$16 sps:$4 sm:$0xff]   ;;  %v1070_v23 = vld [vmem:[%s1661_s2 + $0x1a8] ss:$16 sps:$4 sm:$0xff]  }
  0x15   :  { %514 = vmatpush1.bf16.msra.mxu0 %v1015_v42  ;;  %v1071_v24 = vld [vmem:[%s1661_s2 + $0x1c4] ss:$16 sps:$4 sm:$0xff]   ;;  %v1073_v25 = vld [vmem:[%s1661_s2 + $0x1cc] ss:$16 sps:$4 sm:$0xff]   ;;  %v1075_v26 = vld [vmem:[%s1661_s2 + $0x1c0] ss:$16 sps:$4 sm:$0xff]   ;;  %v78_v42 = vlaneseq }
  0x16   :  { %567 = vmatpush1.bf16.msra.mxu1 %v1016_v43  ;;  %515 = vmatprep.subr.bf16.mxu0 %v1017_v44  ;;  %v1076_v27 = vld [vmem:[%s1661_s2 + $0x1c8] ss:$16 sps:$4 sm:$0xff]   ;;  %v1077_v28 = vld [vmem:[%s1661_s2 + $0x1e4] ss:$16 sps:$4 sm:$0xff]   ;;  %v1079_v29 = vld [vmem:[%s1661_s2 + $0x1ec] ss:$16 sps:$4 sm:$0xff]  }
  0x17   :  { %568 = vmatprep.subr.bf16.mxu1 %v1019_v45  ;;  %v1081_v30 = vld [vmem:[%s1661_s2 + $0x1e0] ss:$16 sps:$4 sm:$0xff]   ;;  %v1082_v31 = vld [vmem:[%s1661_s2 + $0x1e8] ss:$16 sps:$4 sm:$0xff]   ;;  %v79_v45 = vshrl.u32 %v78_v42, 7 }
  0x19   :  { %516 = vmatpush1.bf16.msra.mxu0 %v1021_v46  ;;  %v80_v46 = vsub.s32 0, %v79_v45 }
  0x1a   :  { %569 = vmatpush1.bf16.msra.mxu1 %v1022_v47  ;;  %517 = vmatprep.subr.bf16.mxu0 %v1023_v48  ;;  %v84_v47 = vsub.s32 1, %v79_v45 }
  0x1b   :  { %570 = vmatprep.subr.bf16.mxu1 %v1025_v49  ;;  %v76_v49 = vld [vmem:[%s1662_s1] sm:$0x3] }
  0x1d   :  { %518 = vmatpush1.bf16.msra.mxu0 %v1027_v50 }
  0x1e   :  { %571 = vmatpush1.bf16.msra.mxu1 %v1028_v51  ;;  %519 = vmatprep.subr.bf16.mxu0 %v1029_v52 }
  0x1f   :  { %572 = vmatprep.subr.bf16.mxu1 %v1031_v53  ;;  %v81_v53 = vrot.slane %v76_v49, %v80_v46 }
  0x21   :  { %520 = vmatpush1.bf16.msra.mxu0 %v1033_v54  ;;  %v85_v54 = vrot.slane %v76_v49, %v84_v47  ;;  %v613_v47 = vld [vmem:[%s1663_s3 + $0x10] sm:$0xff]  ;;  %v614_v49 = vld [vmem:[%s1663_s3 + $0x18] sm:$0xff] }
  0x22   :  { %573 = vmatpush1.bf16.msra.mxu1 %v1034_v55  ;;  %521 = vmatprep.subr.bf16.mxu0 %v1035_v56  ;;  %vm856_vm3 = vcmp.ne.s32.totalorder %v613_v47, 4294967196  ;;  %vm857_vm4 = vcmp.ne.s32.totalorder %v614_v49, 4294967196 }
  0x23   :  { %574 = vmatprep.subr.bf16.mxu1 %v1037_v57 }
  0x25   :  { %522 = vmatpush1.bf16.msra.mxu0 %v1039_v58 }
  0x26   :  { %575 = vmatpush1.bf16.msra.mxu1 %v1040_v59  ;;  %523 = vmatprep.subr.bf16.mxu0 %v1041_v60 }
  0x27   :  { %576 = vmatprep.subr.bf16.mxu1 %v1043_v61 }
  0x29   :  { %524 = vmatpush1.bf16.msra.mxu0 %v1045_v62 }
  0x2a   :  { %577 = vmatpush1.bf16.msra.mxu1 %v1046_v63  ;;  %525 = vmatprep.subr.bf16.mxu0 %v1047_v0 }
  0x2b   :  { %578 = vmatprep.subr.bf16.mxu1 %v1049_v1 }
  0x2d   :  { %526 = vmatpush1.bf16.msra.mxu0 %v1051_v2 }
  0x2e   :  { %579 = vmatpush1.bf16.msra.mxu1 %v1052_v7  ;;  %527 = vmatprep.subr.bf16.mxu0 %v1053_v12 }
  0x2f   :  { %580 = vmatprep.subr.bf16.mxu1 %v1055_v13  ;;  %v1139_v13 = vmov -1e+30  }
  0x30   :  { %105 = vst.msk [vmem:[#allocation3] sm:$0xff] %vm104_vm0, %v1139_v13  ;;  %106 = vst.msk [vmem:[#allocation3 + $0x8] sm:$0xff] %vm104_vm0, %v1139_v13 }
  0x31   :  { %528 = vmatpush1.bf16.msra.mxu0 %v1057_v14  ;;  %107 = vst.msk [vmem:[#allocation3 + $0x10] sm:$0xff] %vm104_vm0, %v1139_v13  ;;  %108 = vst.msk [vmem:[#allocation3 + $0x18] sm:$0xff] %vm104_vm0, %v1139_v13 }
  0x32   :  { %581 = vmatpush1.bf16.msra.mxu1 %v1058_v15  ;;  %529 = vmatprep.subr.bf16.mxu0 %v1059_v16 }
  0x33   :  { %582 = vmatprep.subr.bf16.mxu1 %v1061_v17 }
  0x35   :  { %530 = vmatpush1.bf16.msra.mxu0 %v1063_v18 }
  0x36   :  { %583 = vmatpush1.bf16.msra.mxu1 %v1064_v19  ;;  %531 = vmatprep.subr.bf16.mxu0 %v1065_v20 }
  0x37   :  { %584 = vmatprep.subr.bf16.mxu1 %v1067_v21 }
  0x39   :  { %532 = vmatpush1.bf16.msra.mxu0 %v1069_v22 }
  0x3a   :  { %585 = vmatpush1.bf16.msra.mxu1 %v1070_v23  ;;  %533 = vmatprep.subr.bf16.mxu0 %v1071_v24 }
  0x3b   :  { %586 = vmatprep.subr.bf16.mxu1 %v1073_v25 }
  0x3d   :  { %534 = vmatpush1.bf16.msra.mxu0 %v1075_v26 }
  0x3e   :  { %587 = vmatpush1.bf16.msra.mxu1 %v1076_v27  ;;  %535 = vmatprep.subr.bf16.mxu0 %v1077_v28 }
  0x3f   :  { %588 = vmatprep.subr.bf16.mxu1 %v1079_v29 }
  0x41   :  { %536 = vmatpush1.bf16.msra.mxu0 %v1081_v30 }
  0x42   :  { %589 = vmatpush1.bf16.msra.mxu1 %v1082_v31 }
  0x95   :  { %v45_v32 = vpop.xlane.xlu0 %44  ;;  %v51_v33 = vpop.xlane.xlu1 %50 }
  0x96   :  { %v56_v34 = vmul.f32 0.00390625, %v45_v32  ;;  %v58_v35 = vmul.f32 0.00390625, %v51_v33 }
  0x98   :  { %v60_v36 = vadd.f32 1e-06, %v56_v34  ;;  %v62_v37 = vadd.f32 1e-06, %v58_v35 }
  0x99   :  { %v48_v38 = vpop.xlane.xlu0 %47  ;;  %v54_v39 = vpop.xlane.xlu1 %53 }
  0x9a   :  { %1083 = vrsqrt.f32 %v60_v36  ;;  %v57_v40 = vmul.f32 0.00390625, %v48_v38  ;;  %v59_v41 = vmul.f32 0.00390625, %v54_v39 }
  0x9b   :  { %1085 = vrsqrt.f32 %v62_v37 }
  0x9c   :  { %v61_v43 = vadd.f32 1e-06, %v57_v40  ;;  %v63_v44 = vadd.f32 1e-06, %v59_v41  ;;  %v1140_v40 = vmov 0   ;;  %v1141_v41 = vmov 0.0  }
  0x9d   :  { %985 = vset.pattern.permute.xlu0 %v1140_v40  ;;  %986 = vset.pattern.permute.xlu1 %v1140_v40  ;;  %109 = vst.msk [vmem:[#allocation4] sm:$0xff] %vm104_vm0, %v1141_v41  ;;  %110 = vst.msk [vmem:[#allocation4 + $0x8] sm:$0xff] %vm104_vm0, %v1141_v41 }
  0x9e   :  { %1087 = vrsqrt.f32 %v61_v43  ;;  %111 = vst.msk [vmem:[#allocation4 + $0x10] sm:$0xff] %vm104_vm0, %v1141_v41  ;;  %112 = vst.msk [vmem:[#allocation4 + $0x18] sm:$0xff] %vm104_vm0, %v1141_v41  ;;  %v611_v43 = vld [vmem:[%s1663_s3] sm:$0xff] }
  0x9f   :  { %1089 = vrsqrt.f32 %v63_v44  ;;  %113 = vst.msk [vmem:[#allocation5] sm:$0xff] %vm104_vm0, %v1141_v41  ;;  %114 = vst.msk [vmem:[#allocation5 + $0x8] sm:$0xff] %vm104_vm0, %v1141_v41  ;;  %vm854_vm1 = vcmp.ne.s32.totalorder %v611_v43, 4294967196  ;;  %v612_v44 = vld [vmem:[%s1663_s3 + $0x8] sm:$0xff] }
  0xa0   :  { %115 = vst.msk [vmem:[#allocation5 + $0x10] sm:$0xff] %vm104_vm0, %v1141_v41  ;;  %116 = vst.msk [vmem:[#allocation5 + $0x18] sm:$0xff] %vm104_vm0, %v1141_v41  ;;  %v1486_v45 = vsel %vm854_vm1, 1.0, %v1141_v41  ;;  %vm855_vm2 = vcmp.ne.s32.totalorder %v612_v44, 4294967196 }
  0xa1   :  { %902 = vst.msk [vmem:[%s1664_s5] sm:$0xff] %vm104_vm0, %v1486_v45  ;;  %v1493_v46 = vsel %vm855_vm2, 1.0, %v1141_v41 }
  0xa2   :  { %903 = vst.msk [vmem:[%s1664_s5 + $0x8] sm:$0xff] %vm104_vm0, %v1493_v46 }
  0xa4   :  { %v1084_v48 = vpop.eup %1083 }
  0xa5   :  { %v1086_v50 = vpop.eup %1085  ;;  %v69_v52 = vmul.f32 %v1084_v48, %v1183_v4  ;;  %v68_v55 = vmul.f32 %v1084_v48, %v1181_v3  ;;  %v1503_v48 = vsel %vm856_vm3, 1.0, %v1141_v41 }
  0xa6   :  { %v73_v51 = vmul.f32 %v1086_v50, %v1187_v6  ;;  %v72_v12 = vmul.f32 %v1086_v50, %v1185_v5  ;;  %904 = vst.msk [vmem:[%s1664_s5 + $0x10] sm:$0xff] %vm104_vm0, %v1503_v48  ;;  %v1513_v50 = vsel %vm857_vm4, 1.0, %v1141_v41 }
  0xa7   :  { %v89_v62 = vmul.f32 %v85_v54, %v69_v52  ;;  %v88_v0 = vmul.f32 %v81_v53, %v68_v55  ;;  %905 = vst.msk [vmem:[%s1664_s5 + $0x18] sm:$0xff] %vm104_vm0, %v1513_v50 }
  0xa8   :  { %v1088_v56 = vpop.eup %1087  ;;  %v93_v61 = vmul.f32 %v85_v54, %v73_v51  ;;  %v1520_v51 = vld [vmem:[#allocation3] sm:$0xff] }
  0xa9   :  { %v1090_v57 = vpop.eup %1089  ;;  %v71_v58 = vmul.f32 %v1088_v56, %v1194_v9  ;;  %v70_v59 = vmul.f32 %v1088_v56, %v1192_v8  ;;  %v92_v8 = vmul.f32 %v81_v53, %v72_v12 }
  0xaa   :  { %v75_v60 = vmul.f32 %v1090_v57, %v1198_v11  ;;  %v74_v3 = vmul.f32 %v1090_v57, %v1196_v10 }
  0xab   :  { %v91_v63 = vmul.f32 %v85_v54, %v71_v58  ;;  %v90_v1 = vmul.f32 %v81_v53, %v70_v59  ;;  %v1540_v59 = vld [vmem:[#allocation3 + $0x10] sm:$0xff] }
  0xac   :  { %v95_v6 = vmul.f32 %v85_v54, %v75_v60  ;;  %v94_v9 = vmul.f32 %v81_v53, %v74_v3  ;;  %v1522_v53 = vld [vmem:[#allocation3 + $0x8] sm:$0xff] }
  0xad   :  { %v97_v2 = vpack.c.bf16 %v91_v63, %v89_v62  ;;  %v96_v4 = vpack.c.bf16 %v90_v1, %v88_v0 }
  0xae   :  { %v99_v7 = vpack.c.bf16 %v95_v6, %v93_v61  ;;  %v98_v11 = vpack.c.bf16 %v94_v9, %v92_v8  ;;  %v1542_v61 = vld [vmem:[#allocation3 + $0x18] sm:$0xff] }
  0xaf   :  { %537 = vmatprep.mubr.bf16.mxu0 %v97_v2  ;;  %590 = vmatprep.mubr.bf16.mxu1 %v97_v2 }
  0xb0   :  { %538 = vmatmul.mubr.bf16.vlgmr.msra.gmra.mrb[0].mxu0 %v96_v4  ;;  %591 = vmatmul.mubr.bf16.vlgmr.msra.gmra.mrb[0].mxu1 %v96_v4 }
  0xb1   :  { %547 = vmatprep.mubr.bf16.mxu0 %v99_v7  ;;  %600 = vmatprep.mubr.bf16.mxu1 %v99_v7 }
  0xb8   :  { %548 = vmatmul.mubr.bf16.gmra.mrb[4].mxu0 %v98_v11  ;;  %601 = vmatmul.mubr.bf16.gmra.mrb[4].mxu1 %v98_v11 }
 0x183   :  { %v1424_v5 = vpop.f32.mrb[0].mxu0  ;;  %v1426_v10 = vpop.f32.mrb[0].mxu1 }
 0x184   :  { %v1428_v14 = vpop.f32.mrb[1].mxu0  ;;  %v1430_v15 = vpop.f32.mrb[1].mxu1 }
 0x185   :  { %v707_v16 = vmax.f32 %v1424_v5, %v1428_v14  ;;  %v1434_v17 = vpop.f32.mrb[2].mxu0  ;;  %v1436_v18 = vpop.f32.mrb[2].mxu1 }
 0x186   :  { %v1438_v19 = vpop.f32.mrb[3].mxu0  ;;  %v1440_v20 = vpop.f32.mrb[3].mxu1 }
 0x187   :  { %v712_v21 = vmax.f32 %v1434_v17, %v1438_v19  ;;  %v708_v22 = vmax.f32 %v707_v16, %v1426_v10 }
 0x189   :  { %v709_v23 = vmax.f32 %v708_v22, %v1430_v15  ;;  %v713_v24 = vmax.f32 %v712_v21, %v1436_v18 }
 0x18b   :  { %v1447_v25 = vpop.f32.mrb[4].mxu1  ;;  %710 = vmax.xlane.f32.xlu0 %v709_v23  ;;  %v1449_v26 = vpop.f32.mrb[4].mxu0  ;;  %v714_v27 = vmax.f32 %v713_v24, %v1440_v20 }
 0x18c   :  { %v1452_v28 = vpop.f32.mrb[5].mxu0  ;;  %v1454_v29 = vpop.f32.mrb[5].mxu1 }
 0x18d   :  { %v717_v30 = vmax.f32 %v1449_v26, %v1452_v28  ;;  %v1458_v31 = vpop.f32.mrb[6].mxu1  ;;  %715 = vmax.xlane.f32.xlu1 %v714_v27  ;;  %v1460_v32 = vpop.f32.mrb[6].mxu0 }
 0x18e   :  { %v1462_v33 = vpop.f32.mrb[7].mxu0  ;;  %v1464_v34 = vpop.f32.mrb[7].mxu1 }
 0x18f   :  { %v722_v35 = vmax.f32 %v1460_v32, %v1462_v33  ;;  %v718_v36 = vmax.f32 %v717_v30, %v1447_v25 }
 0x191   :  { %v719_v37 = vmax.f32 %v718_v36, %v1454_v29  ;;  %v723_v38 = vmax.f32 %v722_v35, %v1458_v31  ;;  %v1569_v36 = vand.u32 127, %v78_v42 }
 0x193   :  { %720 = vmax.xlane.f32.xlu0 %v719_v37  ;;  %v724_v39 = vmax.f32 %v723_v38, %v1464_v34 }
 0x195   :  { %725 = vmax.xlane.f32.xlu1 %v724_v39 }
 0x218   :  { %v711_v52 = vpop.xlane.xlu0 %710 }
 0x219   :  { %v1525_v54 = vmax.f32 %v1520_v51, %v711_v52 }
 0x21a   :  { %v716_v55 = vpop.xlane.xlu1 %715 }
 0x21b   :  { %v731_v56 = vsub.f32 %v1520_v51, %v1525_v54  ;;  %847 = vst.msk [vmem:[#allocation3] sm:$0xff] %vm104_vm0, %v1525_v54  ;;  %v1532_v57 = vmax.f32 %v1522_v53, %v716_v55  ;;  %753 = vperm.xlu0 %985, %v1525_v54   ;;  %v1576_v55 = vadd.s32 128, %v1569_v36 }
 0x21d   :  { %v732_v58 = vsub.f32 %v1522_v53, %v1532_v57  ;;  %848 = vst.msk [vmem:[#allocation3 + $0x8] sm:$0xff] %vm104_vm0, %v1532_v57  ;;  %758 = vperm.xlu1 %986, %v1532_v57  }
 0x220   :  { %v721_v60 = vpop.xlane.xlu0 %720 }
 0x221   :  { %v1545_v62 = vmax.f32 %v1540_v59, %v721_v60 }
 0x222   :  { %v726_v63 = vpop.xlane.xlu1 %725 }
 0x223   :  { %v733_v0 = vsub.f32 %v1540_v59, %v1545_v62  ;;  %849 = vst.msk [vmem:[#allocation3 + $0x10] sm:$0xff] %vm104_vm0, %v1545_v62  ;;  %v1552_v1 = vmax.f32 %v1542_v61, %v726_v63  ;;  %763 = vperm.xlu1 %986, %v1545_v62   ;;  %v745_v59 = vld [vmem:[#allocation4 + $0x10] sm:$0xff] }
 0x225   :  { %v734_v6 = vsub.f32 %v1542_v61, %v1552_v1  ;;  %850 = vst.msk [vmem:[#allocation3 + $0x18] sm:$0xff] %vm104_vm0, %v1552_v1 }
 0x227   :  { %768 = vperm.xlu1 %986, %v1552_v1  }
 0x22b   :  { %631 = vperm.xlu1 %986, %v611_v43  }
 0x22f   :  { %634 = vperm.xlu1 %986, %v612_v44  }
 0x233   :  { %637 = vperm.xlu1 %986, %v613_v47  }
 0x237   :  { %640 = vperm.xlu1 %986, %v614_v49  }
 0x29a   :  { %v754_v2 = vpop.permute.xlu0 %753 }
 0x29b   :  { %v771_v4 = vsub.f32 %v1424_v5, %v754_v2  ;;  %v772_v7 = vsub.f32 %v1428_v14, %v754_v2  ;;  %v773_v12 = vsub.f32 %v1426_v10, %v754_v2  ;;  %v774_v3 = vsub.f32 %v1430_v15, %v754_v2 }
 0x29c   :  { %v759_v8 = vpop.permute.xlu1 %758 }
 0x29d   :  { %v787_v9 = vmul.f32 1.442695, %v771_v4  ;;  %v789_v11 = vmul.f32 1.442695, %v772_v7  ;;  %v791_v13 = vmul.f32 1.442695, %v773_v12  ;;  %v775_v16 = vsub.f32 %v1434_v17, %v759_v8 }
 0x29e   :  { %v793_v21 = vmul.f32 1.442695, %v774_v3  ;;  %v776_v22 = vsub.f32 %v1438_v19, %v759_v8  ;;  %v777_v23 = vsub.f32 %v1436_v18, %v759_v8  ;;  %v778_v24 = vsub.f32 %v1440_v20, %v759_v8 }
 0x29f   :  { %1091 = vpow2.f32 %v787_v9  ;;  %v795_v27 = vmul.f32 1.442695, %v775_v16  ;;  %v1583_v7 = vadd.s32 256, %v1569_v36  ;;  %v1586_v12 = vadd.s32 384, %v1569_v36 }
 0x2a0   :  { %1093 = vpow2.f32 %v789_v11  ;;  %v797_v30 = vmul.f32 1.442695, %v776_v22  ;;  %v799_v35 = vmul.f32 1.442695, %v777_v23  ;;  %v801_v37 = vmul.f32 1.442695, %v778_v24 }
 0x2a1   :  { %1095 = vpow2.f32 %v791_v13 }
 0x2a2   :  { %1097 = vpow2.f32 %v793_v21  ;;  %v764_v38 = vpop.permute.xlu1 %763 }
 0x2a3   :  { %1099 = vpow2.f32 %v795_v27  ;;  %v779_v39 = vsub.f32 %v1449_v26, %v764_v38  ;;  %v780_v40 = vsub.f32 %v1452_v28, %v764_v38  ;;  %v781_v41 = vsub.f32 %v1447_v25, %v764_v38 }
 0x2a4   :  { %1101 = vpow2.f32 %v797_v30  ;;  %v782_v43 = vsub.f32 %v1454_v29, %v764_v38 }
 0x2a5   :  { %1103 = vpow2.f32 %v799_v35  ;;  %v803_v44 = vmul.f32 1.442695, %v779_v39  ;;  %v805_v47 = vmul.f32 1.442695, %v780_v40  ;;  %v807_v49 = vmul.f32 1.442695, %v781_v41 }
 0x2a6   :  { %1105 = vpow2.f32 %v801_v37  ;;  %v809_v42 = vmul.f32 1.442695, %v782_v43  ;;  %v769_v52 = vpop.permute.xlu1 %768 }
 0x2a7   :  { %1107 = vpow2.f32 %v803_v44  ;;  %v783_v60 = vsub.f32 %v1460_v32, %v769_v52  ;;  %v784_v63 = vsub.f32 %v1462_v33, %v769_v52  ;;  %v785_v2 = vsub.f32 %v1458_v31, %v769_v52 }
 0x2a8   :  { %1109 = vpow2.f32 %v805_v47  ;;  %v786_v4 = vsub.f32 %v1464_v34, %v769_v52 }
 0x2a9   :  { %v1092_v3 = vpop.eup %1091  ;;  %1111 = vpow2.f32 %v807_v49  ;;  %v811_v8 = vmul.f32 1.442695, %v783_v60  ;;  %v813_v9 = vmul.f32 1.442695, %v784_v63  ;;  %v815_v11 = vmul.f32 1.442695, %v785_v2 }
 0x2aa   :  { %v1094_v13 = vpop.eup %1093  ;;  %1113 = vpow2.f32 %v809_v42  ;;  %v817_v16 = vmul.f32 1.442695, %v786_v4  ;;  %v632_v21 = vpop.permute.xlu1 %631 }
 0x2ab   :  { %v1096_v22 = vpop.eup %1095  ;;  %1115 = vpow2.f32 %v811_v8  ;;  %vm642_vm5 = vcmp.eq.s32.totalorder %v1569_v36, %v632_v21  ;;  %vm643_vm6 = vcmp.eq.s32.totalorder %v1576_v55, %v632_v21  ;;  %v819_v23 = vadd.f32 %v1094_v13, %v1092_v3 }
 0x2ac   :  { %v1098_v24 = vpop.eup %1097  ;;  %1117 = vpow2.f32 %v813_v9  ;;  %vm644_vm7 = vcmp.eq.s32.totalorder %v1583_v7, %v632_v21  ;;  %vm645_vm8 = vcmp.eq.s32.totalorder %v1586_v12, %v632_v21  ;;  %v658_v27 = vsel %vm642_vm5, %v1424_v5, 0.0 }
 0x2ad   :  { %v1100_v30 = vpop.eup %1099  ;;  %1119 = vpow2.f32 %v815_v11  ;;  %v820_v35 = vadd.f32 %v1096_v22, %v819_v23  ;;  %v659_v37 = vsel %vm643_vm6, %v1428_v14, 0.0  ;;  %v660_v38 = vsel %vm644_vm7, %v1426_v10, 0.0 }
 0x2ae   :  { %v1102_v39 = vpop.eup %1101  ;;  %1121 = vpow2.f32 %v817_v16  ;;  %v635_v40 = vpop.permute.xlu1 %634  ;;  %v661_v41 = vsel %vm645_vm8, %v1430_v15, 0.0  ;;  %v674_v43 = vadd.f32 %v659_v37, %v658_v27 }
 0x2af   :  { %v1104_v44 = vpop.eup %1103  ;;  %vm646_vm9 = vcmp.eq.s32.totalorder %v1569_v36, %v635_v40  ;;  %vm647_vm10 = vcmp.eq.s32.totalorder %v1576_v55, %v635_v40  ;;  %v821_v47 = vadd.f32 %v1098_v24, %v820_v35  ;;  %v824_v5 = vadd.f32 %v1102_v39, %v1100_v30 }
 0x2b0   :  { %v1106_v49 = vpop.eup %1105  ;;  %v675_v42 = vadd.f32 %v674_v43, %v660_v38  ;;  %vm648_vm11 = vcmp.eq.s32.totalorder %v1583_v7, %v635_v40  ;;  %vm649_vm12 = vcmp.eq.s32.totalorder %v1586_v12, %v635_v40  ;;  %v662_v10 = vsel %vm646_vm9, %v1434_v17, 0.0 }
 0x2b1   :  { %v1108_v14 = vpop.eup %1107  ;;  %822 = vadd.xlane.f32.xlu1 %v821_v47  ;;  %v825_v52 = vadd.f32 %v1104_v44, %v824_v5  ;;  %v663_v15 = vsel %vm647_vm10, %v1438_v19, 0.0  ;;  %v664_v60 = vsel %vm648_vm11, %v1436_v18, 0.0  ;;  %v665_v63 = vsel %vm649_vm12, %v1440_v20, 0.0 }
 0x2b2   :  { %v1110_v2 = vpop.eup %1109  ;;  %v638_v4 = vpop.permute.xlu1 %637  ;;  %v676_v3 = vadd.f32 %v675_v42, %v661_v41  ;;  %v679_v8 = vadd.f32 %v663_v15, %v662_v10 }
 0x2b3   :  { %v1112_v9 = vpop.eup %1111  ;;  %v826_v11 = vadd.f32 %v1106_v49, %v825_v52  ;;  %vm650_vm13 = vcmp.eq.s32.totalorder %v1569_v36, %v638_v4  ;;  %vm651_vm14 = vcmp.eq.s32.totalorder %v1576_v55, %v638_v4  ;;  %v829_v17 = vadd.f32 %v1110_v2, %v1108_v14  ;;  %v744_v49 = vld [vmem:[#allocation4 + $0x8] sm:$0xff]  ;;  %v626_v52 = vld [vmem:[#allocation5] sm:$0xff] }
 0x2b4   :  { %v1114_v13 = vpop.eup %1113  ;;  %v680_v16 = vadd.f32 %v679_v8, %v664_v60  ;;  %vm652_vm15 = vcmp.eq.s32.totalorder %v1583_v7, %v638_v4  ;;  %vm653_vm1 = vcmp.eq.s32.totalorder %v1586_v12, %v638_v4  ;;  %v666_v18 = vsel %vm650_vm13, %v1449_v26, 0.0  ;;  %v628_v8 = vld [vmem:[#allocation5 + $0x10] sm:$0xff] }
 0x2b5   :  { %v1116_v19 = vpop.eup %1115  ;;  %827 = vadd.xlane.f32.xlu0 %v826_v11  ;;  %v830_v20 = vadd.f32 %v1112_v9, %v829_v17  ;;  %v667_v21 = vsel %vm651_vm14, %v1452_v28, 0.0  ;;  %v668_v22 = vsel %vm652_vm15, %v1447_v25, 0.0  ;;  %v669_v23 = vsel %vm653_vm1, %v1454_v29, 0.0  ;;  %v627_v9 = vld [vmem:[#allocation5 + $0x8] sm:$0xff] }
 0x2b6   :  { %v1118_v24 = vpop.eup %1117  ;;  %v641_v27 = vpop.permute.xlu1 %640  ;;  %v681_v30 = vadd.f32 %v680_v16, %v665_v63  ;;  %v684_v35 = vadd.f32 %v667_v21, %v666_v18 }
 0x2b7   :  { %v1120_v37 = vpop.eup %1119  ;;  %vm654_vm2 = vcmp.eq.s32.totalorder %v1569_v36, %v641_v27  ;;  %vm655_vm3 = vcmp.eq.s32.totalorder %v1576_v55, %v641_v27  ;;  %v831_v38 = vadd.f32 %v1114_v13, %v830_v20  ;;  %v834_v26 = vadd.f32 %v1118_v24, %v1116_v19  ;;  %v629_v19 = vld [vmem:[#allocation5 + $0x18] sm:$0xff] }
 0x2b8   :  { %v1122_v39 = vpop.eup %1121  ;;  %v685_v40 = vadd.f32 %v684_v35, %v668_v22  ;;  %vm656_vm4 = vcmp.eq.s32.totalorder %v1583_v7, %v641_v27  ;;  %vm657_vm5 = vcmp.eq.s32.totalorder %v1586_v12, %v641_v27  ;;  %v670_v25 = vsel %vm654_vm2, %v1460_v32, 0.0  ;;  %v743_v12 = vld [vmem:[#allocation4] sm:$0xff] }
 0x2b9   :  { %832 = vadd.xlane.f32.xlu0 %v831_v38  ;;  %v835_v28 = vadd.f32 %v1120_v37, %v834_v26  ;;  %v671_v29 = vsel %vm655_vm3, %v1462_v33, 0.0  ;;  %v672_v41 = vsel %vm656_vm4, %v1458_v31, 0.0  ;;  %v673_v36 = vsel %vm657_vm5, %v1464_v34, 0.0  ;;  %v878_v27 = vld [vmem:[#allocation3] sm:$0xff] }
 0x2ba   :  { %v686_v43 = vadd.f32 %v685_v40, %v669_v23  ;;  %v689_v55 = vadd.f32 %v671_v29, %v670_v25  ;;  %v735_v32 = vmul.f32 1.442695, %v731_v56  ;;  %v737_v31 = vmul.f32 1.442695, %v732_v58 }
 0x2bb   :  { %v836_v44 = vadd.f32 %v1122_v39, %v835_v28  ;;  %v739_v33 = vmul.f32 1.442695, %v733_v0  ;;  %v741_v34 = vmul.f32 1.442695, %v734_v6  ;;  %v746_v6 = vld [vmem:[#allocation4 + $0x18] sm:$0xff]  ;;  %v879_v39 = vld [vmem:[#allocation3 + $0x8] sm:$0xff] }
 0x2bc   :  { %v690_v47 = vadd.f32 %v689_v55, %v672_v41  ;;  %1123 = vpow2.f32 %v735_v32 }
 0x2bd   :  { %837 = vadd.xlane.f32.xlu1 %v836_v44  ;;  %677 = vadd.xlane.f32.xlu0 %v676_v3  ;;  %1125 = vpow2.f32 %v737_v31  ;;  %v881_v31 = vld [vmem:[#allocation3 + $0x18] sm:$0xff] }
 0x2be   :  { %v691_v5 = vadd.f32 %v690_v47, %v673_v36  ;;  %1127 = vpow2.f32 %v739_v33 }
 0x2bf   :  { %1129 = vpow2.f32 %v741_v34 }
 0x2c1   :  { %682 = vadd.xlane.f32.xlu1 %v681_v30  ;;  %687 = vadd.xlane.f32.xlu0 %v686_v43  ;;  %v880_v43 = vld [vmem:[#allocation3 + $0x10] sm:$0xff] }
 0x2c5   :  { %692 = vadd.xlane.f32.xlu1 %v691_v5 }
 0x2c6   :  { %v1124_v7 = vpop.eup %1123 }
 0x2c7   :  { %v747_v51 = vmul.f32 %v1124_v7, %v743_v12  ;;  %v1126_v54 = vpop.eup %1125 }
 0x2c8   :  { %v748_v53 = vmul.f32 %v1126_v54, %v744_v49  ;;  %v1128_v57 = vpop.eup %1127 }
 0x2c9   :  { %v749_v0 = vmul.f32 %v1128_v57, %v745_v59  ;;  %v1130_v61 = vpop.eup %1129 }
 0x2ca   :  { %v750_v15 = vmul.f32 %v1130_v61, %v746_v6 }
 0x33e   :  { %v823_v56 = vpop.xlane.xlu1 %822 }
 0x33f   :  { %v839_v42 = vadd.f32 %v823_v56, %v747_v51 }
 0x341   :  { %843 = vst.msk [vmem:[#allocation4] sm:$0xff] %vm104_vm0, %v839_v42 }
 0x342   :  { %v828_v58 = vpop.xlane.xlu0 %827 }
 0x343   :  { %v840_v62 = vadd.f32 %v828_v58, %v748_v53 }
 0x345   :  { %844 = vst.msk [vmem:[#allocation4 + $0x8] sm:$0xff] %vm104_vm0, %v840_v62 }
 0x346   :  { %v833_v1 = vpop.xlane.xlu0 %832 }
 0x347   :  { %v841_v10 = vadd.f32 %v833_v1, %v749_v0 }
 0x348   :  { %v866_v14 = vld [vmem:[#allocation4] sm:$0xff] }
 0x349   :  { %1131 = vlog2.f32 %v866_v14  ;;  %845 = vst.msk [vmem:[#allocation4 + $0x10] sm:$0xff] %vm104_vm0, %v841_v10 }
 0x34a   :  { %v678_v60 = vpop.xlane.xlu0 %677  ;;  %v838_v63 = vpop.xlane.xlu1 %837 }
 0x34b   :  { %v694_v2 = vadd.f32 %v678_v60, %v626_v52  ;;  %v842_v4 = vadd.f32 %v838_v63, %v750_v15 }
 0x34c   :  { %v867_v3 = vld [vmem:[#allocation4 + $0x8] sm:$0xff] }
 0x34d   :  { %1133 = vlog2.f32 %v867_v3  ;;  %699 = vst.msk [vmem:[#allocation5] sm:$0xff] %vm104_vm0, %v694_v2  ;;  %846 = vst.msk [vmem:[#allocation4 + $0x18] sm:$0xff] %vm104_vm0, %v842_v4 }
 0x34e   :  { %v688_v11 = vpop.xlane.xlu0 %687  ;;  %v683_v17 = vpop.xlane.xlu1 %682 }
 0x34f   :  { %v696_v13 = vadd.f32 %v688_v11, %v628_v8  ;;  %v695_v16 = vadd.f32 %v683_v17, %v627_v9 }
 0x350   :  { %v868_v18 = vld [vmem:[#allocation4 + $0x10] sm:$0xff] }
 0x351   :  { %1135 = vlog2.f32 %v868_v18  ;;  %701 = vst.msk [vmem:[#allocation5 + $0x10] sm:$0xff] %vm104_vm0, %v696_v13  ;;  %700 = vst.msk [vmem:[#allocation5 + $0x8] sm:$0xff] %vm104_vm0, %v695_v16 }
 0x352   :  { %v693_v20 = vpop.xlane.xlu1 %692 }
 0x353   :  { %v1132_v21 = vpop.eup %1131  ;;  %v697_v22 = vadd.f32 %v693_v20, %v629_v19 }
 0x354   :  { %v871_v23 = vmul.f32 0.6931472, %v1132_v21  ;;  %v869_v24 = vld [vmem:[#allocation4 + $0x18] sm:$0xff]  ;;  %v886_v37 = vld [vmem:[#allocation5] sm:$0xff] }
 0x355   :  { %1137 = vlog2.f32 %v869_v24  ;;  %702 = vst.msk [vmem:[#allocation5 + $0x18] sm:$0xff] %vm104_vm0, %v697_v22 }
 0x356   :  { %v882_v30 = vadd.f32 %v878_v27, %v871_v23 }
 0x357   :  { %v1134_v35 = vpop.eup %1133 }
 0x358   :  { %v890_v38 = vsub.f32 %v882_v30, %v886_v37  ;;  %v873_v26 = vmul.f32 0.6931472, %v1134_v35  ;;  %v887_v40 = vld [vmem:[#allocation5 + $0x8] sm:$0xff]  ;;  %v888_v5 = vld [vmem:[#allocation5 + $0x10] sm:$0xff] }
 0x35a   :  { %v894_v25 = vmul.f32 %v1486_v45, %v890_v38  ;;  %v883_v28 = vadd.f32 %v879_v39, %v873_v26 }
 0x35b   :  { %v1136_v29 = vpop.eup %1135 }
 0x35c   :  { %898 = vst.msk [vmem:[%s1665_s4] sm:$0xff] %vm104_vm0, %v894_v25  ;;  %v875_v41 = vmul.f32 0.6931472, %v1136_v29  ;;  %v891_v36 = vsub.f32 %v883_v28, %v887_v40  ;;  %v889_v7 = vld [vmem:[#allocation5 + $0x18] sm:$0xff] }
 0x35e   :  { %v884_v55 = vadd.f32 %v880_v43, %v875_v41  ;;  %v895_v44 = vmul.f32 %v1493_v46, %v891_v36 }
 0x35f   :  { %v1138_v47 = vpop.eup %1137 }
 0x360   :  { %v892_v32 = vsub.f32 %v884_v55, %v888_v5  ;;  %899 = vst.msk [vmem:[%s1665_s4 + $0x8] sm:$0xff] %vm104_vm0, %v895_v44  ;;  %v877_v45 = vmul.f32 0.6931472, %v1138_v47 }
 0x362   :  { %v896_v33 = vmul.f32 %v1503_v48, %v892_v32  ;;  %v885_v34 = vadd.f32 %v881_v31, %v877_v45 }
 0x364   :  { %900 = vst.msk [vmem:[%s1665_s4 + $0x10] sm:$0xff] %vm104_vm0, %v896_v33  ;;  %v893_v46 = vsub.f32 %v885_v34, %v889_v7 }
 0x366   :  { %v897_v12 = vmul.f32 %v1513_v50, %v893_v46 }
 0x368   :  { %901 = vst.msk [vmem:[%s1665_s4 + $0x18] sm:$0xff] %vm104_vm0, %v897_v12 }

</bundles_post_ra>
